<compile_context>
chip_gen: v6e
topology: v6e:2x2x1
jax: 0.10.0
libtpu: 0.0.40
codegen_flags: <defaults>
</compile_context>

<pallas_src>
import jax
import jax.numpy as jnp
from jax.experimental import pallas as pl
from jax.experimental.pallas import tpu as pltpu

# ------------------------- model hyper-params (small demo sizes) -------------------------
B = 2                 # batch
C_IN = 3              # resnet18 expects 3 input channels
H = W = 16            # small spatial size for the demo
HW = H * W
NUM_FEATURES = 512    # resnet18 backbone feature dim (backbone.fc.in_features)
EMBEDDING_SIZE = 512
NUM_CLASSES = 10
LOGITS_PAD = 128      # lane-pad classifier output; sliced back to NUM_CLASSES outside
BN_EPS = 1e-5
KERNEL = 3
KDIM = C_IN * KERNEL * KERNEL   # im2col patch length = 27
KDIM_PAD = 32                   # 27 taps + 1 bias column + 4 zero columns


# ------------------------------------ Pallas kernel ---------------------------------------
def fused_kernel(patch_ref, pool_ref, cw_ref, w1_hbm, b1_ref, w2_hbm, b2_ref,
                 logits_ref, emb_ref, w1_vmem, w2_vmem, sem):
    """Fused backbone + embedding head + classifier (single invocation).

    patch_ref : (B*HW, KDIM_PAD) bf16  im2col patches; column 27 == 1.0 (bias fold)
    pool_ref  : (B, B*HW)        bf16  block-diagonal sum-pooling matrix (1/HW in w1)
    cw_ref    : (KDIM_PAD, NUM_FEATURES) bf16  conv weight; row 27 == conv bias
    w1_hbm    : (NUM_FEATURES, EMBEDDING_SIZE) bf16  HBM ref (BN + 1/HW folded in)
    b1_ref    : (1, EMBEDDING_SIZE) f32              folded bias
    w2_hbm    : (EMBEDDING_SIZE, LOGITS_PAD) bf16    HBM ref, classifier weight (padded)
    b2_ref    : (1, LOGITS_PAD) f32                  classifier bias (padded)
    logits_ref: (B, LOGITS_PAD) f32
    emb_ref   : (B, EMBEDDING_SIZE) f32
    w1_vmem / w2_vmem / sem : VMEM scratch + DMA semaphores for the overlapped fetch
    """
    # ---- kick off the big weight DMAs; they overlap the conv + pooling matmuls ----
    w1_cp = pltpu.make_async_copy(w1_hbm, w1_vmem, sem.at[0])
    w2_cp = pltpu.make_async_copy(w2_hbm, w2_vmem, sem.at[1])
    w1_cp.start()
    w2_cp.start()

    # ---- backbone: conv-as-matmul (bias folded into row 27) + ReLU ----
    y = jnp.maximum(
        jnp.dot(patch_ref[...], cw_ref[...], preferred_element_type=jnp.float32),
        0.0,
    ).astype(jnp.bfloat16)                                              # (B*HW, 512)

    # ---- global average pool as an MXU matmul (sum pooling; 1/HW folded into w1) ----
    f = jnp.dot(pool_ref[...], y, preferred_element_type=jnp.float32)   # (B, 512) f32

    # ---- embedding head: Linear (BN + 1/HW folded) + ReLU; Dropout = identity (eval) ----
    w1_cp.wait()
    e = jnp.maximum(
        jnp.dot(f.astype(jnp.bfloat16), w1_vmem[...],
                preferred_element_type=jnp.float32) + b1_ref[...],
        0.0,
    )                                                                    # (B, 512) f32
    emb_ref[...] = e

    # ---- classifier (lane-padded to 128 outputs for dense stores) ----
    w2_cp.wait()
    logits_ref[...] = (
        jnp.dot(e.astype(jnp.bfloat16), w2_vmem[...],
                preferred_element_type=jnp.float32) + b2_ref[...]
    )


# ------------------------------------ JAX-side glue ---------------------------------------
def _im2col_taps(x_nhwc):
    """(B, H, W, C) -> list of 9 shifted taps, each (B, H, W, C). padding=1, stride=1."""
    xp = jnp.pad(x_nhwc, ((0, 0), (1, 1), (1, 1), (0, 0)))
    return [xp[:, dy:dy + H, dx:dx + W, :] for dy in range(KERNEL) for dx in range(KERNEL)]


def init_params(key):
    ks = jax.random.split(key, 6)
    p = {}
    # "backbone" conv stem: 3x3, 3 -> 512 (rows ordered tap-major: (dy,dx) outer, c inner)
    p["conv_w"] = jax.random.normal(ks[0], (KDIM, NUM_FEATURES), jnp.float32) / jnp.sqrt(KDIM)
    p["conv_b"] = jnp.zeros((1, NUM_FEATURES), jnp.float32)
    # embedding: Linear(512 -> 512) + BatchNorm1d(512)
    p["w1"] = jax.random.normal(ks[1], (NUM_FEATURES, EMBEDDING_SIZE), jnp.float32) / jnp.sqrt(NUM_FEATURES)
    p["b1"] = jax.random.normal(ks[2], (1, EMBEDDING_SIZE), jnp.float32) * 0.01
    p["bn_gamma"] = jnp.ones((1, EMBEDDING_SIZE), jnp.float32)
    p["bn_beta"] = jnp.zeros((1, EMBEDDING_SIZE), jnp.float32)
    p["bn_mean"] = jax.random.normal(ks[3], (1, EMBEDDING_SIZE), jnp.float32) * 0.1
    p["bn_var"] = jnp.abs(jax.random.normal(ks[4], (1, EMBEDDING_SIZE), jnp.float32)) + 0.5
    # classifier: Linear(512 -> num_classes)
    p["w2"] = jax.random.normal(ks[5], (EMBEDDING_SIZE, NUM_CLASSES), jnp.float32) / jnp.sqrt(EMBEDDING_SIZE)
    p["b2"] = jnp.zeros((1, NUM_CLASSES), jnp.float32)
    return p


def prepare_params(p):
    """One-time host transform: BN + 1/HW fold into w1/b1, conv-bias fold into conv_w,
    pad ragged dims, bf16 matmul weights, build the sum-pooling matrix."""
    scale = p["bn_gamma"] * jax.lax.rsqrt(p["bn_var"] + BN_EPS)            # (1, E)
    w1f = (p["w1"] * scale * (1.0 / HW)).astype(jnp.bfloat16)              # BN + GAP-scale folded
    b1f = (p["b1"] - p["bn_mean"]) * scale + p["bn_beta"]                  # BN folded bias (f32)
    # conv bias folded as contraction row 27 (patch column 27 is a constant 1.0)
    conv_w = jnp.concatenate(
        [p["conv_w"], p["conv_b"],
         jnp.zeros((KDIM_PAD - KDIM - 1, NUM_FEATURES), jnp.float32)],
        axis=0,
    ).astype(jnp.bfloat16)                                                 # (32, 512)
    w2p = jnp.pad(p["w2"], ((0, 0), (0, LOGITS_PAD - NUM_CLASSES))).astype(jnp.bfloat16)
    b2p = jnp.pad(p["b2"], ((0, 0), (0, LOGITS_PAD - NUM_CLASSES)))
    # block-"diagonal" sum-pooling matrix (B, B*HW); the 1/HW scale lives in w1
    pool = jnp.repeat(jnp.eye(B, dtype=jnp.float32), HW, axis=1).astype(jnp.bfloat16)
    return {"conv_w": conv_w, "pool": pool,
            "w1": w1f, "b1": b1f, "w2": w2p, "b2": b2p}


_VMEM = pl.BlockSpec(memory_space=pltpu.MemorySpace.VMEM)
_HBM = pl.BlockSpec(memory_space=pl.ANY)      # raw HBM ref; kernel DMAs it manually


@jax.jit
def face_recognition_forward(x_nchw, prepped):
    """Returns (logits, embedding) matching FaceRecognitionModel.forward (eval mode)."""
    x_nhwc = jnp.transpose(x_nchw, (0, 2, 3, 1)).astype(jnp.float32)
    taps = _im2col_taps(x_nhwc)                                            # 9 x (B, H, W, C)
    ones = jnp.ones((B, H, W, 1), jnp.float32)                             # bias column
    zeros = jnp.zeros((B, H, W, KDIM_PAD - KDIM - 1), jnp.float32)         # K pad to 32
    patches = jnp.concatenate(taps + [ones, zeros], axis=-1)               # (B, H, W, 32)
    patches = patches.reshape(B * HW, KDIM_PAD).astype(jnp.bfloat16)       # single matmul LHS
    # (the pad/slice/concat/reshape/cast above fuse into one XLA fusion under jit)

    logits_pad, embedding = pl.pallas_call(
        fused_kernel,
        out_shape=(
            jax.ShapeDtypeStruct((B, LOGITS_PAD), jnp.float32),
            jax.ShapeDtypeStruct((B, EMBEDDING_SIZE), jnp.float32),
        ),
        in_specs=[
            _VMEM,   # patches      (32 KiB)
            _VMEM,   # pool matrix  (2 KiB)
            _VMEM,   # conv_w       (32 KiB)
            _HBM,    # w1 -> manual async copy (512 KiB)
            _VMEM,   # b1
            _HBM,    # w2 -> manual async copy (128 KiB)
            _VMEM,   # b2
        ],
        out_specs=(_VMEM, _VMEM),
        scratch_shapes=[
            pltpu.VMEM((NUM_FEATURES, EMBEDDING_SIZE), jnp.bfloat16),   # w1 landing buffer
            pltpu.VMEM((EMBEDDING_SIZE, LOGITS_PAD), jnp.bfloat16),    # w2 landing buffer
            pltpu.SemaphoreType.DMA((2,)),
        ],
    )(patches, prepped["pool"], prepped["conv_w"],
      prepped["w1"], prepped["b1"], prepped["w2"], prepped["b2"])

    return logits_pad[:, :NUM_CLASSES], embedding


def reference_forward(x_nchw, p):
    """Pure-JAX f32 reference of the same stand-in graph (unfused bias / BN / GAP)."""
    x_nhwc = jnp.transpose(x_nchw, (0, 2, 3, 1)).astype(jnp.float32)
    taps = _im2col_taps(x_nhwc)
    patches = jnp.concatenate(taps, axis=-1).reshape(B, HW, KDIM)
    y = jnp.maximum(jnp.einsum("bpk,kf->bpf", patches, p["conv_w"]) + p["conv_b"], 0.0)
    f = jnp.mean(y, axis=1)                                                # (B, 512)
    e = f @ p["w1"] + p["b1"]
    e = (e - p["bn_mean"]) * p["bn_gamma"] * jax.lax.rsqrt(p["bn_var"] + BN_EPS) + p["bn_beta"]
    e = jnp.maximum(e, 0.0)                                                # Dropout = identity (eval)
    logits = e @ p["w2"] + p["b2"]
    return logits, e


if __name__ == "__main__":
    key = jax.random.PRNGKey(0)
    k_x, k_p = jax.random.split(key)
    x = jax.random.normal(k_x, (B, C_IN, H, W), jnp.float32)   # NCHW like PyTorch
    params = init_params(k_p)
    prepped = prepare_params(params)                            # one-time host transform

    logits, embedding = face_recognition_forward(x, prepped)
    jax.block_until_ready((logits, embedding))

    assert logits.shape == (B, NUM_CLASSES)
    assert embedding.shape == (B, EMBEDDING_SIZE)
    assert bool(jnp.all(jnp.isfinite(logits))) and bool(jnp.all(jnp.isfinite(embedding)))

    # validate the bf16 kernel (and all the host-side folds) against the f32 reference
    ref_logits, ref_emb = reference_forward(x, params)
    assert bool(jnp.allclose(logits, ref_logits, rtol=5e-2, atol=5e-2))
    assert bool(jnp.allclose(embedding, ref_emb, rtol=5e-2, atol=5e-2))

    print("KERNEL_OK")
</pallas_src>

<mosaic_0001>
module attributes {stable_mosaic.version = 11 : i64} {
  func.func @fused_kernel(%arg0: memref<512x32xbf16, #tpu.memory_space<vmem>>, %arg1: memref<2x512xbf16, #tpu.memory_space<vmem>>, %arg2: memref<32x512xbf16, #tpu.memory_space<vmem>>, %arg3: memref<512x512xbf16, #tpu.memory_space<any>>, %arg4: memref<1x512xf32, #tpu.memory_space<vmem>>, %arg5: memref<512x128xbf16, #tpu.memory_space<any>>, %arg6: memref<1x128xf32, #tpu.memory_space<vmem>>, %arg7: memref<2x128xf32, #tpu.memory_space<vmem>>, %arg8: memref<2x512xf32, #tpu.memory_space<vmem>>, %arg9: memref<512x512xbf16, #tpu.memory_space<vmem>>, %arg10: memref<512x128xbf16, #tpu.memory_space<vmem>>, %arg11: memref<2x!tpu.dma_semaphore, #tpu.memory_space<semaphore_mem>>) attributes {dimension_semantics = [], scalar_prefetch = 0 : i64, scratch_operands = 3 : i64, tpu.core_type = #tpu.core_type<tc>} {
    %c0_i32 = arith.constant 0 : i32
    %0 = tpu.memref_slice %arg11[%c0_i32] : memref<2x!tpu.dma_semaphore, #tpu.memory_space<semaphore_mem>> -> memref<1x!tpu.dma_semaphore, #tpu.memory_space<semaphore_mem>>
    %1 = tpu.memref_squeeze %0 : memref<1x!tpu.dma_semaphore, #tpu.memory_space<semaphore_mem>> -> memref<!tpu.dma_semaphore, #tpu.memory_space<semaphore_mem>>
    tpu.enqueue_dma source(%arg3 : memref<512x512xbf16, #tpu.memory_space<any>>) target(%arg9 : memref<512x512xbf16, #tpu.memory_space<vmem>>) target_semaphore(%1 : memref<!tpu.dma_semaphore, #tpu.memory_space<semaphore_mem>>)
    %c1_i32 = arith.constant 1 : i32
    %2 = tpu.memref_slice %arg11[%c1_i32] : memref<2x!tpu.dma_semaphore, #tpu.memory_space<semaphore_mem>> -> memref<1x!tpu.dma_semaphore, #tpu.memory_space<semaphore_mem>>
    %3 = tpu.memref_squeeze %2 : memref<1x!tpu.dma_semaphore, #tpu.memory_space<semaphore_mem>> -> memref<!tpu.dma_semaphore, #tpu.memory_space<semaphore_mem>>
    tpu.enqueue_dma source(%arg5 : memref<512x128xbf16, #tpu.memory_space<any>>) target(%arg10 : memref<512x128xbf16, #tpu.memory_space<vmem>>) target_semaphore(%3 : memref<!tpu.dma_semaphore, #tpu.memory_space<semaphore_mem>>)
    %c0 = arith.constant 0 : index
    %c0_0 = arith.constant 0 : index
    %4 = vector.load %arg0[%c0, %c0_0] : memref<512x32xbf16, #tpu.memory_space<vmem>>, vector<512x32xbf16>
    %c0_1 = arith.constant 0 : index
    %c0_2 = arith.constant 0 : index
    %5 = vector.load %arg2[%c0_1, %c0_2] : memref<32x512xbf16, #tpu.memory_space<vmem>>, vector<32x512xbf16>
    %cst = arith.constant dense<0.000000e+00> : vector<512x512xf32>
    %6 = tpu.matmul %4, %5, %cst {dimension_numbers = #tpu.dot_dimension_numbers<[1], [0], [0], [1], [0, 0, 1, 1], [], []>} : vector<512x32xbf16>, vector<32x512xbf16>, vector<512x512xf32> -> vector<512x512xf32>
    %cst_3 = arith.constant 0.000000e+00 : f32
    %7 = vector.broadcast %cst_3 : f32 to vector<512x512xf32>
    %8 = arith.maximumf %6, %7 : vector<512x512xf32>
    %9 = arith.truncf %8 : vector<512x512xf32> to vector<512x512xbf16>
    %c0_4 = arith.constant 0 : index
    %c0_5 = arith.constant 0 : index
    %10 = vector.load %arg1[%c0_4, %c0_5] : memref<2x512xbf16, #tpu.memory_space<vmem>>, vector<2x512xbf16>
    %cst_6 = arith.constant dense<0.000000e+00> : vector<2x512xf32>
    %11 = tpu.matmul %10, %9, %cst_6 {dimension_numbers = #tpu.dot_dimension_numbers<[1], [0], [0], [1], [0, 0, 1, 1], [], []>} : vector<2x512xbf16>, vector<512x512xbf16>, vector<2x512xf32> -> vector<2x512xf32>
    %c0_i32_7 = arith.constant 0 : i32
    %12 = tpu.memref_slice %arg11[%c0_i32_7] : memref<2x!tpu.dma_semaphore, #tpu.memory_space<semaphore_mem>> -> memref<1x!tpu.dma_semaphore, #tpu.memory_space<semaphore_mem>>
    %13 = tpu.memref_squeeze %12 : memref<1x!tpu.dma_semaphore, #tpu.memory_space<semaphore_mem>> -> memref<!tpu.dma_semaphore, #tpu.memory_space<semaphore_mem>>
    tpu.wait_dma2 semaphore(%13 : memref<!tpu.dma_semaphore, #tpu.memory_space<semaphore_mem>>) src(%arg3 : memref<512x512xbf16, #tpu.memory_space<any>>) dst(%arg9 : memref<512x512xbf16, #tpu.memory_space<vmem>>)
    %14 = arith.truncf %11 : vector<2x512xf32> to vector<2x512xbf16>
    %c0_8 = arith.constant 0 : index
    %c0_9 = arith.constant 0 : index
    %15 = vector.load %arg9[%c0_8, %c0_9] : memref<512x512xbf16, #tpu.memory_space<vmem>>, vector<512x512xbf16>
    %cst_10 = arith.constant dense<0.000000e+00> : vector<2x512xf32>
    %16 = tpu.matmul %14, %15, %cst_10 {dimension_numbers = #tpu.dot_dimension_numbers<[1], [0], [0], [1], [0, 0, 1, 1], [], []>} : vector<2x512xbf16>, vector<512x512xbf16>, vector<2x512xf32> -> vector<2x512xf32>
    %c0_11 = arith.constant 0 : index
    %c0_12 = arith.constant 0 : index
    %17 = vector.load %arg4[%c0_11, %c0_12] : memref<1x512xf32, #tpu.memory_space<vmem>>, vector<1x512xf32>
    %18 = vector.broadcast %17 : vector<1x512xf32> to vector<2x512xf32>
    %19 = arith.addf %16, %18 : vector<2x512xf32>
    %cst_13 = arith.constant 0.000000e+00 : f32
    %20 = vector.broadcast %cst_13 : f32 to vector<2x512xf32>
    %21 = arith.maximumf %19, %20 : vector<2x512xf32>
    %c0_14 = arith.constant 0 : index
    %c0_15 = arith.constant 0 : index
    %22 = vector.load %arg8[%c0_14, %c0_15] : memref<2x512xf32, #tpu.memory_space<vmem>>, vector<2x512xf32>
    tpu.vector_store %arg8[%c0_14, %c0_15], %21 {strides = array<i32>} : memref<2x512xf32, #tpu.memory_space<vmem>>, vector<2x512xf32>,
    %c1_i32_16 = arith.constant 1 : i32
    %23 = tpu.memref_slice %arg11[%c1_i32_16] : memref<2x!tpu.dma_semaphore, #tpu.memory_space<semaphore_mem>> -> memref<1x!tpu.dma_semaphore, #tpu.memory_space<semaphore_mem>>
    %24 = tpu.memref_squeeze %23 : memref<1x!tpu.dma_semaphore, #tpu.memory_space<semaphore_mem>> -> memref<!tpu.dma_semaphore, #tpu.memory_space<semaphore_mem>>
    tpu.wait_dma2 semaphore(%24 : memref<!tpu.dma_semaphore, #tpu.memory_space<semaphore_mem>>) src(%arg5 : memref<512x128xbf16, #tpu.memory_space<any>>) dst(%arg10 : memref<512x128xbf16, #tpu.memory_space<vmem>>)
    %25 = arith.truncf %21 : vector<2x512xf32> to vector<2x512xbf16>
    %c0_17 = arith.constant 0 : index
    %c0_18 = arith.constant 0 : index
    %26 = vector.load %arg10[%c0_17, %c0_18] : memref<512x128xbf16, #tpu.memory_space<vmem>>, vector<512x128xbf16>
    %cst_19 = arith.constant dense<0.000000e+00> : vector<2x128xf32>
    %27 = tpu.matmul %25, %26, %cst_19 {dimension_numbers = #tpu.dot_dimension_numbers<[1], [0], [0], [1], [0, 0, 1, 1], [], []>} : vector<2x512xbf16>, vector<512x128xbf16>, vector<2x128xf32> -> vector<2x128xf32>
    %c0_20 = arith.constant 0 : index
    %c0_21 = arith.constant 0 : index
    %28 = vector.load %arg6[%c0_20, %c0_21] : memref<1x128xf32, #tpu.memory_space<vmem>>, vector<1x128xf32>
    %29 = vector.broadcast %28 : vector<1x128xf32> to vector<2x128xf32>
    %30 = arith.addf %27, %29 : vector<2x128xf32>
    %c0_22 = arith.constant 0 : index
    %c0_23 = arith.constant 0 : index
    %31 = vector.load %arg7[%c0_22, %c0_23] : memref<2x128xf32, #tpu.memory_space<vmem>>, vector<2x128xf32>
    tpu.vector_store %arg7[%c0_22, %c0_23], %30 {strides = array<i32>} : memref<2x128xf32, #tpu.memory_space<vmem>>, vector<2x128xf32>,
    return
  }
}

</mosaic_0001>

<bundles_post_ra>
// kernel: face_recognition_forward.1
= control target key start
LH: loop header
LB: loop body
LE: loop exit
PB: predicated region body
PF: predicated region fallthrough
CT: control target
= control target key end

     0   :  { %14 = vsyncpa [#allocation6], 0  ;;  %s5787_s0 = inlined_call_operand.vmem [shape: bf16[512,32], index: 0, kind: input, shape index: {}]   ;;  %s5788_s1 = inlined_call_operand.vmem [shape: bf16[2,512], index: 1, kind: input, shape index: {}]   ;;  %s5789_s2 = inlined_call_operand.vmem [shape: bf16[32,512], index: 2, kind: input, shape index: {}]   ;;  %s5790_s3 = inlined_call_operand.vmem [shape: bf16[512,512], index: 3, kind: input, shape index: {}]   ;;  %s5791_s4 = inlined_call_operand.vmem [shape: f32[1,512], index: 4, kind: input, shape index: {}]   ;;  %s5792_s5 = inlined_call_operand.vmem [shape: bf16[512,128], index: 5, kind: input, shape index: {}]   ;;  %s5793_s6 = inlined_call_operand.vmem [shape: f32[1,128], index: 6, kind: input, shape index: {}]   ;;  %s5794_s7 = inlined_call_operand.hbm [shape: f32[2,128], index: 7, kind: output, shape index: {0}]   ;;  %s5795_s8 = inlined_call_operand.hbm [shape: f32[2,512], index: 8, kind: output, shape index: {1}]  }
   0x1   :  { %15 = vsyncpa [#allocation8], 0  ;;  %v3974_v0 = vld [vmem:[%s5790_s3] sm:$0xff]  ;;  %v3979_v1 = vld [vmem:[%s5790_s3 + $0x8] sm:$0xff] }
   0x2   :  { %5928 = vst [vmem:[#allocation15_spill] sm:$0xff] %v3974_v0  ;;  %5929 = vst [vmem:[#allocation16_spill] sm:$0xff] %v3979_v1  ;;  %v3984_v2 = vld [vmem:[%s5790_s3 + $0x10] sm:$0xff]  ;;  %v3989_v3 = vld [vmem:[%s5790_s3 + $0x18] sm:$0xff] }
   0x3   :  { %5930 = vst [vmem:[#allocation17_spill] sm:$0xff] %v3984_v2  ;;  %5931 = vst [vmem:[#allocation18_spill] sm:$0xff] %v3989_v3  ;;  %v3994_v4 = vld [vmem:[%s5790_s3 + $0x20] sm:$0xff]  ;;  %v3999_v5 = vld [vmem:[%s5790_s3 + $0x28] sm:$0xff] }
   0x4   :  { %5932 = vst [vmem:[#allocation19_spill] sm:$0xff] %v3994_v4  ;;  %5933 = vst [vmem:[#allocation20_spill] sm:$0xff] %v3999_v5  ;;  %v4004_v6 = vld [vmem:[%s5790_s3 + $0x30] sm:$0xff]  ;;  %v4009_v7 = vld [vmem:[%s5790_s3 + $0x38] sm:$0xff] }
   0x5   :  { %5934 = vst [vmem:[#allocation21_spill] sm:$0xff] %v4004_v6  ;;  %5935 = vst [vmem:[#allocation22_spill] sm:$0xff] %v4009_v7  ;;  %v4014_v8 = vld [vmem:[%s5790_s3 + $0x40] sm:$0xff]  ;;  %v4019_v9 = vld [vmem:[%s5790_s3 + $0x48] sm:$0xff] }
   0x6   :  { %5936 = vst [vmem:[#allocation23_spill] sm:$0xff] %v4014_v8  ;;  %5937 = vst [vmem:[#allocation24_spill] sm:$0xff] %v4019_v9  ;;  %v4024_v10 = vld [vmem:[%s5790_s3 + $0x50] sm:$0xff]  ;;  %v4029_v11 = vld [vmem:[%s5790_s3 + $0x58] sm:$0xff] }
   0x7   :  { %5938 = vst [vmem:[#allocation25_spill] sm:$0xff] %v4024_v10  ;;  %5939 = vst [vmem:[#allocation26_spill] sm:$0xff] %v4029_v11  ;;  %v4034_v12 = vld [vmem:[%s5790_s3 + $0x60] sm:$0xff]  ;;  %v4039_v13 = vld [vmem:[%s5790_s3 + $0x68] sm:$0xff] }
   0x8   :  { %5940 = vst [vmem:[#allocation27_spill] sm:$0xff] %v4034_v12  ;;  %5941 = vst [vmem:[#allocation28_spill] sm:$0xff] %v4039_v13  ;;  %v4044_v14 = vld [vmem:[%s5790_s3 + $0x70] sm:$0xff]  ;;  %v4049_v15 = vld [vmem:[%s5790_s3 + $0x78] sm:$0xff] }
   0x9   :  { %5942 = vst [vmem:[#allocation29_spill] sm:$0xff] %v4044_v14  ;;  %5943 = vst [vmem:[#allocation30_spill] sm:$0xff] %v4049_v15  ;;  %v4054_v16 = vld [vmem:[%s5790_s3 + $0x80] sm:$0xff]  ;;  %v4059_v17 = vld [vmem:[%s5790_s3 + $0x88] sm:$0xff] }
   0xa   :  { %5944 = vst [vmem:[#allocation31_spill] sm:$0xff] %v4054_v16  ;;  %5945 = vst [vmem:[#allocation32_spill] sm:$0xff] %v4059_v17  ;;  %v4064_v18 = vld [vmem:[%s5790_s3 + $0x90] sm:$0xff]  ;;  %v4069_v19 = vld [vmem:[%s5790_s3 + $0x98] sm:$0xff] }
   0xb   :  { %5946 = vst [vmem:[#allocation33_spill] sm:$0xff] %v4064_v18  ;;  %5947 = vst [vmem:[#allocation34_spill] sm:$0xff] %v4069_v19  ;;  %v4074_v20 = vld [vmem:[%s5790_s3 + $0xa0] sm:$0xff]  ;;  %v4079_v21 = vld [vmem:[%s5790_s3 + $0xa8] sm:$0xff] }
   0xc   :  { %5948 = vst [vmem:[#allocation35_spill] sm:$0xff] %v4074_v20  ;;  %5949 = vst [vmem:[#allocation36_spill] sm:$0xff] %v4079_v21  ;;  %v4084_v22 = vld [vmem:[%s5790_s3 + $0xb0] sm:$0xff]  ;;  %v4089_v23 = vld [vmem:[%s5790_s3 + $0xb8] sm:$0xff] }
   0xd   :  { %5950 = vst [vmem:[#allocation37_spill] sm:$0xff] %v4084_v22  ;;  %5951 = vst [vmem:[#allocation38_spill] sm:$0xff] %v4089_v23  ;;  %v4094_v24 = vld [vmem:[%s5790_s3 + $0xc0] sm:$0xff]  ;;  %v4099_v25 = vld [vmem:[%s5790_s3 + $0xc8] sm:$0xff] }
   0xe   :  { %5952 = vst [vmem:[#allocation39_spill] sm:$0xff] %v4094_v24  ;;  %5953 = vst [vmem:[#allocation40_spill] sm:$0xff] %v4099_v25  ;;  %v4104_v26 = vld [vmem:[%s5790_s3 + $0xd0] sm:$0xff]  ;;  %v4109_v27 = vld [vmem:[%s5790_s3 + $0xd8] sm:$0xff] }
   0xf   :  { %5954 = vst [vmem:[#allocation41_spill] sm:$0xff] %v4104_v26  ;;  %5955 = vst [vmem:[#allocation42_spill] sm:$0xff] %v4109_v27  ;;  %v4114_v28 = vld [vmem:[%s5790_s3 + $0xe0] sm:$0xff]  ;;  %v4119_v29 = vld [vmem:[%s5790_s3 + $0xe8] sm:$0xff] }
  0x10   :  { %5956 = vst [vmem:[#allocation43_spill] sm:$0xff] %v4114_v28  ;;  %5957 = vst [vmem:[#allocation44_spill] sm:$0xff] %v4119_v29  ;;  %v4124_v30 = vld [vmem:[%s5790_s3 + $0xf0] sm:$0xff]  ;;  %v4129_v31 = vld [vmem:[%s5790_s3 + $0xf8] sm:$0xff] }
  0x11   :  { %5958 = vst [vmem:[#allocation45_spill] sm:$0xff] %v4124_v30  ;;  %5959 = vst [vmem:[#allocation46_spill] sm:$0xff] %v4129_v31  ;;  %v4134_v32 = vld [vmem:[%s5790_s3 + $0x100] sm:$0xff]  ;;  %v4139_v33 = vld [vmem:[%s5790_s3 + $0x108] sm:$0xff] }
  0x12   :  { %5960 = vst [vmem:[#allocation47_spill] sm:$0xff] %v4134_v32  ;;  %5961 = vst [vmem:[#allocation48_spill] sm:$0xff] %v4139_v33  ;;  %v4144_v34 = vld [vmem:[%s5790_s3 + $0x110] sm:$0xff]  ;;  %v4149_v35 = vld [vmem:[%s5790_s3 + $0x118] sm:$0xff] }
  0x13   :  { %5962 = vst [vmem:[#allocation49_spill] sm:$0xff] %v4144_v34  ;;  %5963 = vst [vmem:[#allocation50_spill] sm:$0xff] %v4149_v35  ;;  %v4154_v36 = vld [vmem:[%s5790_s3 + $0x120] sm:$0xff]  ;;  %v4159_v37 = vld [vmem:[%s5790_s3 + $0x128] sm:$0xff] }
  0x14   :  { %5964 = vst [vmem:[#allocation51_spill] sm:$0xff] %v4154_v36  ;;  %5965 = vst [vmem:[#allocation52_spill] sm:$0xff] %v4159_v37  ;;  %v4164_v38 = vld [vmem:[%s5790_s3 + $0x130] sm:$0xff]  ;;  %v4169_v39 = vld [vmem:[%s5790_s3 + $0x138] sm:$0xff] }
  0x15   :  { %5966 = vst [vmem:[#allocation53_spill] sm:$0xff] %v4164_v38  ;;  %5967 = vst [vmem:[#allocation54_spill] sm:$0xff] %v4169_v39  ;;  %v4174_v40 = vld [vmem:[%s5790_s3 + $0x140] sm:$0xff]  ;;  %v4179_v41 = vld [vmem:[%s5790_s3 + $0x148] sm:$0xff] }
  0x16   :  { %5968 = vst [vmem:[#allocation55_spill] sm:$0xff] %v4174_v40  ;;  %5969 = vst [vmem:[#allocation56_spill] sm:$0xff] %v4179_v41  ;;  %v4184_v42 = vld [vmem:[%s5790_s3 + $0x150] sm:$0xff]  ;;  %v4189_v43 = vld [vmem:[%s5790_s3 + $0x158] sm:$0xff] }
  0x17   :  { %5970 = vst [vmem:[#allocation57_spill] sm:$0xff] %v4184_v42  ;;  %5971 = vst [vmem:[#allocation58_spill] sm:$0xff] %v4189_v43  ;;  %v4194_v44 = vld [vmem:[%s5790_s3 + $0x160] sm:$0xff]  ;;  %v4199_v45 = vld [vmem:[%s5790_s3 + $0x168] sm:$0xff] }
  0x18   :  { %5972 = vst [vmem:[#allocation59_spill] sm:$0xff] %v4194_v44  ;;  %5973 = vst [vmem:[#allocation60_spill] sm:$0xff] %v4199_v45  ;;  %v4204_v46 = vld [vmem:[%s5790_s3 + $0x170] sm:$0xff]  ;;  %v4209_v47 = vld [vmem:[%s5790_s3 + $0x178] sm:$0xff] }
  0x19   :  { %5974 = vst [vmem:[#allocation61_spill] sm:$0xff] %v4204_v46  ;;  %5975 = vst [vmem:[#allocation62_spill] sm:$0xff] %v4209_v47  ;;  %v4214_v48 = vld [vmem:[%s5790_s3 + $0x180] sm:$0xff]  ;;  %v4219_v49 = vld [vmem:[%s5790_s3 + $0x188] sm:$0xff] }
  0x1a   :  { %5976 = vst [vmem:[#allocation63_spill] sm:$0xff] %v4214_v48  ;;  %5977 = vst [vmem:[#allocation64_spill] sm:$0xff] %v4219_v49  ;;  %v4224_v50 = vld [vmem:[%s5790_s3 + $0x190] sm:$0xff]  ;;  %v4229_v51 = vld [vmem:[%s5790_s3 + $0x198] sm:$0xff] }
  0x1b   :  { %5978 = vst [vmem:[#allocation65_spill] sm:$0xff] %v4224_v50  ;;  %5979 = vst [vmem:[#allocation66_spill] sm:$0xff] %v4229_v51  ;;  %v4234_v52 = vld [vmem:[%s5790_s3 + $0x1a0] sm:$0xff]  ;;  %v4239_v53 = vld [vmem:[%s5790_s3 + $0x1a8] sm:$0xff] }
  0x1c   :  { %5980 = vst [vmem:[#allocation67_spill] sm:$0xff] %v4234_v52  ;;  %5981 = vst [vmem:[#allocation68_spill] sm:$0xff] %v4239_v53  ;;  %v4244_v54 = vld [vmem:[%s5790_s3 + $0x1b0] sm:$0xff]  ;;  %v4249_v55 = vld [vmem:[%s5790_s3 + $0x1b8] sm:$0xff] }
  0x1d   :  { %5982 = vst [vmem:[#allocation69_spill] sm:$0xff] %v4244_v54  ;;  %5983 = vst [vmem:[#allocation70_spill] sm:$0xff] %v4249_v55  ;;  %v4254_v56 = vld [vmem:[%s5790_s3 + $0x1c0] sm:$0xff]  ;;  %v4259_v57 = vld [vmem:[%s5790_s3 + $0x1c8] sm:$0xff] }
  0x1e   :  { %5984 = vst [vmem:[#allocation71_spill] sm:$0xff] %v4254_v56  ;;  %5985 = vst [vmem:[#allocation72_spill] sm:$0xff] %v4259_v57  ;;  %v4264_v58 = vld [vmem:[%s5790_s3 + $0x1d0] sm:$0xff]  ;;  %v4269_v59 = vld [vmem:[%s5790_s3 + $0x1d8] sm:$0xff] }
  0x1f   :  { %5986 = vst [vmem:[#allocation73_spill] sm:$0xff] %v4264_v58  ;;  %5987 = vst [vmem:[#allocation74_spill] sm:$0xff] %v4269_v59  ;;  %v4274_v60 = vld [vmem:[%s5790_s3 + $0x1e0] sm:$0xff]  ;;  %v4279_v61 = vld [vmem:[%s5790_s3 + $0x1e8] sm:$0xff] }
  0x20   :  { %5988 = vst [vmem:[#allocation75_spill] sm:$0xff] %v4274_v60  ;;  %5989 = vst [vmem:[#allocation76_spill] sm:$0xff] %v4279_v61  ;;  %v4284_v62 = vld [vmem:[%s5790_s3 + $0x1f0] sm:$0xff]  ;;  %v4289_v63 = vld [vmem:[%s5790_s3 + $0x1f8] sm:$0xff] }
  0x21   :  { %5990 = vst [vmem:[#allocation77_spill] sm:$0xff] %v4284_v62  ;;  %5991 = vst [vmem:[#allocation78_spill] sm:$0xff] %v4289_v63  ;;  %v4294_v33 = vld [vmem:[%s5790_s3 + $0x200] sm:$0xff]  ;;  %v4299_v35 = vld [vmem:[%s5790_s3 + $0x208] sm:$0xff] }
  0x22   :  { %5992 = vst [vmem:[#allocation79_spill] sm:$0xff] %v4294_v33  ;;  %5993 = vst [vmem:[#allocation80_spill] sm:$0xff] %v4299_v35  ;;  %v4304_v37 = vld [vmem:[%s5790_s3 + $0x210] sm:$0xff]  ;;  %v4309_v39 = vld [vmem:[%s5790_s3 + $0x218] sm:$0xff] }
  0x23   :  { %5994 = vst [vmem:[#allocation81_spill] sm:$0xff] %v4304_v37  ;;  %5995 = vst [vmem:[#allocation82_spill] sm:$0xff] %v4309_v39  ;;  %v4314_v41 = vld [vmem:[%s5790_s3 + $0x220] sm:$0xff]  ;;  %v4319_v43 = vld [vmem:[%s5790_s3 + $0x228] sm:$0xff] }
  0x24   :  { %5996 = vst [vmem:[#allocation83_spill] sm:$0xff] %v4314_v41  ;;  %5997 = vst [vmem:[#allocation84_spill] sm:$0xff] %v4319_v43  ;;  %v4324_v45 = vld [vmem:[%s5790_s3 + $0x230] sm:$0xff]  ;;  %v4329_v47 = vld [vmem:[%s5790_s3 + $0x238] sm:$0xff] }
  0x25   :  { %5998 = vst [vmem:[#allocation85_spill] sm:$0xff] %v4324_v45  ;;  %5999 = vst [vmem:[#allocation86_spill] sm:$0xff] %v4329_v47  ;;  %v4334_v49 = vld [vmem:[%s5790_s3 + $0x240] sm:$0xff]  ;;  %v4339_v51 = vld [vmem:[%s5790_s3 + $0x248] sm:$0xff] }
  0x26   :  { %6000 = vst [vmem:[#allocation87_spill] sm:$0xff] %v4334_v49  ;;  %6001 = vst [vmem:[#allocation88_spill] sm:$0xff] %v4339_v51  ;;  %v4344_v53 = vld [vmem:[%s5790_s3 + $0x250] sm:$0xff]  ;;  %v4349_v55 = vld [vmem:[%s5790_s3 + $0x258] sm:$0xff] }
  0x27   :  { %6002 = vst [vmem:[#allocation89_spill] sm:$0xff] %v4344_v53  ;;  %6003 = vst [vmem:[#allocation90_spill] sm:$0xff] %v4349_v55  ;;  %v4354_v57 = vld [vmem:[%s5790_s3 + $0x260] sm:$0xff]  ;;  %v4359_v59 = vld [vmem:[%s5790_s3 + $0x268] sm:$0xff] }
  0x28   :  { %6004 = vst [vmem:[#allocation91_spill] sm:$0xff] %v4354_v57  ;;  %6005 = vst [vmem:[#allocation92_spill] sm:$0xff] %v4359_v59  ;;  %v4364_v61 = vld [vmem:[%s5790_s3 + $0x270] sm:$0xff]  ;;  %v4369_v63 = vld [vmem:[%s5790_s3 + $0x278] sm:$0xff] }
  0x29   :  { %6006 = vst [vmem:[#allocation93_spill] sm:$0xff] %v4364_v61  ;;  %6007 = vst [vmem:[#allocation94_spill] sm:$0xff] %v4369_v63  ;;  %v4374_v35 = vld [vmem:[%s5790_s3 + $0x280] sm:$0xff]  ;;  %v4379_v39 = vld [vmem:[%s5790_s3 + $0x288] sm:$0xff] }
  0x2a   :  { %6008 = vst [vmem:[#allocation95_spill] sm:$0xff] %v4374_v35  ;;  %6009 = vst [vmem:[#allocation96_spill] sm:$0xff] %v4379_v39  ;;  %v4384_v1 = vld [vmem:[%s5790_s3 + $0x290] sm:$0xff]  ;;  %v4389_v3 = vld [vmem:[%s5790_s3 + $0x298] sm:$0xff] }
  0x2b   :  { %6010 = vst [vmem:[#allocation97_spill] sm:$0xff] %v4384_v1  ;;  %6011 = vst [vmem:[#allocation98_spill] sm:$0xff] %v4389_v3  ;;  %v4394_v43 = vld [vmem:[%s5790_s3 + $0x2a0] sm:$0xff]  ;;  %v4399_v47 = vld [vmem:[%s5790_s3 + $0x2a8] sm:$0xff] }
  0x2c   :  { %6012 = vst [vmem:[#allocation99_spill] sm:$0xff] %v4394_v43  ;;  %6013 = vst [vmem:[#allocation100_spill] sm:$0xff] %v4399_v47  ;;  %v4404_v5 = vld [vmem:[%s5790_s3 + $0x2b0] sm:$0xff]  ;;  %v4409_v7 = vld [vmem:[%s5790_s3 + $0x2b8] sm:$0xff] }
  0x2d   :  { %6014 = vst [vmem:[#allocation101_spill] sm:$0xff] %v4404_v5  ;;  %6015 = vst [vmem:[#allocation102_spill] sm:$0xff] %v4409_v7  ;;  %v4414_v51 = vld [vmem:[%s5790_s3 + $0x2c0] sm:$0xff]  ;;  %v4419_v55 = vld [vmem:[%s5790_s3 + $0x2c8] sm:$0xff] }
  0x2e   :  { %6016 = vst [vmem:[#allocation103_spill] sm:$0xff] %v4414_v51  ;;  %6017 = vst [vmem:[#allocation104_spill] sm:$0xff] %v4419_v55  ;;  %v4424_v9 = vld [vmem:[%s5790_s3 + $0x2d0] sm:$0xff]  ;;  %v4429_v11 = vld [vmem:[%s5790_s3 + $0x2d8] sm:$0xff] }
  0x2f   :  { %6018 = vst [vmem:[#allocation105_spill] sm:$0xff] %v4424_v9  ;;  %6019 = vst [vmem:[#allocation106_spill] sm:$0xff] %v4429_v11  ;;  %v4434_v59 = vld [vmem:[%s5790_s3 + $0x2e0] sm:$0xff]  ;;  %v4439_v63 = vld [vmem:[%s5790_s3 + $0x2e8] sm:$0xff] }
  0x30   :  { %6020 = vst [vmem:[#allocation107_spill] sm:$0xff] %v4434_v59  ;;  %6021 = vst [vmem:[#allocation108_spill] sm:$0xff] %v4439_v63  ;;  %v4444_v13 = vld [vmem:[%s5790_s3 + $0x2f0] sm:$0xff]  ;;  %v4449_v15 = vld [vmem:[%s5790_s3 + $0x2f8] sm:$0xff] }
  0x31   :  { %6022 = vst [vmem:[#allocation109_spill] sm:$0xff] %v4444_v13  ;;  %6023 = vst [vmem:[#allocation110_spill] sm:$0xff] %v4449_v15  ;;  %v4454_v39 = vld [vmem:[%s5790_s3 + $0x300] sm:$0xff]  ;;  %v4459_v3 = vld [vmem:[%s5790_s3 + $0x308] sm:$0xff] }
  0x32   :  { %6024 = vst [vmem:[#allocation111_spill] sm:$0xff] %v4454_v39  ;;  %6025 = vst [vmem:[#allocation112_spill] sm:$0xff] %v4459_v3  ;;  %v4464_v17 = vld [vmem:[%s5790_s3 + $0x310] sm:$0xff]  ;;  %v4469_v19 = vld [vmem:[%s5790_s3 + $0x318] sm:$0xff] }
  0x33   :  { %6026 = vst [vmem:[#allocation113_spill] sm:$0xff] %v4464_v17  ;;  %6027 = vst [vmem:[#allocation114_spill] sm:$0xff] %v4469_v19  ;;  %v4474_v47 = vld [vmem:[%s5790_s3 + $0x320] sm:$0xff]  ;;  %v4479_v7 = vld [vmem:[%s5790_s3 + $0x328] sm:$0xff] }
  0x34   :  { %6028 = vst [vmem:[#allocation115_spill] sm:$0xff] %v4474_v47  ;;  %6029 = vst [vmem:[#allocation116_spill] sm:$0xff] %v4479_v7  ;;  %v4484_v3 = vld [vmem:[%s5790_s3 + $0x330] sm:$0xff]  ;;  %v4489_v21 = vld [vmem:[%s5790_s3 + $0x338] sm:$0xff] }
  0x35   :  { %6030 = vst [vmem:[#allocation117_spill] sm:$0xff] %v4484_v3  ;;  %6031 = vst [vmem:[#allocation118_spill] sm:$0xff] %v4489_v21  ;;  %v4494_v19 = vld [vmem:[%s5790_s3 + $0x340] sm:$0xff]  ;;  %v4499_v23 = vld [vmem:[%s5790_s3 + $0x348] sm:$0xff] }
  0x36   :  { %6032 = vst [vmem:[#allocation119_spill] sm:$0xff] %v4494_v19  ;;  %6033 = vst [vmem:[#allocation120_spill] sm:$0xff] %v4499_v23  ;;  %v4504_v7 = vld [vmem:[%s5790_s3 + $0x350] sm:$0xff]  ;;  %v4509_v55 = vld [vmem:[%s5790_s3 + $0x358] sm:$0xff] }
  0x37   :  { %6034 = vst [vmem:[#allocation121_spill] sm:$0xff] %v4504_v7  ;;  %6035 = vst [vmem:[#allocation122_spill] sm:$0xff] %v4509_v55  ;;  %v4514_v21 = vld [vmem:[%s5790_s3 + $0x360] sm:$0xff]  ;;  %v4519_v11 = vld [vmem:[%s5790_s3 + $0x368] sm:$0xff] }
  0x38   :  { %6036 = vst [vmem:[#allocation123_spill] sm:$0xff] %v4514_v21  ;;  %6037 = vst [vmem:[#allocation124_spill] sm:$0xff] %v4519_v11  ;;  %v4524_v23 = vld [vmem:[%s5790_s3 + $0x370] sm:$0xff]  ;;  %v4529_v25 = vld [vmem:[%s5790_s3 + $0x378] sm:$0xff] }
  0x39   :  { %6038 = vst [vmem:[#allocation125_spill] sm:$0xff] %v4524_v23  ;;  %6039 = vst [vmem:[#allocation126_spill] sm:$0xff] %v4529_v25  ;;  %v4534_v55 = vld [vmem:[%s5790_s3 + $0x380] sm:$0xff]  ;;  %v4539_v27 = vld [vmem:[%s5790_s3 + $0x388] sm:$0xff] }
  0x3a   :  { %6040 = vst [vmem:[#allocation127_spill] sm:$0xff] %v4534_v55  ;;  %6041 = vst [vmem:[#allocation128_spill] sm:$0xff] %v4539_v27  ;;  %v4544_v11 = vld [vmem:[%s5790_s3 + $0x390] sm:$0xff]  ;;  %v4549_v63 = vld [vmem:[%s5790_s3 + $0x398] sm:$0xff] }
  0x3b   :  { %6042 = vst [vmem:[#allocation129_spill] sm:$0xff] %v4544_v11  ;;  %6043 = vst [vmem:[#allocation130_spill] sm:$0xff] %v4549_v63  ;;  %v4554_v25 = vld [vmem:[%s5790_s3 + $0x3a0] sm:$0xff]  ;;  %v4559_v15 = vld [vmem:[%s5790_s3 + $0x3a8] sm:$0xff] }
  0x3c   :  { %6044 = vst [vmem:[#allocation131_spill] sm:$0xff] %v4554_v25  ;;  %6045 = vst [vmem:[#allocation132_spill] sm:$0xff] %v4559_v15  ;;  %v4564_v27 = vld [vmem:[%s5790_s3 + $0x3b0] sm:$0xff]  ;;  %v4569_v29 = vld [vmem:[%s5790_s3 + $0x3b8] sm:$0xff] }
  0x3d   :  { %6046 = vst [vmem:[#allocation133_spill] sm:$0xff] %v4564_v27  ;;  %6047 = vst [vmem:[#allocation134_spill] sm:$0xff] %v4569_v29  ;;  %v4574_v63 = vld [vmem:[%s5790_s3 + $0x3c0] sm:$0xff]  ;;  %v4579_v31 = vld [vmem:[%s5790_s3 + $0x3c8] sm:$0xff] }
  0x3e   :  { %6048 = vst [vmem:[#allocation135_spill] sm:$0xff] %v4574_v63  ;;  %6049 = vst [vmem:[#allocation136_spill] sm:$0xff] %v4579_v31  ;;  %v4584_v15 = vld [vmem:[%s5790_s3 + $0x3d0] sm:$0xff]  ;;  %v4589_v39 = vld [vmem:[%s5790_s3 + $0x3d8] sm:$0xff] }
  0x3f   :  { %6050 = vst [vmem:[#allocation137_spill] sm:$0xff] %v4584_v15  ;;  %6051 = vst [vmem:[#allocation138_spill] sm:$0xff] %v4589_v39  ;;  %v4594_v29 = vld [vmem:[%s5790_s3 + $0x3e0] sm:$0xff]  ;;  %v4599_v17 = vld [vmem:[%s5790_s3 + $0x3e8] sm:$0xff] }
  0x40   :  { %6052 = vst [vmem:[#allocation139_spill] sm:$0xff] %v4594_v29  ;;  %6053 = vst [vmem:[#allocation140_spill] sm:$0xff] %v4599_v17  ;;  %v4604_v31 = vld [vmem:[%s5790_s3 + $0x3f0] sm:$0xff]  ;;  %v4609_v32 = vld [vmem:[%s5790_s3 + $0x3f8] sm:$0xff] }
  0x41   :  { %6054 = vst [vmem:[#allocation141_spill] sm:$0xff] %v4604_v31  ;;  %6055 = vst [vmem:[#allocation142_spill] sm:$0xff] %v4609_v32 }
  0x42   :  { %323 = vsyncadd [#allocation4], 16384  ;;  %v358_v39 = vld [vmem:[%s5792_s5] sm:$0xff]  ;;  %v360_v34 = vld [vmem:[%s5792_s5 + $0x8] sm:$0xff] }
  0x43   :  { %359 = vst [vmem:[#allocation3] sm:$0xff] %v358_v39  ;;  %361 = vst [vmem:[#allocation3 + $0x8] sm:$0xff] %v360_v34  ;;  %v362_v17 = vld [vmem:[%s5792_s5 + $0x10] sm:$0xff]  ;;  %v364_v47 = vld [vmem:[%s5792_s5 + $0x18] sm:$0xff] }
  0x44   :  { %v366_v32 = vld [vmem:[%s5792_s5 + $0x20] sm:$0xff]  ;;  %363 = vst [vmem:[#allocation3 + $0x10] sm:$0xff] %v362_v17  ;;  %365 = vst [vmem:[#allocation3 + $0x18] sm:$0xff] %v364_v47  ;;  %v368_v39 = vld [vmem:[%s5792_s5 + $0x28] sm:$0xff] }
  0x45   :  { %367 = vst [vmem:[#allocation3 + $0x20] sm:$0xff] %v366_v32  ;;  %v370_v34 = vld [vmem:[%s5792_s5 + $0x30] sm:$0xff]  ;;  %v372_v3 = vld [vmem:[%s5792_s5 + $0x38] sm:$0xff]  ;;  %369 = vst [vmem:[#allocation3 + $0x28] sm:$0xff] %v368_v39 }
  0x46   :  { %371 = vst [vmem:[#allocation3 + $0x30] sm:$0xff] %v370_v34  ;;  %373 = vst [vmem:[#allocation3 + $0x38] sm:$0xff] %v372_v3  ;;  %v374_v17 = vld [vmem:[%s5792_s5 + $0x40] sm:$0xff]  ;;  %v376_v32 = vld [vmem:[%s5792_s5 + $0x48] sm:$0xff] }
  0x47   :  { %v378_v47 = vld [vmem:[%s5792_s5 + $0x50] sm:$0xff]  ;;  %375 = vst [vmem:[#allocation3 + $0x40] sm:$0xff] %v374_v17  ;;  %377 = vst [vmem:[#allocation3 + $0x48] sm:$0xff] %v376_v32  ;;  %v380_v39 = vld [vmem:[%s5792_s5 + $0x58] sm:$0xff] }
  0x48   :  { %379 = vst [vmem:[#allocation3 + $0x50] sm:$0xff] %v378_v47  ;;  %v382_v3 = vld [vmem:[%s5792_s5 + $0x60] sm:$0xff]  ;;  %v384_v34 = vld [vmem:[%s5792_s5 + $0x68] sm:$0xff]  ;;  %381 = vst [vmem:[#allocation3 + $0x58] sm:$0xff] %v380_v39 }
  0x49   :  { %383 = vst [vmem:[#allocation3 + $0x60] sm:$0xff] %v382_v3  ;;  %385 = vst [vmem:[#allocation3 + $0x68] sm:$0xff] %v384_v34  ;;  %v386_v17 = vld [vmem:[%s5792_s5 + $0x70] sm:$0xff]  ;;  %v388_v32 = vld [vmem:[%s5792_s5 + $0x78] sm:$0xff] }
  0x4a   :  { %v390_v47 = vld [vmem:[%s5792_s5 + $0x80] sm:$0xff]  ;;  %387 = vst [vmem:[#allocation3 + $0x70] sm:$0xff] %v386_v17  ;;  %389 = vst [vmem:[#allocation3 + $0x78] sm:$0xff] %v388_v32  ;;  %v392_v39 = vld [vmem:[%s5792_s5 + $0x88] sm:$0xff] }
  0x4b   :  { %391 = vst [vmem:[#allocation3 + $0x80] sm:$0xff] %v390_v47  ;;  %v394_v3 = vld [vmem:[%s5792_s5 + $0x90] sm:$0xff]  ;;  %v396_v34 = vld [vmem:[%s5792_s5 + $0x98] sm:$0xff]  ;;  %393 = vst [vmem:[#allocation3 + $0x88] sm:$0xff] %v392_v39 }
  0x4c   :  { %395 = vst [vmem:[#allocation3 + $0x90] sm:$0xff] %v394_v3  ;;  %397 = vst [vmem:[#allocation3 + $0x98] sm:$0xff] %v396_v34  ;;  %v398_v17 = vld [vmem:[%s5792_s5 + $0xa0] sm:$0xff]  ;;  %v400_v32 = vld [vmem:[%s5792_s5 + $0xa8] sm:$0xff] }
  0x4d   :  { %v402_v47 = vld [vmem:[%s5792_s5 + $0xb0] sm:$0xff]  ;;  %399 = vst [vmem:[#allocation3 + $0xa0] sm:$0xff] %v398_v17  ;;  %401 = vst [vmem:[#allocation3 + $0xa8] sm:$0xff] %v400_v32  ;;  %v404_v39 = vld [vmem:[%s5792_s5 + $0xb8] sm:$0xff] }
  0x4e   :  { %403 = vst [vmem:[#allocation3 + $0xb0] sm:$0xff] %v402_v47  ;;  %v406_v3 = vld [vmem:[%s5792_s5 + $0xc0] sm:$0xff]  ;;  %v408_v34 = vld [vmem:[%s5792_s5 + $0xc8] sm:$0xff]  ;;  %405 = vst [vmem:[#allocation3 + $0xb8] sm:$0xff] %v404_v39 }
  0x4f   :  { %407 = vst [vmem:[#allocation3 + $0xc0] sm:$0xff] %v406_v3  ;;  %409 = vst [vmem:[#allocation3 + $0xc8] sm:$0xff] %v408_v34  ;;  %v410_v17 = vld [vmem:[%s5792_s5 + $0xd0] sm:$0xff]  ;;  %v412_v32 = vld [vmem:[%s5792_s5 + $0xd8] sm:$0xff] }
  0x50   :  { %v414_v47 = vld [vmem:[%s5792_s5 + $0xe0] sm:$0xff]  ;;  %411 = vst [vmem:[#allocation3 + $0xd0] sm:$0xff] %v410_v17  ;;  %413 = vst [vmem:[#allocation3 + $0xd8] sm:$0xff] %v412_v32  ;;  %v416_v39 = vld [vmem:[%s5792_s5 + $0xe8] sm:$0xff] }
  0x51   :  { %415 = vst [vmem:[#allocation3 + $0xe0] sm:$0xff] %v414_v47  ;;  %v418_v3 = vld [vmem:[%s5792_s5 + $0xf0] sm:$0xff]  ;;  %v420_v34 = vld [vmem:[%s5792_s5 + $0xf8] sm:$0xff]  ;;  %417 = vst [vmem:[#allocation3 + $0xe8] sm:$0xff] %v416_v39 }
  0x52   :  { %419 = vst [vmem:[#allocation3 + $0xf0] sm:$0xff] %v418_v3  ;;  %421 = vst [vmem:[#allocation3 + $0xf8] sm:$0xff] %v420_v34 }
  0x53   :  { %429 = vsyncadd [#allocation4 + $0x1], 4096  ;;  %v3797_v17 = vld [vmem:[%s5789_s2 + $0x24] ss:$16 sps:$4 sm:$0xff]   ;;  %v3799_v32 = vld [vmem:[%s5789_s2 + $0x20] ss:$16 sps:$4 sm:$0xff]  }
  0x54   :  { %v5889_v47 = vmov 0   ;;  %v3800_v39 = vld [vmem:[%s5789_s2 + $0x4] ss:$16 sps:$4 sm:$0xff]   ;;  %811 = vmatprep.subr.bf16.mxu0 %v3797_v17  ;;  %v3802_v3 = vld [vmem:[%s5789_s2] ss:$16 sps:$4 sm:$0xff]   ;;  %vm702_vm0 = vcmask 261120  }
  0x55   :  { %831 = vmatprep.mubr.bf16.mxu0 %v5889_v47  ;;  %1184 = vmatprep.mubr.bf16.mxu1 %v5889_v47  ;;  %v3803_v34 = vld [vmem:[%s5787_s0] sm:$0xff]   ;;  %v3804_v17 = vld [vmem:[%s5787_s0 + $0x8] sm:$0xff]   ;;  %v3805_v38 = vld [vmem:[%s5787_s0 + $0x10] sm:$0xff]   ;;  %v6059_v60 = vmov 0  }
  0x56   :  { %812 = vmatpush1.bf16.msra.mxu0 %v3799_v32  ;;  %v3819_v32 = vld [vmem:[%s5789_s2 + $0x2c] ss:$16 sps:$4 sm:$0xff]   ;;  %v3825_v36 = vld [vmem:[%s5789_s2 + $0x8] ss:$16 sps:$4 sm:$0xff]   ;;  %v3837_v15 = vld [vmem:[%s5787_s0 + $0xe0] sm:$0xff]  }
  0x57   :  { %813 = vmatprep.subr.bf16.mxu0 %v3800_v39  ;;  %v3821_v39 = vld [vmem:[%s5789_s2 + $0x28] ss:$16 sps:$4 sm:$0xff]   ;;  %1164 = vmatprep.subr.bf16.mxu1 %v3819_v32 }
  0x58   :  { %1165 = vmatpush1.bf16.msra.mxu1 %v3821_v39  ;;  %v3806_v32 = vld [vmem:[%s5787_s0 + $0x18] sm:$0xff]   ;;  %v3811_v39 = vld [vmem:[%s5787_s0 + $0x40] sm:$0xff]  }
  0x5a   :  { %814 = vmatpush1.bf16.msra.mxu0 %v3802_v3  ;;  %v3823_v3 = vld [vmem:[%s5789_s2 + $0xc] ss:$16 sps:$4 sm:$0xff]  }
  0x5b   :  { %1166 = vmatprep.subr.bf16.mxu1 %v3823_v3  ;;  %v3812_v3 = vld [vmem:[%s5787_s0 + $0x48] sm:$0xff]  }
  0x5c   :  { %1167 = vmatpush1.bf16.msra.mxu1 %v3825_v36  ;;  %v3807_v36 = vld [vmem:[%s5787_s0 + $0x20] sm:$0xff]  }
  0x5d   :  { %3520 = vmatmul.mubr.msk.bf16.vlgmr.msra.gmra.mxu0 %vm702_vm0, %v3803_v34 }
  0x5e   :  { %841 = vmatprep.mubr.bf16.mxu0 %v5889_v47 }
  0x5f   :  { %3552 = vmatmul.mubr.msk.bf16.vlgmr.msra.gmra.mxu1 %vm702_vm0, %v3803_v34  ;;  %v3808_v34 = vld [vmem:[%s5787_s0 + $0x28] sm:$0xff]  }
  0x60   :  { %1194 = vmatprep.mubr.bf16.mxu1 %v5889_v47 }
  0x65   :  { %3521 = vmatmul.mubr.msk.bf16.gmra.mxu0 %vm702_vm0, %v3804_v17 }
  0x66   :  { %851 = vmatprep.mubr.bf16.mxu0 %v5889_v47 }
  0x67   :  { %3553 = vmatmul.mubr.msk.bf16.gmra.mxu1 %vm702_vm0, %v3804_v17  ;;  %v3809_v17 = vld [vmem:[%s5787_s0 + $0x30] sm:$0xff]  }
  0x68   :  { %1204 = vmatprep.mubr.bf16.mxu1 %v5889_v47 }
  0x6d   :  { %3522 = vmatmul.mubr.msk.bf16.gmra.mxu0 %vm702_vm0, %v3805_v38 }
  0x6e   :  { %861 = vmatprep.mubr.bf16.mxu0 %v5889_v47 }
  0x6f   :  { %3554 = vmatmul.mubr.msk.bf16.gmra.mxu1 %vm702_vm0, %v3805_v38  ;;  %v3810_v38 = vld [vmem:[%s5787_s0 + $0x38] sm:$0xff]  }
  0x70   :  { %1214 = vmatprep.mubr.bf16.mxu1 %v5889_v47 }
  0x75   :  { %3523 = vmatmul.mubr.msk.bf16.gmra.mxu0 %vm702_vm0, %v3806_v32 }
  0x76   :  { %871 = vmatprep.mubr.bf16.mxu0 %v5889_v47 }
  0x77   :  { %3555 = vmatmul.mubr.msk.bf16.gmra.mxu1 %vm702_vm0, %v3806_v32  ;;  %v3813_v32 = vld [vmem:[%s5787_s0 + $0x50] sm:$0xff]  }
  0x78   :  { %1224 = vmatprep.mubr.bf16.mxu1 %v5889_v47 }
  0x7d   :  { %3524 = vmatmul.mubr.msk.bf16.gmra.mxu0 %vm702_vm0, %v3807_v36 }
  0x7e   :  { %881 = vmatprep.mubr.bf16.mxu0 %v5889_v47 }
  0x7f   :  { %3556 = vmatmul.mubr.msk.bf16.gmra.mxu1 %vm702_vm0, %v3807_v36  ;;  %v3814_v36 = vld [vmem:[%s5787_s0 + $0x58] sm:$0xff]  }
  0x80   :  { %1234 = vmatprep.mubr.bf16.mxu1 %v5889_v47 }
  0x85   :  { %3525 = vmatmul.mubr.msk.bf16.gmra.mxu0 %vm702_vm0, %v3808_v34 }
  0x86   :  { %891 = vmatprep.mubr.bf16.mxu0 %v5889_v47 }
  0x87   :  { %3557 = vmatmul.mubr.msk.bf16.gmra.mxu1 %vm702_vm0, %v3808_v34  ;;  %v3815_v34 = vld [vmem:[%s5787_s0 + $0x60] sm:$0xff]  }
  0x88   :  { %1244 = vmatprep.mubr.bf16.mxu1 %v5889_v47 }
  0x8d   :  { %3526 = vmatmul.mubr.msk.bf16.gmra.mxu0 %vm702_vm0, %v3809_v17 }
  0x8e   :  { %901 = vmatprep.mubr.bf16.mxu0 %v5889_v47 }
  0x8f   :  { %3558 = vmatmul.mubr.msk.bf16.gmra.mxu1 %vm702_vm0, %v3809_v17  ;;  %v3816_v17 = vld [vmem:[%s5787_s0 + $0x68] sm:$0xff]  }
  0x90   :  { %1254 = vmatprep.mubr.bf16.mxu1 %v5889_v47 }
  0x95   :  { %3527 = vmatmul.mubr.msk.bf16.gmra.mxu0 %vm702_vm0, %v3810_v38 }
  0x96   :  { %911 = vmatprep.mubr.bf16.mxu0 %v5889_v47 }
  0x97   :  { %3559 = vmatmul.mubr.msk.bf16.gmra.mxu1 %vm702_vm0, %v3810_v38  ;;  %v3817_v38 = vld [vmem:[%s5787_s0 + $0x70] sm:$0xff]  }
  0x98   :  { %1264 = vmatprep.mubr.bf16.mxu1 %v5889_v47 }
  0x9d   :  { %3528 = vmatmul.mubr.msk.bf16.gmra.mxu0 %vm702_vm0, %v3811_v39 }
  0x9e   :  { %921 = vmatprep.mubr.bf16.mxu0 %v5889_v47 }
  0x9f   :  { %3560 = vmatmul.mubr.msk.bf16.gmra.mxu1 %vm702_vm0, %v3811_v39  ;;  %v3818_v39 = vld [vmem:[%s5787_s0 + $0x78] sm:$0xff]  }
  0xa0   :  { %1274 = vmatprep.mubr.bf16.mxu1 %v5889_v47 }
  0xa5   :  { %3529 = vmatmul.mubr.msk.bf16.gmra.mxu0 %vm702_vm0, %v3812_v3 }
  0xa6   :  { %931 = vmatprep.mubr.bf16.mxu0 %v5889_v47 }
  0xa7   :  { %3561 = vmatmul.mubr.msk.bf16.gmra.mxu1 %vm702_vm0, %v3812_v3  ;;  %v3822_v3 = vld [vmem:[%s5787_s0 + $0x80] sm:$0xff]  }
  0xa8   :  { %1284 = vmatprep.mubr.bf16.mxu1 %v5889_v47 }
  0xad   :  { %3530 = vmatmul.mubr.msk.bf16.gmra.mxu0 %vm702_vm0, %v3813_v32 }
  0xae   :  { %941 = vmatprep.mubr.bf16.mxu0 %v5889_v47 }
  0xaf   :  { %3562 = vmatmul.mubr.msk.bf16.gmra.mxu1 %vm702_vm0, %v3813_v32  ;;  %v3826_v32 = vld [vmem:[%s5787_s0 + $0x88] sm:$0xff]  }
  0xb0   :  { %1294 = vmatprep.mubr.bf16.mxu1 %v5889_v47 }
  0xb5   :  { %3531 = vmatmul.mubr.msk.bf16.gmra.mxu0 %vm702_vm0, %v3814_v36 }
  0xb6   :  { %951 = vmatprep.mubr.bf16.mxu0 %v5889_v47 }
  0xb7   :  { %3563 = vmatmul.mubr.msk.bf16.gmra.mxu1 %vm702_vm0, %v3814_v36  ;;  %v3827_v36 = vld [vmem:[%s5787_s0 + $0x90] sm:$0xff]  }
  0xb8   :  { %1304 = vmatprep.mubr.bf16.mxu1 %v5889_v47 }
  0xbd   :  { %3532 = vmatmul.mubr.msk.bf16.gmra.mxu0 %vm702_vm0, %v3815_v34 }
  0xbe   :  { %961 = vmatprep.mubr.bf16.mxu0 %v5889_v47 }
  0xbf   :  { %3564 = vmatmul.mubr.msk.bf16.gmra.mxu1 %vm702_vm0, %v3815_v34  ;;  %v3828_v34 = vld [vmem:[%s5787_s0 + $0x98] sm:$0xff]  }
  0xc0   :  { %1314 = vmatprep.mubr.bf16.mxu1 %v5889_v47 }
  0xc5   :  { %3533 = vmatmul.mubr.msk.bf16.gmra.mxu0 %vm702_vm0, %v3816_v17 }
  0xc6   :  { %971 = vmatprep.mubr.bf16.mxu0 %v5889_v47 }
  0xc7   :  { %3565 = vmatmul.mubr.msk.bf16.gmra.mxu1 %vm702_vm0, %v3816_v17  ;;  %v3829_v17 = vld [vmem:[%s5787_s0 + $0xa0] sm:$0xff]  }
  0xc8   :  { %1324 = vmatprep.mubr.bf16.mxu1 %v5889_v47 }
  0xcd   :  { %3534 = vmatmul.mubr.msk.bf16.gmra.mxu0 %vm702_vm0, %v3817_v38 }
  0xce   :  { %981 = vmatprep.mubr.bf16.mxu0 %v5889_v47 }
  0xcf   :  { %3566 = vmatmul.mubr.msk.bf16.gmra.mxu1 %vm702_vm0, %v3817_v38  ;;  %v3830_v38 = vld [vmem:[%s5787_s0 + $0xa8] sm:$0xff]  }
  0xd0   :  { %1334 = vmatprep.mubr.bf16.mxu1 %v5889_v47 }
  0xd5   :  { %3535 = vmatmul.mubr.msk.bf16.gmra.mxu0 %vm702_vm0, %v3818_v39 }
  0xd6   :  { %991 = vmatprep.mubr.bf16.mxu0 %v5889_v47 }
  0xd7   :  { %3567 = vmatmul.mubr.msk.bf16.gmra.mxu1 %vm702_vm0, %v3818_v39  ;;  %v3831_v39 = vld [vmem:[%s5787_s0 + $0xb0] sm:$0xff]  }
  0xd8   :  { %1344 = vmatprep.mubr.bf16.mxu1 %v5889_v47 }
  0xdd   :  { %3536 = vmatmul.mubr.msk.bf16.gmra.mxu0 %vm702_vm0, %v3822_v3 }
  0xde   :  { %1001 = vmatprep.mubr.bf16.mxu0 %v5889_v47 }
  0xdf   :  { %3568 = vmatmul.mubr.msk.bf16.gmra.mxu1 %vm702_vm0, %v3822_v3  ;;  %v3832_v3 = vld [vmem:[%s5787_s0 + $0xb8] sm:$0xff]  }
  0xe0   :  { %1354 = vmatprep.mubr.bf16.mxu1 %v5889_v47 }
  0xe5   :  { %3537 = vmatmul.mubr.msk.bf16.gmra.mxu0 %vm702_vm0, %v3826_v32 }
  0xe6   :  { %1011 = vmatprep.mubr.bf16.mxu0 %v5889_v47 }
  0xe7   :  { %3569 = vmatmul.mubr.msk.bf16.gmra.mxu1 %vm702_vm0, %v3826_v32  ;;  %v3833_v32 = vld [vmem:[%s5787_s0 + $0xc0] sm:$0xff]  }
  0xe8   :  { %1364 = vmatprep.mubr.bf16.mxu1 %v5889_v47 }
  0xed   :  { %3538 = vmatmul.mubr.msk.bf16.gmra.mxu0 %vm702_vm0, %v3827_v36 }
  0xee   :  { %1021 = vmatprep.mubr.bf16.mxu0 %v5889_v47 }
  0xef   :  { %3570 = vmatmul.mubr.msk.bf16.gmra.mxu1 %vm702_vm0, %v3827_v36 }
  0xf0   :  { %1374 = vmatprep.mubr.bf16.mxu1 %v5889_v47 }
  0xf5   :  { %3539 = vmatmul.mubr.msk.bf16.gmra.mxu0 %vm702_vm0, %v3828_v34 }
  0xf6   :  { %1031 = vmatprep.mubr.bf16.mxu0 %v5889_v47 }
  0xf7   :  { %3571 = vmatmul.mubr.msk.bf16.gmra.mxu1 %vm702_vm0, %v3828_v34 }
  0xf8   :  { %1384 = vmatprep.mubr.bf16.mxu1 %v5889_v47 }
  0xfd   :  { %3540 = vmatmul.mubr.msk.bf16.gmra.mxu0 %vm702_vm0, %v3829_v17 }
  0xfe   :  { %1041 = vmatprep.mubr.bf16.mxu0 %v5889_v47 }
  0xff   :  { %3572 = vmatmul.mubr.msk.bf16.gmra.mxu1 %vm702_vm0, %v3829_v17 }
 0x100   :  { %1394 = vmatprep.mubr.bf16.mxu1 %v5889_v47 }
 0x105   :  { %3541 = vmatmul.mubr.msk.bf16.gmra.mxu0 %vm702_vm0, %v3830_v38 }
 0x106   :  { %1051 = vmatprep.mubr.bf16.mxu0 %v5889_v47 }
 0x107   :  { %3573 = vmatmul.mubr.msk.bf16.gmra.mxu1 %vm702_vm0, %v3830_v38  ;;  %v3834_v38 = vld [vmem:[%s5787_s0 + $0xc8] sm:$0xff]  }
 0x108   :  { %1404 = vmatprep.mubr.bf16.mxu1 %v5889_v47 }
 0x10d   :  { %3542 = vmatmul.mubr.msk.bf16.gmra.mxu0 %vm702_vm0, %v3831_v39 }
 0x10e   :  { %1061 = vmatprep.mubr.bf16.mxu0 %v5889_v47 }
 0x10f   :  { %3574 = vmatmul.mubr.msk.bf16.gmra.mxu1 %vm702_vm0, %v3831_v39 }
 0x110   :  { %1414 = vmatprep.mubr.bf16.mxu1 %v5889_v47 }
 0x115   :  { %3543 = vmatmul.mubr.msk.bf16.gmra.mxu0 %vm702_vm0, %v3832_v3 }
 0x116   :  { %1071 = vmatprep.mubr.bf16.mxu0 %v5889_v47 }
 0x117   :  { %3575 = vmatmul.mubr.msk.bf16.gmra.mxu1 %vm702_vm0, %v3832_v3 }
 0x118   :  { %1424 = vmatprep.mubr.bf16.mxu1 %v5889_v47 }
 0x11d   :  { %v833_v36 = vpop.f32.mrf.mxu0  ;;  %3544 = vmatmul.mubr.msk.bf16.gmra.mxu0 %vm702_vm0, %v3833_v32 }
 0x11e   :  { %1081 = vmatprep.mubr.bf16.mxu0 %v5889_v47  ;;  %v1505_v19 = vmax.f32 %v833_v36, 0.0  ;;  %v3835_v36 = vld [vmem:[%s5787_s0 + $0xd0] sm:$0xff]  }
 0x11f   :  { %v835_v34 = vpop.f32.mrf.mxu0  ;;  %v1186_v48 = vpop.f32.mrf.mxu1  ;;  %3576 = vmatmul.mubr.msk.bf16.gmra.mxu1 %vm702_vm0, %v3833_v32 }
 0x120   :  { %v1506_v42 = vmax.f32 %v835_v34, 0.0  ;;  %1434 = vmatprep.mubr.bf16.mxu1 %v5889_v47 }
 0x121   :  { %v837_v17 = vpop.f32.mrf.mxu0 }
 0x122   :  { %v1509_v7 = vmax.f32 %v837_v17, 0.0 }
 0x123   :  { %v839_v40 = vpop.f32.mrf.mxu0 }
 0x124   :  { %v4907_v21 = vpack.c.bf16 %v1509_v7, %v1505_v19  ;;  %v1510_v23 = vmax.f32 %v839_v40, 0.0 }
 0x125   :  { %v843_v44 = vpop.f32.mrf.mxu0  ;;  %3545 = vmatmul.mubr.msk.bf16.gmra.mxu0 %vm702_vm0, %v3834_v38 }
 0x126   :  { %v4910_v46 = vpack.c.bf16 %v1510_v23, %v1506_v42  ;;  %1091 = vmatprep.mubr.bf16.mxu0 %v5889_v47  ;;  %v1513_v7 = vmax.f32 %v843_v44, 0.0 }
 0x127   :  { %v845_v39 = vpop.f32.mrf.mxu0  ;;  %3577 = vmatmul.mubr.msk.bf16.gmra.mxu1 %vm702_vm0, %v3834_v38 }
 0x128   :  { %v1514_v34 = vmax.f32 %v845_v39, 0.0  ;;  %v1188_v39 = vpop.f32.mrf.mxu1  ;;  %1444 = vmatprep.mubr.bf16.mxu1 %v5889_v47 }
 0x129   :  { %v847_v55 = vpop.f32.mrf.mxu0 }
 0x12a   :  { %v1517_v19 = vmax.f32 %v847_v55, 0.0  ;;  %v3836_v55 = vld [vmem:[%s5787_s0 + $0xd8] sm:$0xff]  }
 0x12b   :  { %v849_v40 = vpop.f32.mrf.mxu0 }
 0x12c   :  { %v4918_v17 = vpack.c.bf16 %v1517_v19, %v1513_v7  ;;  %v1518_v23 = vmax.f32 %v849_v40, 0.0  ;;  %v1507_v7 = vmax.f32 %v1186_v48, 0.0  ;;  %v1190_v40 = vpop.f32.mrf.mxu1 }
 0x12d   :  { %v4920_v42 = vpop.f32.mrf.mxu0  ;;  %3546 = vmatmul.mubr.msk.bf16.gmra.mxu0 %vm702_vm0, %v3835_v36 }
 0x12e   :  { %v4923_v11 = vpack.c.bf16 %v1518_v23, %v1514_v34  ;;  %1101 = vmatprep.mubr.bf16.mxu0 %v5889_v47  ;;  %v1508_v34 = vmax.f32 %v1188_v39, 0.0  ;;  %v1511_v23 = vmax.f32 %v1190_v40, 0.0  ;;  %v1192_v32 = vpop.f32.mrf.mxu1  ;;  %v3922_v39 = vmov 1966171168  }
 0x12f   :  { %v4926_v3 = vpop.f32.mrf.mxu0  ;;  %v1512_v27 = vmax.f32 %v1192_v32, 0.0  ;;  %v1900_v40 = vunpack.c.l.s4 %v3922_v39  ;;  %3578 = vmatmul.mubr.msk.bf16.gmra.mxu1 %vm702_vm0, %v3835_v36 }
 0x130   :  { %v4941_v25 = vpack.c.bf16 %v1511_v23, %v1507_v7  ;;  %v1196_v54 = vpop.f32.mrf.mxu1  ;;  %v1902_v23 = vlaneseq  ;;  %1454 = vmatprep.mubr.bf16.mxu1 %v6059_v60 }
 0x131   :  { %v4930_v44 = vpop.f32.mrf.mxu0  ;;  %v4946_v48 = vpack.c.bf16 %v1512_v27, %v1508_v34  ;;  %v1515_v32 = vmax.f32 %v1196_v54, 0.0  ;;  %v1901_v56 = vunpack.c.0.s8 %v1900_v40  ;;  %v3584_v40 = vld.sshfl [vmem:[%s5788_s1] sm:$0x33 pattern:$0x75316420] }
 0x132   :  { %6056 = vst [vmem:[#allocation143_spill] sm:$0xff] %v4941_v25  ;;  %v1198_v7 = vpop.f32.mrf.mxu1  ;;  %v4956_v38 = vshrl.u32 %v1902_v23, 7  ;;  %v1898_v10 = vcombine.high %v3584_v40, %v3584_v40 }
 0x133   :  { %v4935_v19 = vpop.f32.mrf.mxu0  ;;  %6057 = vst [vmem:[#allocation144_spill] sm:$0xff] %v4946_v48  ;;  %v1516_v27 = vmax.f32 %v1198_v7, 0.0 }
 0x134   :  { %v1200_v29 = vpop.f32.mrf.mxu1  ;;  %6058 = vst [vmem:[#allocation145_spill] sm:$0xff] %v4956_v38  ;;  %v1904_v31 = vsub.s32 %v1901_v56, %v4956_v38 }
 0x135   :  { %v4937_v50 = vpop.f32.mrf.mxu0  ;;  %3547 = vmatmul.mubr.msk.bf16.gmra.mxu0 %vm702_vm0, %v3836_v55  ;;  %v1519_v34 = vmax.f32 %v1200_v29, 0.0 }
 0x136   :  { %1111 = vmatprep.mubr.bf16.mxu0 %v5889_v47  ;;  %v1202_v39 = vpop.f32.mrf.mxu1  ;;  %v4971_v29 = vrot.slane %v3584_v40, %v1904_v31 }
 0x137   :  { %v4943_v52 = vpop.f32.mrf.mxu0  ;;  %v4963_v62 = vpack.c.bf16 %v1519_v34, %v1515_v32  ;;  %v1520_v54 = vmax.f32 %v1202_v39, 0.0  ;;  %v3838_v32 = vld [vmem:[%s5787_s0 + $0xe8] sm:$0xff]   ;;  %3579 = vmatmul.mubr.msk.bf16.gmra.mxu1 %vm702_vm0, %v3836_v55 }
 0x138   :  { %v1206_v7 = vpop.f32.mrf.mxu1  ;;  %1464 = vmatprep.mubr.bf16.mxu1 %v6059_v60 }
 0x139   :  { %v4949_v63 = vpop.f32.mrf.mxu0  ;;  %6060 = vst [vmem:[#allocation146_spill] sm:$0xff] %v4963_v62  ;;  %v4973_v33 = vpack.c.bf16 %v1520_v54, %v1516_v27  ;;  %v1523_v39 = vmax.f32 %v1206_v7, 0.0 }
 0x13a   :  { %v1208_v34 = vpop.f32.mrf.mxu1 }
 0x13b   :  { %v4954_v58 = vpop.f32.mrf.mxu0  ;;  %6061 = vst [vmem:[#allocation147_spill] sm:$0xff] %v4973_v33  ;;  %v1524_v0 = vmax.f32 %v1208_v34, 0.0  ;;  %v3839_v34 = vld [vmem:[%s5787_s0 + $0xf0] sm:$0xff]  }
 0x13c   :  { %v1210_v37 = vpop.f32.mrf.mxu1 }
 0x13d   :  { %v4958_v47 = vpop.f32.mrf.mxu0  ;;  %3548 = vmatmul.mubr.msk.bf16.gmra.mxu0 %vm702_vm0, %v3837_v15  ;;  %v1527_v2 = vmax.f32 %v1210_v37, 0.0 }
 0x13e   :  { %1121 = vmatprep.mubr.bf16.mxu0 %v6059_v60  ;;  %v1212_v27 = vpop.f32.mrf.mxu1 }
 0x13f   :  { %v4968_v23 = vpop.f32.mrf.mxu0  ;;  %v4987_v54 = vpack.c.bf16 %v1527_v2, %v1523_v39  ;;  %v1528_v41 = vmax.f32 %v1212_v27, 0.0  ;;  %3580 = vmatmul.mubr.msk.bf16.gmra.mxu1 %vm702_vm0, %v3837_v15 }
 0x140   :  { %v1216_v4 = vpop.f32.mrf.mxu1  ;;  %1474 = vmatprep.mubr.bf16.mxu1 %v6059_v60 }
 0x141   :  { %v4976_v56 = vpop.f32.mrf.mxu0  ;;  %6062 = vst [vmem:[#allocation148_spill] sm:$0xff] %v4987_v54  ;;  %v4992_v7 = vpack.c.bf16 %v1528_v41, %v1524_v0  ;;  %v1531_v49 = vmax.f32 %v1216_v4, 0.0 }
 0x142   :  { %v1218_v6 = vpop.f32.mrf.mxu1 }
 0x143   :  { %v4981_v38 = vpop.f32.mrf.mxu0  ;;  %6063 = vst [vmem:[#allocation149_spill] sm:$0xff] %v4992_v7  ;;  %v1532_v27 = vmax.f32 %v1218_v6, 0.0 }
 0x144   :  { %v1220_v39 = vpop.f32.mrf.mxu1 }
 0x145   :  { %v4983_v36 = vpop.f32.mrf.mxu0  ;;  %3549 = vmatmul.mubr.msk.bf16.gmra.mxu0 %vm702_vm0, %v3838_v32  ;;  %v1535_v53 = vmax.f32 %v1220_v39, 0.0  ;;  %v5013_v39 = vld [vmem:[%s5787_s0 + $0xf8] sm:$0xff]  }
 0x146   :  { %1131 = vmatprep.mubr.bf16.mxu0 %v6059_v60  ;;  %v1222_v0 = vpop.f32.mrf.mxu1 }
 0x147   :  { %v4989_v45 = vpop.f32.mrf.mxu0  ;;  %v5004_v41 = vpack.c.bf16 %v1535_v53, %v1531_v49  ;;  %v1536_v55 = vmax.f32 %v1222_v0, 0.0  ;;  %v5017_v53 = vrot.slane %v1898_v10, %v1904_v31  ;;  %3581 = vmatmul.mubr.msk.bf16.gmra.mxu1 %vm702_vm0, %v3838_v32 }
 0x148   :  { %v1226_v61 = vpop.f32.mrf.mxu1  ;;  %1484 = vmatprep.mubr.bf16.mxu1 %v6059_v60 }
 0x149   :  { %v4995_v37 = vpop.f32.mrf.mxu0  ;;  %v5007_v4 = vpack.c.bf16 %v1536_v55, %v1532_v27  ;;  %v1539_v49 = vmax.f32 %v1226_v61, 0.0 }
 0x14a   :  { %v5015_v12 = vpop.f32.mrf.mxu1 }
 0x14b   :  { %v5000_v2 = vpop.f32.mrf.mxu0 }
 0x14c   :  { %v1230_v0 = vpop.f32.mrf.mxu1 }
 0x14d   :  { %v893_v8 = vpop.f32.mrf.mxu0  ;;  %3550 = vmatmul.mubr.msk.bf16.gmra.mxu0 %vm702_vm0, %v3839_v34  ;;  %v1543_v14 = vmax.f32 %v1230_v0, 0.0 }
 0x14e   :  { %1141 = vmatprep.mubr.bf16.mxu0 %v6059_v60  ;;  %v5021_v15 = vpop.f32.mrf.mxu1 }
 0x14f   :  { %v895_v57 = vpop.f32.mrf.mxu0  ;;  %v5023_v27 = vpack.c.bf16 %v1543_v14, %v1539_v49  ;;  %3582 = vmatmul.mubr.msk.bf16.gmra.mxu1 %vm702_vm0, %v3839_v34  ;;  %v1549_v34 = vmax.f32 %v4995_v37, 0.0 }
 0x150   :  { %v5026_v1 = vpop.f32.mrf.mxu1  ;;  %v1554_v22 = vmax.f32 %v895_v57, 0.0  ;;  %1494 = vmatprep.mubr.bf16.mxu1 %v6059_v60 }
 0x151   :  { %v897_v6 = vpop.f32.mrf.mxu0 }
 0x152   :  { %v5030_v31 = vpop.f32.mrf.mxu1  ;;  %v1557_v9 = vmax.f32 %v897_v6, 0.0 }
 0x153   :  { %v899_v40 = vpop.f32.mrf.mxu0 }
 0x154   :  { %v5032_v16 = vpop.f32.mrf.mxu1  ;;  %v1558_v18 = vmax.f32 %v899_v40, 0.0  ;;  %v1553_v40 = vmax.f32 %v893_v8, 0.0 }
 0x155   :  { %v903_v35 = vpop.f32.mrf.mxu0  ;;  %3551 = vmatmul.mubr.msk.bf16.gmra.mxu0 %vm702_vm0, %v5013_v39 }
 0x156   :  { %1951 = vmatprep.mubr.bf16.mxu0 %v5017_v53  ;;  %v1561_v49 = vmax.f32 %v903_v35, 0.0  ;;  %v5034_v20 = vpop.f32.mrf.mxu1  ;;  %v1786_v59 = vpack.c.bf16 %v1558_v18, %v1554_v22 }
 0x157   :  { %v905_v55 = vpop.f32.mrf.mxu0  ;;  %3583 = vmatmul.mubr.msk.bf16.gmra.mxu1 %vm702_vm0, %v5013_v39 }
 0x158   :  { %v1562_v43 = vmax.f32 %v905_v55, 0.0  ;;  %v5036_v26 = vpop.f32.mrf.mxu1 }
 0x159   :  { %v907_v10 = vpop.f32.mrf.mxu0 }
 0x15a   :  { %v1565_v61 = vmax.f32 %v907_v10, 0.0  ;;  %v1550_v10 = vmax.f32 %v5000_v2, 0.0  ;;  %v5041_v55 = vpop.f32.mrf.mxu1 }
 0x15b   :  { %v909_v0 = vpop.f32.mrf.mxu0 }
 0x15c   :  { %v1566_v14 = vmax.f32 %v909_v0, 0.0  ;;  %v1789_v32 = vpack.c.bf16 %v1565_v61, %v1561_v49  ;;  %v1542_v61 = vmax.f32 %v4981_v38, 0.0  ;;  %v1785_v0 = vpack.c.bf16 %v1557_v9, %v1553_v40  ;;  %v5046_v18 = vpop.f32.mrf.mxu1 }
 0x15d   :  { %v913_v5 = vpop.f32.mrf.mxu0  ;;  %v1541_v9 = vmax.f32 %v4976_v56, 0.0 }
 0x15e   :  { %v1790_v51 = vpack.c.bf16 %v1566_v14, %v1562_v43  ;;  %v1546_v43 = vmax.f32 %v4989_v45, 0.0  ;;  %v1569_v57 = vmax.f32 %v913_v5, 0.0  ;;  %v1545_v14 = vmax.f32 %v4983_v36, 0.0  ;;  %v5051_v5 = vpop.f32.mrf.mxu1 }
 0x15f   :  { %v915_v24 = vpop.f32.mrf.mxu0  ;;  %v1538_v45 = vmax.f32 %v4968_v23, 0.0 }
 0x160   :  { %1919 = vmatprep.subr.bf16.mxu0 %v1790_v51  ;;  %v1782_v22 = vpack.c.bf16 %v1550_v10, %v1546_v43  ;;  %v1570_v51 = vmax.f32 %v915_v24, 0.0  ;;  %v1781_v38 = vpack.c.bf16 %v1549_v34, %v1545_v14  ;;  %v1534_v24 = vmax.f32 %v4954_v58, 0.0 }
 0x161   :  { %v917_v35 = vpop.f32.mrf.mxu0  ;;  %1920 = vmatpush1.bf16.msra.mxu0 %v1789_v32  ;;  %v5057_v32 = vpop.f32.mrf.mxu1  ;;  %v1778_v36 = vpack.c.bf16 %v1542_v61, %v1538_v45  ;;  %v1537_v10 = vmax.f32 %v4958_v47, 0.0 }
 0x162   :  { %v1573_v6 = vmax.f32 %v917_v35, 0.0  ;;  %1921 = vmatprep.subr.bf16.mxu0 %v1786_v59  ;;  %v1530_v35 = vmax.f32 %v4943_v52, 0.0 }
 0x163   :  { %v919_v2 = vpop.f32.mrf.mxu0  ;;  %v5063_v23 = vpop.f32.mrf.mxu1  ;;  %v1777_v34 = vpack.c.bf16 %v1541_v9, %v1537_v10 }
 0x164   :  { %v5048_v8 = vpack.c.bf16 %v1573_v6, %v1569_v57  ;;  %v1574_v60 = vmax.f32 %v919_v2, 0.0  ;;  %v1526_v57 = vmax.f32 %v4935_v19, 0.0  ;;  %v1533_v6 = vmax.f32 %v4949_v63, 0.0 }
 0x165   :  { %v923_v49 = vpop.f32.mrf.mxu0  ;;  %1922 = vmatpush1.bf16.msra.mxu0 %v1785_v0  ;;  %v5068_v0 = vpop.f32.mrf.mxu1  ;;  %v1774_v58 = vpack.c.bf16 %v1534_v24, %v1530_v35  ;;  %v1522_v19 = vmax.f32 %v4926_v3, 0.0  ;;  %v1525_v63 = vmax.f32 %v4930_v44, 0.0 }
 0x166   :  { %v5054_v59 = vpack.c.bf16 %v1574_v60, %v1570_v51  ;;  %1923 = vmatprep.subr.bf16.mxu0 %v1782_v22  ;;  %v1577_v43 = vmax.f32 %v923_v49, 0.0  ;;  %v1529_v22 = vmax.f32 %v4937_v50, 0.0 }
 0x167   :  { %v925_v37 = vpop.f32.mrf.mxu0  ;;  %v5075_v52 = vpop.f32.mrf.mxu1  ;;  %v1770_v9 = vpack.c.bf16 %v1526_v57, %v1522_v19 }
 0x168   :  { %v1578_v61 = vmax.f32 %v925_v37, 0.0  ;;  %v1773_v14 = vpack.c.bf16 %v1533_v6, %v1529_v22 }
 0x169   :  { %v927_v40 = vpop.f32.mrf.mxu0  ;;  %1924 = vmatpush1.bf16.msra.mxu0 %v1781_v38  ;;  %v1266_v45 = vpop.f32.mrf.mxu1  ;;  %v1521_v38 = vmax.f32 %v4920_v42, 0.0 }
 0x16a   :  { %v1581_v56 = vmax.f32 %v927_v40, 0.0  ;;  %1925 = vmatprep.subr.bf16.mxu0 %v1778_v36  ;;  %v1571_v24 = vmax.f32 %v1266_v45, 0.0 }
 0x16b   :  { %v929_v39 = vpop.f32.mrf.mxu0  ;;  %v1268_v37 = vpop.f32.mrf.mxu1  ;;  %v1769_v36 = vpack.c.bf16 %v1525_v63, %v1521_v38 }
 0x16c   :  { %v5070_v47 = vpack.c.bf16 %v1581_v56, %v1577_v43  ;;  %v1582_v2 = vmax.f32 %v929_v39, 0.0  ;;  %v1572_v40 = vmax.f32 %v1268_v37, 0.0 }
 0x16d   :  { %v5073_v51 = vpop.f32.mrf.mxu0  ;;  %1926 = vmatpush1.bf16.msra.mxu0 %v1777_v34  ;;  %v1270_v10 = vpop.f32.mrf.mxu1 }
 0x16e   :  { %v5078_v60 = vpack.c.bf16 %v1582_v2, %v1578_v61  ;;  %1927 = vmatprep.subr.bf16.mxu0 %v1774_v58  ;;  %v1575_v35 = vmax.f32 %v1270_v10, 0.0 }
 0x16f   :  { %v5081_v49 = vpop.f32.mrf.mxu0  ;;  %v1272_v43 = vpop.f32.mrf.mxu1 }
 0x170   :  { %v5091_v56 = vpack.c.bf16 %v1575_v35, %v1571_v24  ;;  %v1576_v42 = vmax.f32 %v1272_v43, 0.0 }
 0x171   :  { %v5084_v50 = vpop.f32.mrf.mxu0  ;;  %1928 = vmatpush1.bf16.msra.mxu0 %v1773_v14  ;;  %v1276_v6 = vpop.f32.mrf.mxu1 }
 0x172   :  { %1929 = vmatprep.subr.bf16.mxu0 %v1770_v9  ;;  %6064 = vst [vmem:[#allocation150_spill] sm:$0xff] %v5091_v56  ;;  %v5095_v34 = vpack.c.bf16 %v1576_v42, %v1572_v40  ;;  %v1579_v61 = vmax.f32 %v1276_v6, 0.0 }
 0x173   :  { %v5086_v3 = vpop.f32.mrf.mxu0  ;;  %v1278_v58 = vpop.f32.mrf.mxu1 }
 0x174   :  { %6065 = vst [vmem:[#allocation151_spill] sm:$0xff] %v5095_v34 }
 0x175   :  { %v5088_v44 = vpop.f32.mrf.mxu0  ;;  %1930 = vmatpush1.bf16.msra.mxu0 %v1769_v36  ;;  %v1280_v22 = vpop.f32.mrf.mxu1 }
 0x176   :  { %1931 = vmatprep.subr.bf16.mxu0 %v4923_v11  ;;  %v1580_v11 = vmax.f32 %v1278_v58, 0.0  ;;  %v1583_v19 = vmax.f32 %v1280_v22, 0.0 }
 0x177   :  { %v5093_v57 = vpop.f32.mrf.mxu0  ;;  %v1282_v14 = vpop.f32.mrf.mxu1 }
 0x178   :  { %v5106_v45 = vpack.c.bf16 %v1583_v19, %v1579_v61  ;;  %v1584_v9 = vmax.f32 %v1282_v14, 0.0 }
 0x179   :  { %v5097_v39 = vpop.f32.mrf.mxu0  ;;  %1932 = vmatpush1.bf16.msra.mxu0 %v4918_v17  ;;  %v1286_v17 = vpop.f32.mrf.mxu1 }
 0x17a   :  { %1933 = vmatprep.subr.bf16.mxu0 %v4910_v46  ;;  %6066 = vst [vmem:[#allocation152_spill] sm:$0xff] %v5106_v45  ;;  %v5110_v37 = vpack.c.bf16 %v1584_v9, %v1580_v11  ;;  %v1587_v36 = vmax.f32 %v1286_v17, 0.0 }
 0x17b   :  { %v5101_v2 = vpop.f32.mrf.mxu0  ;;  %v5114_v24 = vpop.f32.mrf.mxu1 }
 0x17c   :  { %6067 = vst [vmem:[#allocation153_spill] sm:$0xff] %v5110_v37  ;;  %6068 = vst [vmem:[#allocation154_spill] sm:$0xff] %v5114_v24 }
 0x17d   :  { %v5103_v63 = vpop.f32.mrf.mxu0  ;;  %1934 = vmatpush1.bf16.msra.mxu0 %v4907_v21  ;;  %v1290_v40 = vpop.f32.mrf.mxu1 }
 0x17e   :  { %v1591_v35 = vmax.f32 %v1290_v40, 0.0 }
 0x17f   :  { %v5108_v38 = vpop.f32.mrf.mxu0  ;;  %v5120_v21 = vpop.f32.mrf.mxu1 }
 0x180   :  { %6069 = vst [vmem:[#allocation155_spill] sm:$0xff] %v5120_v21  ;;  %v5122_v42 = vpack.c.bf16 %v1591_v35, %v1587_v36 }
 0x181   :  { %v5112_v46 = vpop.f32.mrf.mxu0  ;;  %v5124_v58 = vpop.f32.mrf.mxu1 }
 0x182   :  { %6070 = vst [vmem:[#allocation156_spill] sm:$0xff] %v5122_v42  ;;  %6071 = vst [vmem:[#allocation157_spill] sm:$0xff] %v5124_v58 }
 0x183   :  { %v5116_v10 = vpop.f32.mrf.mxu0  ;;  %v5126_v22 = vpop.f32.mrf.mxu1 }
 0x184   :  { %6072 = vst [vmem:[#allocation158_spill] sm:$0xff] %v5126_v22 }
 0x185   :  { %v5118_v43 = vpop.f32.mrf.mxu0  ;;  %v5128_v19 = vpop.f32.mrf.mxu1 }
 0x186   :  { %6073 = vst [vmem:[#allocation159_spill] sm:$0xff] %v5128_v19 }
 0x187   :  { %v965_v6 = vpop.f32.mrf.mxu0  ;;  %v5130_v9 = vpop.f32.mrf.mxu1 }
 0x188   :  { %6074 = vst [vmem:[#allocation160_spill] sm:$0xff] %v5130_v9 }
 0x189   :  { %v967_v61 = vpop.f32.mrf.mxu0  ;;  %v5132_v40 = vpop.f32.mrf.mxu1 }
 0x18a   :  { %6075 = vst [vmem:[#allocation161_spill] sm:$0xff] %v5132_v40 }
 0x18b   :  { %v969_v11 = vpop.f32.mrf.mxu0  ;;  %v5134_v28 = vpop.f32.mrf.mxu1 }
 0x18c   :  { %6076 = vst [vmem:[#allocation162_spill] sm:$0xff] %v5134_v28  ;;  %v1614_v54 = vmax.f32 %v969_v11, 0.0 }
 0x18d   :  { %v973_v14 = vpop.f32.mrf.mxu0  ;;  %v5136_v35 = vpop.f32.mrf.mxu1 }
 0x18e   :  { %6077 = vst [vmem:[#allocation163_spill] sm:$0xff] %v5136_v35 }
 0x18f   :  { %v975_v17 = vpop.f32.mrf.mxu0  ;;  %v5138_v56 = vpop.f32.mrf.mxu1 }
 0x190   :  { %6078 = vst [vmem:[#allocation164_spill] sm:$0xff] %v5138_v56  ;;  %v1618_v35 = vmax.f32 %v975_v17, 0.0  ;;  %v1606_v17 = vmax.f32 %v5116_v10, 0.0 }
 0x191   :  { %v977_v13 = vpop.f32.mrf.mxu0  ;;  %v5140_v45 = vpop.f32.mrf.mxu1 }
 0x192   :  { %6079 = vst [vmem:[#allocation165_spill] sm:$0xff] %v5140_v45  ;;  %v1621_v56 = vmax.f32 %v977_v13, 0.0 }
 0x193   :  { %v979_v36 = vpop.f32.mrf.mxu0  ;;  %v5142_v42 = vpop.f32.mrf.mxu1 }
 0x194   :  { %6080 = vst [vmem:[#allocation166_spill] sm:$0xff] %v5142_v42  ;;  %v1622_v24 = vmax.f32 %v979_v36, 0.0 }
 0x195   :  { %v983_v30 = vpop.f32.mrf.mxu0  ;;  %v5144_v21 = vpop.f32.mrf.mxu1 }
 0x196   :  { %v1625_v22 = vmax.f32 %v983_v30, 0.0  ;;  %v1818_v42 = vpack.c.bf16 %v1622_v24, %v1618_v35 }
 0x197   :  { %v985_v34 = vpop.f32.mrf.mxu0  ;;  %v5146_v25 = vpop.f32.mrf.mxu1 }
 0x198   :  { %v1626_v40 = vmax.f32 %v985_v34, 0.0  ;;  %v1610_v34 = vmax.f32 %v965_v6, 0.0 }
 0x199   :  { %v987_v37 = vpop.f32.mrf.mxu0  ;;  %v5148_v45 = vpop.f32.mrf.mxu1 }
 0x19a   :  { %v1629_v19 = vmax.f32 %v987_v37, 0.0  ;;  %v1617_v37 = vmax.f32 %v973_v14, 0.0 }
 0x19b   :  { %v989_v58 = vpop.f32.mrf.mxu0  ;;  %v5150_v36 = vpop.f32.mrf.mxu1 }
 0x19c   :  { %v1630_v9 = vmax.f32 %v989_v58, 0.0  ;;  %v1821_v62 = vpack.c.bf16 %v1629_v19, %v1625_v22  ;;  %v1817_v13 = vpack.c.bf16 %v1621_v56, %v1617_v37  ;;  %v1605_v56 = vmax.f32 %v5112_v46, 0.0 }
 0x19d   :  { %v993_v28 = vpop.f32.mrf.mxu0  ;;  %v5153_v19 = vpop.f32.mrf.mxu1  ;;  %v1590_v46 = vmax.f32 %v5086_v3, 0.0  ;;  %v1586_v3 = vmax.f32 %v5081_v49, 0.0 }
 0x19e   :  { %v1822_v48 = vpack.c.bf16 %v1630_v9, %v1626_v40  ;;  %v1633_v30 = vmax.f32 %v993_v28, 0.0  ;;  %v1613_v9 = vmax.f32 %v967_v61, 0.0  ;;  %v1814_v40 = vpack.c.bf16 %v1614_v54, %v1610_v34 }
 0x19f   :  { %v995_v33 = vpop.f32.mrf.mxu0  ;;  %v5158_v6 = vpop.f32.mrf.mxu1  ;;  %v1602_v28 = vmax.f32 %v5108_v38, 0.0  ;;  %v1594_v38 = vmax.f32 %v5093_v57, 0.0 }
 0x1a0   :  { %1935 = vmatprep.subr.bf16.mxu0 %v1822_v48  ;;  %v1634_v11 = vmax.f32 %v995_v33, 0.0  ;;  %v1598_v33 = vmax.f32 %v5101_v2, 0.0 }
 0x1a1   :  { %v997_v7 = vpop.f32.mrf.mxu0  ;;  %1936 = vmatpush2.bf16.msra.mxu0 %v1821_v62  ;;  %v1609_v62 = vmax.f32 %v5118_v43, 0.0  ;;  %v5164_v54 = vpop.f32.mrf.mxu1  ;;  %v1810_v61 = vpack.c.bf16 %v1606_v17, %v1602_v28  ;;  %v1601_v43 = vmax.f32 %v5103_v63, 0.0 }
 0x1a2   :  { %v1637_v58 = vmax.f32 %v997_v7, 0.0  ;;  %1937 = vmatprep.subr.bf16.mxu0 %v1818_v42  ;;  %v1806_v2 = vpack.c.bf16 %v1598_v33, %v1594_v38 }
 0x1a3   :  { %v999_v22 = vpop.f32.mrf.mxu0  ;;  %v1813_v10 = vpack.c.bf16 %v1613_v9, %v1609_v62  ;;  %v5168_v37 = vpop.f32.mrf.mxu1  ;;  %v1809_v9 = vpack.c.bf16 %v1605_v56, %v1601_v43 }
 0x1a4   :  { %v5155_v24 = vpack.c.bf16 %v1637_v58, %v1633_v30  ;;  %v1638_v48 = vmax.f32 %v999_v22, 0.0  ;;  %v1597_v58 = vmax.f32 %v5097_v39, 0.0  ;;  %v1589_v39 = vmax.f32 %v5084_v50, 0.0 }
 0x1a5   :  { %v1003_v14 = vpop.f32.mrf.mxu0  ;;  %1938 = vmatpush2.bf16.msra.mxu0 %v1817_v13  ;;  %v5173_v22 = vpop.f32.mrf.mxu1 }
 0x1a6   :  { %v5161_v7 = vpack.c.bf16 %v1638_v48, %v1634_v11  ;;  %1939 = vmatprep.subr.bf16.mxu0 %v1814_v40  ;;  %v1641_v34 = vmax.f32 %v1003_v14, 0.0  ;;  %v1593_v11 = vmax.f32 %v5088_v44, 0.0 }
 0x1a7   :  { %v1005_v42 = vpop.f32.mrf.mxu0  ;;  %v5180_v57 = vpop.f32.mrf.mxu1 }
 0x1a8   :  { %v1642_v17 = vmax.f32 %v1005_v42, 0.0  ;;  %v1805_v14 = vpack.c.bf16 %v1597_v58, %v1593_v11  ;;  %v1585_v42 = vmax.f32 %v5073_v51, 0.0 }
 0x1a9   :  { %v1007_v35 = vpop.f32.mrf.mxu0  ;;  %1940 = vmatpush2.bf16.msra.mxu0 %v1813_v10  ;;  %v1346_v56 = vpop.f32.mrf.mxu1  ;;  %v1802_v10 = vpack.c.bf16 %v1590_v46, %v1586_v3 }
 0x1aa   :  { %v1645_v30 = vmax.f32 %v1007_v35, 0.0  ;;  %1941 = vmatprep.subr.bf16.mxu0 %v1810_v61  ;;  %v1635_v61 = vmax.f32 %v1346_v56, 0.0  ;;  %v1801_v43 = vpack.c.bf16 %v1589_v39, %v1585_v42  ;;  %v1556_v39 = vmax.f32 %v5041_v55, 0.0 }
 0x1ab   :  { %v1009_v13 = vpop.f32.mrf.mxu0  ;;  %v1348_v33 = vpop.f32.mrf.mxu1 }
 0x1ac   :  { %v5175_v63 = vpack.c.bf16 %v1645_v30, %v1641_v34  ;;  %v1646_v40 = vmax.f32 %v1009_v13, 0.0  ;;  %v1636_v38 = vmax.f32 %v1348_v33, 0.0  ;;  %v1564_v13 = vmax.f32 %v5063_v23, 0.0 }
 0x1ad   :  { %v5178_v48 = vpop.f32.mrf.mxu0  ;;  %1942 = vmatpush2.bf16.msra.mxu0 %v1809_v9  ;;  %v1350_v35 = vpop.f32.mrf.mxu1  ;;  %v1567_v23 = vmax.f32 %v5068_v0, 0.0 }
 0x1ae   :  { %v5183_v62 = vpack.c.bf16 %v1646_v40, %v1642_v17  ;;  %1943 = vmatprep.subr.bf16.mxu0 %v1806_v2  ;;  %v1639_v34 = vmax.f32 %v1350_v35, 0.0  ;;  %v1568_v2 = vmax.f32 %v5075_v52, 0.0  ;;  %v1560_v52 = vmax.f32 %v5051_v5, 0.0 }
 0x1af   :  { %v5186_v28 = vpop.f32.mrf.mxu0  ;;  %v1352_v30 = vpop.f32.mrf.mxu1  ;;  %v1555_v5 = vmax.f32 %v5036_v26, 0.0 }
 0x1b0   :  { %v5196_v46 = vpack.c.bf16 %v1639_v34, %v1635_v61  ;;  %v1640_v51 = vmax.f32 %v1352_v30, 0.0  ;;  %v1552_v34 = vmax.f32 %v5034_v20, 0.0  ;;  %v1788_v30 = vpack.c.bf16 %v1560_v52, %v1556_v39 }
 0x1b1   :  { %v5189_v44 = vpop.f32.mrf.mxu0  ;;  %1944 = vmatpush2.bf16.msra.mxu0 %v1805_v14  ;;  %v1356_v9 = vpop.f32.mrf.mxu1  ;;  %v1563_v14 = vmax.f32 %v5057_v32, 0.0  ;;  %v1551_v20 = vmax.f32 %v5032_v16, 0.0  ;;  %v1544_v39 = vmax.f32 %v5021_v15, 0.0 }
 0x1b2   :  { %1945 = vmatprep.subr.bf16.mxu0 %v1802_v10  ;;  %6081 = vst [vmem:[#allocation167_spill] sm:$0xff] %v5196_v46  ;;  %v5202_v17 = vpack.c.bf16 %v1640_v51, %v1636_v38  ;;  %v1792_v10 = vpack.c.bf16 %v1568_v2, %v1564_v13  ;;  %v1540_v2 = vmax.f32 %v5015_v12, 0.0 }
 0x1b3   :  { %v5191_v49 = vpop.f32.mrf.mxu0  ;;  %v1358_v11 = vpop.f32.mrf.mxu1  ;;  %v1791_v35 = vpack.c.bf16 %v1567_v23, %v1563_v14 }
 0x1b4   :  { %6082 = vst [vmem:[#allocation168_spill] sm:$0xff] %v5202_v17  ;;  %v1644_v42 = vmax.f32 %v1358_v11, 0.0  ;;  %v1780_v16 = vpack.c.bf16 %v1544_v39, %v1540_v2  ;;  %v6084_v39 = vld [vmem:[#allocation149_spill] sm:$0xff]  ;;  %v6089_v17 = vld [vmem:[#allocation143_spill] sm:$0xff] }
 0x1b5   :  { %v5193_v50 = vpop.f32.mrf.mxu0  ;;  %1946 = vmatpush2.bf16.msra.mxu0 %v1801_v43  ;;  %v1360_v56 = vpop.f32.mrf.mxu1  ;;  %v1559_v43 = vmax.f32 %v5046_v18, 0.0 }
 0x1b6   :  { %1947 = vmatprep.subr.bf16.mxu0 %v5078_v60  ;;  %v1643_v60 = vmax.f32 %v1356_v9, 0.0  ;;  %v1647_v33 = vmax.f32 %v1360_v56, 0.0 }
 0x1b7   :  { %v5198_v58 = vpop.f32.mrf.mxu0  ;;  %v1787_v11 = vpack.c.bf16 %v1559_v43, %v1555_v5 }
 0x1b8   :  { %v5221_v55 = vpack.c.bf16 %v1647_v33, %v1643_v60 }
 0x1b9   :  { %v5204_v40 = vpop.f32.mrf.mxu0  ;;  %1948 = vmatpush2.bf16.msra.mxu0 %v5070_v47  ;;  %v5219_v47 = vcombine.high %v5017_v53, %v5017_v53 }
 0x1ba   :  { %1949 = vmatprep.subr.bf16.mxu0 %v5054_v59  ;;  %v1362_v59 = vpop.f32.mrf.mxu1  ;;  %6083 = vst [vmem:[#allocation169_spill] sm:$0xff] %v5221_v55 }
 0x1bb   :  { %v5208_v3 = vpop.f32.mrf.mxu0  ;;  %v1648_v32 = vmax.f32 %v1362_v59, 0.0  ;;  %1992 = vmatprep.mubr.bf16.mxu1 %v5219_v47 }
 0x1bc   :  { %v1366_v38 = vpop.f32.mrf.mxu1 }
 0x1bd   :  { %v5214_v61 = vpop.f32.mrf.mxu0  ;;  %1950 = vmatpush2.bf16.msra.mxu0 %v5048_v8  ;;  %v1548_v8 = vmax.f32 %v5030_v31, 0.0  ;;  %v5231_v51 = vpack.c.bf16 %v1648_v32, %v1644_v42  ;;  %v1651_v26 = vmax.f32 %v1366_v38, 0.0  ;;  %v1547_v31 = vmax.f32 %v5026_v1, 0.0 }
 0x1be   :  { %2001 = vmatprep.subr.bf16.mxu0 %v1792_v10  ;;  %v1368_v13 = vpop.f32.mrf.mxu1 }
 0x1bf   :  { %v5223_v0 = vpop.f32.mrf.mxu0  ;;  %v1784_v14 = vpack.c.bf16 %v1552_v34, %v1548_v8  ;;  %v1652_v23 = vmax.f32 %v1368_v13, 0.0  ;;  %v1783_v1 = vpack.c.bf16 %v1551_v20, %v1547_v31 }
 0x1c0   :  { %1952 = vmatmul.mubr.bf16.vlgmr.msra.gmra.mxu0 %v4971_v29  ;;  %v1370_v60 = vpop.f32.mrf.mxu1 }
 0x1c1   :  { %v5233_v9 = vpop.f32.mrf.mxu0  ;;  %2002 = vmatpush1.bf16.msra.mxu0 %v1791_v35  ;;  %2033 = vmatprep.mubr.bf16.mxu0 %v5017_v53  ;;  %v1655_v56 = vmax.f32 %v1370_v60, 0.0 }
 0x1c2   :  { %2003 = vmatprep.subr.bf16.mxu0 %v1788_v30  ;;  %v1372_v53 = vpop.f32.mrf.mxu1 }
 0x1c3   :  { %v5236_v18 = vpop.f32.mrf.mxu0  ;;  %v5244_v10 = vpack.c.bf16 %v1655_v56, %v1651_v26  ;;  %v1656_v42 = vmax.f32 %v1372_v53, 0.0 }
 0x1c4   :  { %v1376_v33 = vpop.f32.mrf.mxu1 }
 0x1c5   :  { %v5242_v52 = vpop.f32.mrf.mxu0  ;;  %2004 = vmatpush1.bf16.msra.mxu0 %v1787_v11  ;;  %v5248_v59 = vpack.c.bf16 %v1656_v42, %v1652_v23  ;;  %v1659_v5 = vmax.f32 %v1376_v33, 0.0  ;;  %v6085_v42 = vld [vmem:[#allocation148_spill] sm:$0xff]  ;;  %v6086_v33 = vld [vmem:[#allocation147_spill] sm:$0xff] }
 0x1c6   :  { %2005 = vmatprep.subr.bf16.mxu0 %v1784_v14  ;;  %v1378_v15 = vpop.f32.mrf.mxu1 }
 0x1c7   :  { %v5246_v12 = vpop.f32.mrf.mxu0  ;;  %v1660_v38 = vmax.f32 %v1378_v15, 0.0 }
 0x1c8   :  { %v1380_v35 = vpop.f32.mrf.mxu1 }
 0x1c9   :  { %v5250_v32 = vpop.f32.mrf.mxu0  ;;  %2006 = vmatpush1.bf16.msra.mxu0 %v1783_v1  ;;  %v1663_v8 = vmax.f32 %v1380_v35, 0.0 }
 0x1ca   :  { %2007 = vmatprep.subr.bf16.mxu0 %v1780_v16  ;;  %v1382_v30 = vpop.f32.mrf.mxu1 }
 0x1cb   :  { %v5252_v43 = vpop.f32.mrf.mxu0  ;;  %v5258_v13 = vpack.c.bf16 %v1663_v8, %v1659_v5  ;;  %v1664_v26 = vmax.f32 %v1382_v30, 0.0 }
 0x1cc   :  { %v1386_v31 = vpop.f32.mrf.mxu1 }
 0x1cd   :  { %v5254_v34 = vpop.f32.mrf.mxu0  ;;  %2008 = vmatpush1.bf16.msra.mxu0 %v5023_v27  ;;  %v5260_v20 = vpack.c.bf16 %v1664_v26, %v1660_v38  ;;  %v1667_v14 = vmax.f32 %v1386_v31, 0.0  ;;  %v1632_v38 = vmax.f32 %v5180_v57, 0.0  ;;  %v6087_v26 = vld [vmem:[#allocation146_spill] sm:$0xff] }
 0x1ce   :  { %2009 = vmatprep.subr.bf16.mxu0 %v5007_v4  ;;  %v1388_v60 = vpop.f32.mrf.mxu1 }
 0x1cf   :  { %v1055_v2 = vpop.f32.mrf.mxu0  ;;  %v1668_v56 = vmax.f32 %v1388_v60, 0.0  ;;  %v6088_v60 = vld [vmem:[#allocation144_spill] sm:$0xff] }
 0x1d0   :  { %v1390_v27 = vpop.f32.mrf.mxu1  ;;  %v1682_v55 = vmax.f32 %v1055_v2, 0.0  ;;  %v6091_v2 = vld [vmem:[#allocation162_spill] sm:$0xff] }
 0x1d1   :  { %v5262_v11 = vpop.f32.mrf.mxu0  ;;  %2010 = vmatpush1.bf16.msra.mxu0 %v5004_v41  ;;  %v1671_v53 = vmax.f32 %v1390_v27, 0.0  ;;  %v1628_v41 = vmax.f32 %v5168_v37, 0.0  ;;  %v1631_v37 = vmax.f32 %v5173_v22, 0.0  ;;  %v1619_v22 = vmax.f32 %v5148_v45, 0.0 }
 0x1d2   :  { %2011 = vmatprep.subr.bf16.mxu0 %v6084_v39  ;;  %v1392_v1 = vpop.f32.mrf.mxu1  ;;  %v1620_v39 = vmax.f32 %v5150_v36, 0.0 }
 0x1d3   :  { %v1059_v23 = vpop.f32.mrf.mxu0  ;;  %v5268_v16 = vpack.c.bf16 %v1671_v53, %v1667_v14  ;;  %v1672_v15 = vmax.f32 %v1392_v1, 0.0  ;;  %v1624_v53 = vmax.f32 %v5158_v6, 0.0 }
 0x1d4   :  { %v5270_v35 = vpop.f32.mrf.mxu1 }
 0x1d5   :  { %v1063_v4 = vpop.f32.mrf.mxu0  ;;  %2012 = vmatpush1.bf16.msra.mxu0 %v6085_v42  ;;  %v5274_v8 = vpack.c.bf16 %v1672_v15, %v1668_v56  ;;  %v1627_v42 = vmax.f32 %v5164_v54, 0.0  ;;  %v1686_v56 = vmax.f32 %v1059_v23, 0.0  ;;  %v1824_v15 = vpack.c.bf16 %v1632_v38, %v1628_v41 }
 0x1d6   :  { %2013 = vmatprep.subr.bf16.mxu0 %v6086_v33  ;;  %v5277_v31 = vpop.f32.mrf.mxu1  ;;  %v1616_v54 = vmax.f32 %v5146_v25, 0.0  ;;  %v1685_v23 = vmax.f32 %v5262_v11, 0.0  ;;  %v1681_v25 = vmax.f32 %v5254_v34, 0.0  ;;  %v1670_v34 = vmax.f32 %v5236_v18, 0.0 }
 0x1d7   :  { %v1065_v5 = vpop.f32.mrf.mxu0  ;;  %v1823_v41 = vpack.c.bf16 %v1631_v37, %v1627_v42 }
 0x1d8   :  { %v5284_v57 = vpop.f32.mrf.mxu1  ;;  %v1690_v1 = vmax.f32 %v1065_v5, 0.0 }
 0x1d9   :  { %v1067_v30 = vpop.f32.mrf.mxu0  ;;  %2014 = vmatpush1.bf16.msra.mxu0 %v6087_v26  ;;  %v1689_v26 = vmax.f32 %v1063_v4, 0.0  ;;  %v1623_v4 = vmax.f32 %v5153_v19, 0.0  ;;  %v1615_v19 = vmax.f32 %v5144_v21, 0.0 }
 0x1da   :  { %2015 = vmatprep.subr.bf16.mxu0 %v6088_v60  ;;  %v1693_v14 = vmax.f32 %v1067_v30, 0.0  ;;  %v6090_v60 = vld [vmem:[#allocation166_spill] sm:$0xff]  ;;  %v5288_v30 = vpop.f32.mrf.mxu1 }
 0x1db   :  { %v1069_v27 = vpop.f32.mrf.mxu0  ;;  %v1612_v36 = vmax.f32 %v6090_v60, 0.0  ;;  %v1850_v60 = vpack.c.bf16 %v1686_v56, %v1682_v55 }
 0x1dc   :  { %v1694_v33 = vmax.f32 %v1069_v27, 0.0  ;;  %v1853_v5 = vpack.c.bf16 %v1693_v14, %v1689_v26  ;;  %v5294_v38 = vpop.f32.mrf.mxu1  ;;  %v6093_v14 = vld [vmem:[#allocation165_spill] sm:$0xff] }
 0x1dd   :  { %v1073_v46 = vpop.f32.mrf.mxu0  ;;  %2016 = vmatpush1.bf16.msra.mxu0 %v6089_v17  ;;  %v1678_v17 = vmax.f32 %v5252_v43, 0.0  ;;  %v1611_v26 = vmax.f32 %v6093_v14, 0.0  ;;  %v1674_v43 = vmax.f32 %v5246_v12, 0.0  ;;  %v1816_v56 = vpack.c.bf16 %v1616_v54, %v1612_v36  ;;  %v6094_v36 = vld [vmem:[#allocation158_spill] sm:$0xff] }
 0x1de   :  { %v1854_v6 = vpack.c.bf16 %v1694_v33, %v1690_v1  ;;  %2017 = vmatprep.subr.bf16.mxu0 %v1824_v15  ;;  %v1604_v1 = vmax.f32 %v6091_v2, 0.0  ;;  %v1820_v33 = vpack.c.bf16 %v1624_v53, %v1620_v39  ;;  %v6092_v15 = vld [vmem:[#allocation164_spill] sm:$0xff]  ;;  %v5302_v42 = vpop.f32.mrf.mxu1  ;;  %v1697_v55 = vmax.f32 %v1073_v46, 0.0 }
 0x1df   :  { %v1075_v27 = vpop.f32.mrf.mxu0  ;;  %v1608_v11 = vmax.f32 %v6092_v15, 0.0  ;;  %v1677_v39 = vmax.f32 %v5250_v32, 0.0  ;;  %v1849_v53 = vpack.c.bf16 %v1685_v23, %v1681_v25  ;;  %v1846_v21 = vpack.c.bf16 %v1678_v17, %v1674_v43  ;;  %v6097_v25 = vld [vmem:[#allocation163_spill] sm:$0xff] }
 0x1e0   :  { %1960 = vmatprep.subr.bf16.mxu1 %v1854_v6  ;;  %v5307_v2 = vpop.f32.mrf.mxu1  ;;  %v1673_v46 = vmax.f32 %v5242_v52, 0.0  ;;  %v1596_v54 = vmax.f32 %v6094_v36, 0.0  ;;  %v1666_v32 = vmax.f32 %v5223_v0, 0.0  ;;  %v1815_v43 = vpack.c.bf16 %v1615_v19, %v1611_v26 }
 0x1e1   :  { %v1077_v45 = vpop.f32.mrf.mxu0  ;;  %1961 = vmatpush1.bf16.msra.mxu1 %v1853_v5  ;;  %2018 = vmatpush2.bf16.msra.mxu0 %v1823_v41  ;;  %v1819_v5 = vpack.c.bf16 %v1623_v4, %v1619_v22  ;;  %v1698_v41 = vmax.f32 %v1075_v27, 0.0  ;;  %v6095_v22 = vld [vmem:[#allocation160_spill] sm:$0xff]  ;;  %v6096_v27 = vld [vmem:[#allocation161_spill] sm:$0xff]  ;;  %v1658_v19 = vmax.f32 %v5198_v58, 0.0  ;;  %v1657_v58 = vmax.f32 %v5193_v50, 0.0 }
 0x1e2   :  { %v1701_v37 = vmax.f32 %v1077_v45, 0.0  ;;  %1962 = vmatprep.subr.bf16.mxu1 %v1850_v60  ;;  %2019 = vmatprep.subr.bf16.mxu0 %v1820_v33  ;;  %v5313_v18 = vpop.f32.mrf.mxu1  ;;  %v1600_v4 = vmax.f32 %v6095_v22, 0.0  ;;  %v1603_v17 = vmax.f32 %v6096_v27, 0.0  ;;  %v1669_v60 = vmax.f32 %v5233_v9, 0.0  ;;  %v6100_v9 = vld [vmem:[#allocation157_spill] sm:$0xff] }
 0x1e3   :  { %v1079_v6 = vpop.f32.mrf.mxu0  ;;  %v1845_v52 = vpack.c.bf16 %v1677_v39, %v1673_v46  ;;  %v1607_v45 = vmax.f32 %v6097_v25, 0.0  ;;  %v1842_v0 = vpack.c.bf16 %v1670_v34, %v1666_v32  ;;  %v1595_v39 = vmax.f32 %v6100_v9, 0.0  ;;  %v6101_v46 = vld [vmem:[#allocation159_spill] sm:$0xff] }
 0x1e4   :  { %v5309_v15 = vpack.c.bf16 %v1701_v37, %v1697_v55  ;;  %v1702_v14 = vmax.f32 %v1079_v6, 0.0  ;;  %v5322_v55 = vpop.f32.mrf.mxu1  ;;  %v1662_v37 = vmax.f32 %v5208_v3, 0.0  ;;  %v1599_v36 = vmax.f32 %v6101_v46, 0.0 }
 0x1e5   :  { %v1083_v12 = vpop.f32.mrf.mxu0  ;;  %1963 = vmatpush1.bf16.msra.mxu1 %v1849_v53  ;;  %2020 = vmatpush2.bf16.msra.mxu0 %v1819_v5  ;;  %v6098_v53 = vld [vmem:[#allocation154_spill] sm:$0xff]  ;;  %v1812_v5 = vpack.c.bf16 %v1608_v11, %v1604_v1  ;;  %v1808_v32 = vpack.c.bf16 %v1600_v4, %v1596_v54  ;;  %v1661_v1 = vmax.f32 %v5204_v40, 0.0  ;;  %v1811_v27 = vpack.c.bf16 %v1607_v45, %v1603_v17 }
 0x1e6   :  { %v5316_v23 = vpack.c.bf16 %v1702_v14, %v1698_v41  ;;  %1964 = vmatprep.subr.bf16.mxu1 %v1846_v21  ;;  %2021 = vmatprep.subr.bf16.mxu0 %v1816_v56  ;;  %v1588_v6 = vmax.f32 %v6098_v53, 0.0  ;;  %v1665_v21 = vmax.f32 %v5214_v61, 0.0  ;;  %v6099_v56 = vld [vmem:[#allocation155_spill] sm:$0xff]  ;;  %v5330_v26 = vpop.f32.mrf.mxu1  ;;  %v1705_v3 = vmax.f32 %v1083_v12, 0.0 }
 0x1e7   :  { %v1085_v33 = vpop.f32.mrf.mxu0  ;;  %v1592_v14 = vmax.f32 %v6099_v56, 0.0  ;;  %v1654_v61 = vmax.f32 %v5191_v49, 0.0  ;;  %v1838_v25 = vpack.c.bf16 %v1662_v37, %v1658_v19  ;;  %v1650_v49 = vmax.f32 %v5186_v28, 0.0 }
 0x1e8   :  { %v1841_v11 = vpack.c.bf16 %v1669_v60, %v1665_v21  ;;  %v1653_v4 = vmax.f32 %v5189_v44, 0.0  ;;  %v1837_v17 = vpack.c.bf16 %v1661_v1, %v1657_v58 }
 0x1e9   :  { %v1087_v41 = vpop.f32.mrf.mxu0  ;;  %1965 = vmatpush1.bf16.msra.mxu1 %v1845_v52  ;;  %2022 = vmatpush2.bf16.msra.mxu0 %v1815_v43  ;;  %v5335_v52 = vpop.f32.mrf.mxu1  ;;  %v1706_v43 = vmax.f32 %v1085_v33, 0.0  ;;  %v1807_v33 = vpack.c.bf16 %v1599_v36, %v1595_v39  ;;  %v1834_v50 = vpack.c.bf16 %v1654_v61, %v1650_v49  ;;  %v1804_v37 = vpack.c.bf16 %v1592_v14, %v1588_v6  ;;  %v6102_v6 = vld [vmem:[#allocation156_spill] sm:$0xff]  ;;  %v6103_v14 = vld [vmem:[#allocation153_spill] sm:$0xff] }
 0x1ea   :  { %v1709_v34 = vmax.f32 %v1087_v41, 0.0  ;;  %1966 = vmatprep.subr.bf16.mxu1 %v1842_v0  ;;  %2023 = vmatprep.subr.bf16.mxu0 %v1812_v5  ;;  %v1649_v0 = vmax.f32 %v5178_v48, 0.0 }
 0x1eb   :  { %v1089_v22 = vpop.f32.mrf.mxu0  ;;  %v5342_v54 = vpop.f32.mrf.mxu1 }
 0x1ec   :  { %v5337_v53 = vpack.c.bf16 %v1709_v34, %v1705_v3  ;;  %v1710_v56 = vmax.f32 %v1089_v22, 0.0  ;;  %v1833_v41 = vpack.c.bf16 %v1653_v4, %v1649_v0  ;;  %v6108_v4 = vld [vmem:[#allocation150_spill] sm:$0xff] }
 0x1ed   :  { %v5340_v12 = vpop.f32.mrf.mxu0  ;;  %1967 = vmatpush1.bf16.msra.mxu1 %v1841_v11  ;;  %2024 = vmatpush2.bf16.msra.mxu0 %v1811_v27  ;;  %v1426_v45 = vpop.f32.mrf.mxu1  ;;  %v6106_v11 = vld [vmem:[#allocation152_spill] sm:$0xff] }
 0x1ee   :  { %v5345_v40 = vpack.c.bf16 %v1710_v56, %v1706_v43  ;;  %1968 = vmatprep.subr.bf16.mxu1 %v1838_v25  ;;  %2025 = vmatprep.subr.bf16.mxu0 %v1808_v32  ;;  %v1699_v21 = vmax.f32 %v1426_v45, 0.0 }
 0x1ef   :  { %v5348_v60 = vpop.f32.mrf.mxu0  ;;  %v1428_v28 = vpop.f32.mrf.mxu1 }
 0x1f0   :  { %v1700_v46 = vmax.f32 %v1428_v28, 0.0 }
 0x1f1   :  { %v5351_v5 = vpop.f32.mrf.mxu0  ;;  %1969 = vmatpush1.bf16.msra.mxu1 %v1837_v17  ;;  %2026 = vmatpush2.bf16.msra.mxu0 %v1807_v33  ;;  %v1430_v44 = vpop.f32.mrf.mxu1 }
 0x1f2   :  { %1970 = vmatprep.subr.bf16.mxu1 %v1834_v50  ;;  %2027 = vmatprep.subr.bf16.mxu0 %v1804_v37  ;;  %v1703_v19 = vmax.f32 %v1430_v44, 0.0 }
 0x1f3   :  { %v5353_v9 = vpop.f32.mrf.mxu0  ;;  %v1432_v48 = vpop.f32.mrf.mxu1 }
 0x1f4   :  { %v5360_v36 = vpack.c.bf16 %v1703_v19, %v1699_v21  ;;  %v1704_v3 = vmax.f32 %v1432_v48, 0.0 }
 0x1f5   :  { %v5355_v39 = vpop.f32.mrf.mxu0  ;;  %1971 = vmatpush1.bf16.msra.mxu1 %v1833_v41  ;;  %2028 = vmatpush2.bf16.msra.mxu0 %v6102_v6  ;;  %v1436_v32 = vpop.f32.mrf.mxu1 }
 0x1f6   :  { %1972 = vmatprep.subr.bf16.mxu1 %v5183_v62  ;;  %2029 = vmatprep.subr.bf16.mxu0 %v6103_v14  ;;  %6104 = vst [vmem:[#allocation149_spill] sm:$0xff] %v5360_v36  ;;  %v5364_v61 = vpack.c.bf16 %v1704_v3, %v1700_v46  ;;  %v6107_v62 = vld [vmem:[#allocation151_spill] sm:$0xff]  ;;  %v1707_v27 = vmax.f32 %v1436_v32, 0.0 }
 0x1f7   :  { %v5362_v34 = vpop.f32.mrf.mxu0  ;;  %v1438_v22 = vpop.f32.mrf.mxu1 }
 0x1f8   :  { %6105 = vst [vmem:[#allocation148_spill] sm:$0xff] %v5364_v61  ;;  %v1708_v56 = vmax.f32 %v1438_v22, 0.0 }
 0x1f9   :  { %v5366_v1 = vpop.f32.mrf.mxu0  ;;  %1973 = vmatpush1.bf16.msra.mxu1 %v5175_v63  ;;  %2030 = vmatpush2.bf16.msra.mxu0 %v6106_v11  ;;  %v1440_v43 = vpop.f32.mrf.mxu1 }
 0x1fa   :  { %1974 = vmatprep.subr.bf16.mxu1 %v5161_v7  ;;  %2031 = vmatprep.subr.bf16.mxu0 %v6107_v62  ;;  %v1711_v58 = vmax.f32 %v1440_v43, 0.0 }
 0x1fb   :  { %v5372_v25 = vpop.f32.mrf.mxu0  ;;  %v1442_v63 = vpop.f32.mrf.mxu1 }
 0x1fc   :  { %v5378_v17 = vpack.c.bf16 %v1711_v58, %v1707_v27  ;;  %v1712_v33 = vmax.f32 %v1442_v63, 0.0 }
 0x1fd   :  { %v5374_v49 = vpop.f32.mrf.mxu0  ;;  %1975 = vmatpush1.bf16.msra.mxu1 %v5155_v24  ;;  %2032 = vmatpush2.bf16.msra.mxu0 %v6108_v4  ;;  %v1446_v7 = vpop.f32.mrf.mxu1 }
 0x1fe   :  { %6109 = vst [vmem:[#allocation147_spill] sm:$0xff] %v5378_v17  ;;  %v5380_v50 = vpack.c.bf16 %v1712_v33, %v1708_v56  ;;  %v1715_v28 = vmax.f32 %v1446_v7, 0.0 }
 0x1ff   :  { %v1115_v45 = vpop.f32.mrf.mxu0  ;;  %v5385_v0 = vpop.f32.mrf.mxu1 }
 0x200   :  { %6110 = vst [vmem:[#allocation146_spill] sm:$0xff] %v5380_v50  ;;  %2034 = vmatmul.mubr.bf16.vlgmr.msra.gmra.mxu0 %v4971_v29  ;;  %6111 = vst [vmem:[#allocation144_spill] sm:$0xff] %v5385_v0 }
 0x201   :  { %v5383_v37 = vpop.f32.mrf.mxu0  ;;  %v1450_v41 = vpop.f32.mrf.mxu1 }
 0x202   :  { %v1719_v24 = vmax.f32 %v1450_v41, 0.0 }
 0x203   :  { %v1119_v21 = vpop.f32.mrf.mxu0  ;;  %v5387_v46 = vpop.f32.mrf.mxu1 }
 0x204   :  { %6112 = vst [vmem:[#allocation143_spill] sm:$0xff] %v5387_v46  ;;  %v5389_v19 = vpack.c.bf16 %v1719_v24, %v1715_v28 }
 0x205   :  { %v1123_v44 = vpop.f32.mrf.mxu0  ;;  %v5391_v14 = vpop.f32.mrf.mxu1 }
 0x206   :  { %6113 = vst [vmem:[#allocation166_spill] sm:$0xff] %v5389_v19  ;;  %6114 = vst [vmem:[#allocation162_spill] sm:$0xff] %v5391_v14 }
 0x207   :  { %v1125_v6 = vpop.f32.mrf.mxu0  ;;  %v5393_v11 = vpop.f32.mrf.mxu1 }
 0x208   :  { %6115 = vst [vmem:[#allocation164_spill] sm:$0xff] %v5393_v11 }
 0x209   :  { %v1127_v48 = vpop.f32.mrf.mxu0  ;;  %v5395_v27 = vpop.f32.mrf.mxu1 }
 0x20a   :  { %6116 = vst [vmem:[#allocation165_spill] sm:$0xff] %v5395_v27 }
 0x20b   :  { %v1129_v3 = vpop.f32.mrf.mxu0  ;;  %v5397_v58 = vpop.f32.mrf.mxu1 }
 0x20c   :  { %6117 = vst [vmem:[#allocation158_spill] sm:$0xff] %v5397_v58  ;;  %v1742_v27 = vmax.f32 %v1129_v3, 0.0  ;;  %v1729_v3 = vmax.f32 %v5374_v49, 0.0  ;;  %v1717_v49 = vmax.f32 %v5351_v5, 0.0 }
 0x20d   :  { %v1133_v32 = vpop.f32.mrf.mxu0  ;;  %v5399_v33 = vpop.f32.mrf.mxu1 }
 0x20e   :  { %6118 = vst [vmem:[#allocation160_spill] sm:$0xff] %v5399_v33  ;;  %v1745_v58 = vmax.f32 %v1133_v32, 0.0  ;;  %v1738_v33 = vmax.f32 %v1125_v6, 0.0 }
 0x20f   :  { %v1135_v22 = vpop.f32.mrf.mxu0  ;;  %v5401_v17 = vpop.f32.mrf.mxu1 }
 0x210   :  { %6119 = vst [vmem:[#allocation161_spill] sm:$0xff] %v5401_v17  ;;  %v1746_v50 = vmax.f32 %v1135_v22, 0.0 }
 0x211   :  { %v1137_v62 = vpop.f32.mrf.mxu0  ;;  %v5403_v11 = vpop.f32.mrf.mxu1 }
 0x212   :  { %v1749_v46 = vmax.f32 %v1137_v62, 0.0 }
 0x213   :  { %v1139_v43 = vpop.f32.mrf.mxu0  ;;  %v5405_v17 = vpop.f32.mrf.mxu1 }
 0x214   :  { %v1750_v41 = vmax.f32 %v1139_v43, 0.0  ;;  %v1881_v43 = vpack.c.bf16 %v1749_v46, %v1745_v58  ;;  %v5436_v58 = vcombine.high %v4971_v29, %v4971_v29 }
 0x215   :  { %v1143_v56 = vpop.f32.mrf.mxu0  ;;  %v5410_v6 = vpop.f32.mrf.mxu1 }
 0x216   :  { %v1753_v61 = vmax.f32 %v1143_v56, 0.0  ;;  %v1882_v14 = vpack.c.bf16 %v1750_v41, %v1746_v50  ;;  %v1737_v56 = vmax.f32 %v1123_v44, 0.0  ;;  %v1725_v44 = vmax.f32 %v5366_v1, 0.0 }
 0x217   :  { %v1145_v4 = vpop.f32.mrf.mxu0 }
 0x218   :  { %v1754_v24 = vmax.f32 %v1145_v4, 0.0  ;;  %v1734_v4 = vmax.f32 %v1119_v21, 0.0  ;;  %v1722_v21 = vmax.f32 %v5362_v34, 0.0  ;;  %v1713_v34 = vmax.f32 %v5340_v12, 0.0 }
 0x219   :  { %v1147_v63 = vpop.f32.mrf.mxu0  ;;  %v1691_v12 = vmax.f32 %v5322_v55, 0.0 }
 0x21a   :  { %v1757_v7 = vmax.f32 %v1147_v63, 0.0  ;;  %v1741_v63 = vmax.f32 %v1127_v48, 0.0 }
 0x21b   :  { %v1149_v28 = vpop.f32.mrf.mxu0 }
 0x21c   :  { %v1758_v36 = vmax.f32 %v1149_v28, 0.0  ;;  %v1885_v0 = vpack.c.bf16 %v1757_v7, %v1753_v61  ;;  %v1878_v28 = vpack.c.bf16 %v1742_v27, %v1738_v33  ;;  %v1733_v61 = vmax.f32 %v5383_v37, 0.0 }
 0x21d   :  { %v1877_v50 = vpack.c.bf16 %v1741_v63, %v1737_v56  ;;  %v1721_v37 = vmax.f32 %v5355_v39, 0.0  ;;  %v1692_v39 = vmax.f32 %v5330_v26, 0.0  ;;  %v1695_v27 = vmax.f32 %v5335_v52, 0.0 }
 0x21e   :  { %v1886_v19 = vpack.c.bf16 %v1758_v36, %v1754_v24  ;;  %v1730_v36 = vmax.f32 %v1115_v45, 0.0  ;;  %v1873_v46 = vpack.c.bf16 %v1733_v61, %v1729_v3  ;;  %v1718_v45 = vmax.f32 %v5353_v9, 0.0 }
 0x21f   :  { %v1869_v32 = vpack.c.bf16 %v1725_v44, %v1721_v37  ;;  %v1865_v9 = vpack.c.bf16 %v1717_v49, %v1713_v34  ;;  %v1688_v26 = vmax.f32 %v5313_v18, 0.0  ;;  %v1855_v55 = vpack.c.bf16 %v1695_v27, %v1691_v12  ;;  %v6125_v49 = vld [vmem:[#allocation164_spill] sm:$0xff]  ;;  %v6130_v12 = vld [vmem:[#allocation143_spill] sm:$0xff] }
 0x220   :  { %1976 = vmatprep.subr.bf16.mxu1 %v1886_v19  ;;  %v1726_v19 = vmax.f32 %v5372_v25, 0.0  ;;  %v1714_v25 = vmax.f32 %v5348_v60, 0.0  ;;  %v1696_v60 = vmax.f32 %v5342_v54, 0.0  ;;  %v1683_v54 = vmax.f32 %v5294_v38, 0.0 }
 0x221   :  { %1977 = vmatpush2.bf16.msra.mxu1 %v1885_v0  ;;  %v1874_v0 = vpack.c.bf16 %v1734_v4, %v1730_v36  ;;  %v1676_v52 = vmax.f32 %v5277_v31, 0.0  ;;  %v1680_v7 = vmax.f32 %v5288_v30, 0.0  ;;  %v1679_v18 = vmax.f32 %v5284_v57, 0.0 }
 0x222   :  { %1978 = vmatprep.subr.bf16.mxu1 %v1882_v14  ;;  %v1870_v48 = vpack.c.bf16 %v1726_v19, %v1722_v21  ;;  %v5416_v14 = vpop.f32.mrf.mxu1  ;;  %v1866_v22 = vpack.c.bf16 %v1718_v45, %v1714_v25  ;;  %v1856_v33 = vpack.c.bf16 %v1696_v60, %v1692_v39  ;;  %v1739_v19 = vmax.f32 %v5410_v6, 0.0  ;;  %v6123_v21 = vld [vmem:[#allocation161_spill] sm:$0xff]  ;;  %v6129_v60 = vld [vmem:[#allocation144_spill] sm:$0xff] }
 0x223   :  { %v1848_v41 = vpack.c.bf16 %v1680_v7, %v1676_v52  ;;  %v1732_v44 = vmax.f32 %v6123_v21, 0.0  ;;  %v1720_v27 = vmax.f32 %v6130_v12, 0.0 }
 0x224   :  { %v5421_v1 = vpop.f32.mrf.mxu1 }
 0x225   :  { %1979 = vmatpush2.bf16.msra.mxu1 %v1881_v43  ;;  %v6120_v43 = vld [vmem:[#allocation169_spill] sm:$0xff] }
 0x226   :  { %1980 = vmatprep.subr.bf16.mxu1 %v1878_v28  ;;  %v5423_v62 = vpop.f32.mrf.mxu1 }
 0x227   :  { %v1744_v61 = vmax.f32 %v5423_v62, 0.0  ;;  %v6128_v62 = vld [vmem:[#allocation165_spill] sm:$0xff] }
 0x228   :  { %v5429_v5 = vpop.f32.mrf.mxu1  ;;  %v1727_v39 = vmax.f32 %v6128_v62, 0.0 }
 0x229   :  { %1981 = vmatpush2.bf16.msra.mxu1 %v1877_v50 }
 0x22a   :  { %1982 = vmatprep.subr.bf16.mxu1 %v1874_v0  ;;  %v1743_v0 = vmax.f32 %v5421_v1, 0.0  ;;  %v6127_v1 = vld [vmem:[#allocation162_spill] sm:$0xff] }
 0x22c   :  { %v1879_v25 = vpack.c.bf16 %v1743_v0, %v1739_v19 }
 0x22d   :  { %1983 = vmatpush2.bf16.msra.mxu1 %v1873_v46  ;;  %v1736_v46 = vmax.f32 %v5405_v17, 0.0 }
 0x22e   :  { %1984 = vmatprep.subr.bf16.mxu1 %v1870_v48  ;;  %v6124_v48 = vld [vmem:[#allocation160_spill] sm:$0xff] }
 0x22f   :  { %v1731_v37 = vmax.f32 %v6124_v48, 0.0  ;;  %v1876_v6 = vpack.c.bf16 %v1736_v46, %v1732_v44 }
 0x231   :  { %1985 = vmatpush2.bf16.msra.mxu1 %v1869_v32  ;;  %v1724_v32 = vmax.f32 %v6125_v49, 0.0 }
 0x232   :  { %1986 = vmatprep.subr.bf16.mxu1 %v1866_v22  ;;  %v6126_v22 = vld [vmem:[#allocation158_spill] sm:$0xff] }
 0x233   :  { %v1728_v34 = vmax.f32 %v6126_v22, 0.0 }
 0x235   :  { %1987 = vmatpush2.bf16.msra.mxu1 %v1865_v9  ;;  %v1723_v9 = vmax.f32 %v6127_v1, 0.0 }
 0x236   :  { %1988 = vmatprep.subr.bf16.mxu1 %v5345_v40  ;;  %v1684_v40 = vmax.f32 %v5302_v42, 0.0 }
 0x238   :  { %v1852_v29 = vpack.c.bf16 %v1688_v26, %v1684_v40  ;;  %v1872_v40 = vpack.c.bf16 %v1728_v34, %v1724_v32 }
 0x239   :  { %1989 = vmatpush2.bf16.msra.mxu1 %v5337_v53  ;;  %v1488_v53 = vpop.f32.mrf.mxu1 }
 0x23a   :  { %1990 = vmatprep.subr.bf16.mxu1 %v5316_v23  ;;  %v1687_v23 = vmax.f32 %v5307_v2, 0.0  ;;  %v1748_v28 = vmax.f32 %v1488_v53, 0.0  ;;  %v6132_v53 = vld [vmem:[#allocation146_spill] sm:$0xff] }
 0x23b   :  { %v1490_v42 = vpop.f32.mrf.mxu1 }
 0x23c   :  { %v1851_v38 = vpack.c.bf16 %v1687_v23, %v1683_v54  ;;  %v6133_v54 = vld [vmem:[#allocation147_spill] sm:$0xff]  ;;  %v6134_v23 = vld [vmem:[#allocation148_spill] sm:$0xff] }
 0x23d   :  { %1991 = vmatpush2.bf16.msra.mxu1 %v5309_v15  ;;  %v1675_v15 = vmax.f32 %v5270_v35, 0.0  ;;  %v1492_v2 = vpop.f32.mrf.mxu1 }
 0x23e   :  { %2042 = vmatprep.subr.bf16.mxu1 %v1856_v33  ;;  %v6131_v33 = vld [vmem:[#allocation166_spill] sm:$0xff] }
 0x23f   :  { %v1847_v31 = vpack.c.bf16 %v1679_v18, %v1675_v15  ;;  %v1496_v30 = vpop.f32.mrf.mxu1 }
 0x240   :  { %1993 = vmatmul.mubr.bf16.vlgmr.msra.gmra.mxu1 %v5436_v58 }
 0x241   :  { %2043 = vmatpush1.bf16.msra.mxu1 %v1855_v55  ;;  %2074 = vmatprep.mubr.bf16.mxu1 %v5219_v47  ;;  %v1498_v24 = vpop.f32.mrf.mxu1  ;;  %v6135_v55 = vld [vmem:[#allocation149_spill] sm:$0xff] }
 0x242   :  { %2044 = vmatprep.subr.bf16.mxu1 %v1852_v29  ;;  %v1756_v57 = vmax.f32 %v1498_v24, 0.0 }
 0x243   :  { %v1500_v47 = vpop.f32.mrf.mxu1 }
 0x244   :  { %v1759_v4 = vmax.f32 %v1500_v47, 0.0 }
 0x245   :  { %2045 = vmatpush1.bf16.msra.mxu1 %v1851_v38  ;;  %v1502_v35 = vpop.f32.mrf.mxu1 }
 0x246   :  { %2046 = vmatprep.subr.bf16.mxu1 %v1848_v41  ;;  %v1760_v63 = vmax.f32 %v1502_v35, 0.0 }
 0x248   :  { %v1888_v56 = vpack.c.bf16 %v1760_v63, %v1756_v57 }
 0x249   :  { %2047 = vmatpush1.bf16.msra.mxu1 %v1847_v31 }
 0x24a   :  { %2048 = vmatprep.subr.bf16.mxu1 %v5274_v8  ;;  %v6121_v8 = vld [vmem:[#allocation168_spill] sm:$0xff] }
 0x24d   :  { %2049 = vmatpush1.bf16.msra.mxu1 %v5268_v16  ;;  %v1755_v16 = vmax.f32 %v1496_v30, 0.0 }
 0x24e   :  { %2050 = vmatprep.subr.bf16.mxu1 %v5260_v20  ;;  %v1752_v20 = vmax.f32 %v1492_v2, 0.0 }
 0x24f   :  { %v1887_v36 = vpack.c.bf16 %v1759_v4, %v1755_v16  ;;  %v6136_v4 = vld [vmem:[#allocation45_spill] sm:$0xff] }
 0x250   :  { %v1884_v50 = vpack.c.bf16 %v1752_v20, %v1748_v28  ;;  %v6137_v28 = vld [vmem:[#allocation43_spill] sm:$0xff] }
 0x251   :  { %2051 = vmatpush1.bf16.msra.mxu1 %v5258_v13  ;;  %v6122_v13 = vld [vmem:[#allocation167_spill] sm:$0xff]  ;;  %v3614_v20 = vcombine.high %v6137_v28, %v6136_v4 }
 0x252   :  { %2052 = vmatprep.subr.bf16.mxu1 %v5248_v59  ;;  %v1747_v59 = vmax.f32 %v5429_v5, 0.0  ;;  %v1716_v5 = vmax.f32 %v6129_v60, 0.0 }
 0x254   :  { %v1868_v26 = vpack.c.bf16 %v1720_v27, %v1716_v5 }
 0x255   :  { %2053 = vmatpush1.bf16.msra.mxu1 %v5244_v10  ;;  %v1751_v10 = vmax.f32 %v1490_v42, 0.0 }
 0x256   :  { %2054 = vmatprep.subr.bf16.mxu1 %v5231_v51  ;;  %v1740_v51 = vmax.f32 %v5416_v14, 0.0  ;;  %v1735_v14 = vmax.f32 %v5403_v11, 0.0  ;;  %v1871_v11 = vpack.c.bf16 %v1727_v39, %v1723_v9 }
 0x257   :  { %v1883_v3 = vpack.c.bf16 %v1751_v10, %v1747_v59  ;;  %v3613_v10 = vcombine.low %v6137_v28, %v6136_v4 }
 0x258   :  { %v1880_v45 = vpack.c.bf16 %v1744_v61, %v1740_v51  ;;  %v1875_v17 = vpack.c.bf16 %v1735_v14, %v1731_v37 }
 0x259   :  { %2055 = vmatpush1.bf16.msra.mxu1 %v6120_v43 }
 0x25a   :  { %2056 = vmatprep.subr.bf16.mxu1 %v6121_v8 }
 0x25d   :  { %2057 = vmatpush1.bf16.msra.mxu1 %v6122_v13  ;;  %v6139_v13 = vld [vmem:[#allocation107_spill] sm:$0xff] }
 0x25e   :  { %2058 = vmatprep.subr.bf16.mxu1 %v1888_v56  ;;  %v6138_v56 = vld [vmem:[#allocation109_spill] sm:$0xff] }
 0x25f   :  { %v3678_v59 = vcombine.high %v6139_v13, %v6138_v56 }
 0x261   :  { %2059 = vmatpush2.bf16.msra.mxu1 %v1887_v36  ;;  %v3677_v36 = vcombine.low %v6139_v13, %v6138_v56 }
 0x262   :  { %2060 = vmatprep.subr.bf16.mxu1 %v1884_v50 }
 0x265   :  { %2061 = vmatpush2.bf16.msra.mxu1 %v1883_v3 }
 0x266   :  { %2062 = vmatprep.subr.bf16.mxu1 %v1880_v45 }
 0x269   :  { %2063 = vmatpush2.bf16.msra.mxu1 %v1879_v25 }
 0x26a   :  { %2064 = vmatprep.subr.bf16.mxu1 %v1876_v6 }
 0x26d   :  { %2065 = vmatpush2.bf16.msra.mxu1 %v1875_v17 }
 0x26e   :  { %2066 = vmatprep.subr.bf16.mxu1 %v1872_v40 }
 0x271   :  { %2067 = vmatpush2.bf16.msra.mxu1 %v1871_v11 }
 0x272   :  { %2068 = vmatprep.subr.bf16.mxu1 %v1868_v26 }
 0x275   :  { %2069 = vmatpush2.bf16.msra.mxu1 %v6131_v33 }
 0x276   :  { %2070 = vmatprep.subr.bf16.mxu1 %v6132_v53 }
 0x279   :  { %2071 = vmatpush2.bf16.msra.mxu1 %v6133_v54 }
 0x27a   :  { %2072 = vmatprep.subr.bf16.mxu1 %v6134_v23 }
 0x27d   :  { %2073 = vmatpush2.bf16.msra.mxu1 %v6135_v55 }
 0x280   :  { %2075 = vmatmul.mubr.bf16.vlgmr.msra.gmra.mxu1 %v5436_v58  ;;  %v1953_v52 = vpop.f32.mrf.mxu0 }
 0x282   :  { %v1955_v7 = vpop.f32.mrf.mxu0 }
 0x284   :  { %v1957_v29 = vpop.f32.mrf.mxu0 }
 0x286   :  { %v1958_v42 = vpop.f32.mrf.mxu0 }
 0x2c0   :  { %v2035_v15 = vpop.f32.mrf.mxu0 }
 0x2c2   :  { %v2037_v18 = vpop.f32.mrf.mxu0 }
 0x2c4   :  { %v2039_v38 = vpop.f32.mrf.mxu0 }
 0x2c6   :  { %v2040_v41 = vpop.f32.mrf.mxu0 }
 0x300   :  { %v1994_v2 = vpop.f32.mrf.mxu1 }
 0x301   :  { %v5480_v31 = vadd.f32 %v1994_v2, %v1953_v52 }
 0x302   :  { %v1996_v30 = vpop.f32.mrf.mxu1 }
 0x303   :  { %v1997_v24 = vadd.f32 %v1996_v30, %v1955_v7 }
 0x304   :  { %v1998_v47 = vpop.f32.mrf.mxu1 }
 0x306   :  { %v1999_v35 = vpop.f32.mrf.mxu1 }
 0x340   :  { %v2076_v57 = vpop.f32.mrf.mxu1 }
 0x341   :  { %v5482_v63 = vadd.f32 %v2076_v57, %v2035_v15 }
 0x342   :  { %v2078_v43 = vpop.f32.mrf.mxu1 }
 0x343   :  { %v2079_v58 = vadd.f32 %v2078_v43, %v2037_v18 }
 0x344   :  { %v2080_v8 = vpop.f32.mrf.mxu1 }
 0x346   :  { %v2081_v16 = vpop.f32.mrf.mxu1 }
 0x347   :  { %3913 = dma.done.wait [#allocation4], 16384 }
 0x348   :  { %3914 = vsyncadd [#allocation4], 4294950912  ;;  %v6140_v51 = vld [vmem:[#allocation41_spill] sm:$0xff]  ;;  %v6141_v61 = vld [vmem:[#allocation39_spill] sm:$0xff]  ;;  %2881 = vmatprep.subr.bf16.mxu0 %v3614_v20  ;;  %2922 = vmatprep.subr.bf16.mxu1 %v3678_v59  ;;  %v5528_v29 = vpack.c.bf16 %v1997_v24, %v1997_v24  ;;  %v5530_v42 = vpack.c.bf16 %v2079_v58, %v2079_v58 }
 0x349   :  { %v3610_v50 = vcombine.high %v6141_v61, %v6140_v51  ;;  %v6142_v19 = vld [vmem:[#allocation105_spill] sm:$0xff]  ;;  %v6143_v0 = vld [vmem:[#allocation103_spill] sm:$0xff]  ;;  %2882 = vmatpush1.bf16.msra.mxu0 %v3613_v10  ;;  %2923 = vmatpush1.bf16.msra.mxu1 %v3677_v36  ;;  %v3609_v21 = vcombine.low %v6141_v61, %v6140_v51 }
 0x34a   :  { %v3674_v3 = vcombine.high %v6143_v0, %v6142_v19  ;;  %v3673_v44 = vcombine.low %v6143_v0, %v6142_v19  ;;  %v6144_v46 = vld [vmem:[#allocation37_spill] sm:$0xff]  ;;  %v6145_v45 = vld [vmem:[#allocation35_spill] sm:$0xff]  ;;  %2913 = vmatprep.mubr.bf16.mxu0 %v5528_v29  ;;  %2954 = vmatprep.mubr.bf16.mxu1 %v5530_v42 }
 0x34b   :  { %2883 = vmatprep.subr.bf16.mxu0 %v3610_v50  ;;  %v3606_v48 = vcombine.high %v6145_v45, %v6144_v46  ;;  %v6146_v37 = vld [vmem:[#allocation101_spill] sm:$0xff]  ;;  %v6147_v14 = vld [vmem:[#allocation99_spill] sm:$0xff]  ;;  %v3605_v49 = vcombine.low %v6145_v45, %v6144_v46 }
 0x34c   :  { %2924 = vmatprep.subr.bf16.mxu1 %v3674_v3  ;;  %v3670_v25 = vcombine.high %v6147_v14, %v6146_v37  ;;  %v3669_v32 = vcombine.low %v6147_v14, %v6146_v37  ;;  %v6148_v22 = vld [vmem:[#allocation33_spill] sm:$0xff]  ;;  %v6149_v34 = vld [vmem:[#allocation31_spill] sm:$0xff] }
 0x34d   :  { %2884 = vmatpush1.bf16.msra.mxu0 %v3609_v21  ;;  %2925 = vmatpush1.bf16.msra.mxu1 %v3673_v44  ;;  %v3602_v6 = vcombine.high %v6149_v34, %v6148_v22  ;;  %v6150_v1 = vld [vmem:[#allocation97_spill] sm:$0xff]  ;;  %v6151_v9 = vld [vmem:[#allocation95_spill] sm:$0xff]  ;;  %v3601_v39 = vcombine.low %v6149_v34, %v6148_v22 }
 0x34e   :  { %2885 = vmatprep.subr.bf16.mxu0 %v3606_v48  ;;  %2926 = vmatprep.subr.bf16.mxu1 %v3670_v25  ;;  %v3666_v62 = vcombine.high %v6151_v9, %v6150_v1  ;;  %v3665_v17 = vcombine.low %v6151_v9, %v6150_v1  ;;  %v6152_v60 = vld [vmem:[#allocation29_spill] sm:$0xff]  ;;  %v6153_v5 = vld [vmem:[#allocation27_spill] sm:$0xff] }
 0x34f   :  { %v3598_v12 = vcombine.high %v6153_v5, %v6152_v60  ;;  %v6154_v27 = vld [vmem:[#allocation93_spill] sm:$0xff]  ;;  %v6155_v40 = vld [vmem:[#allocation91_spill] sm:$0xff]  ;;  %v3597_v26 = vcombine.low %v6153_v5, %v6152_v60 }
 0x350   :  { %v3662_v11 = vcombine.high %v6155_v40, %v6154_v27  ;;  %v3661_v33 = vcombine.low %v6155_v40, %v6154_v27  ;;  %v6156_v53 = vld [vmem:[#allocation25_spill] sm:$0xff]  ;;  %v6157_v54 = vld [vmem:[#allocation23_spill] sm:$0xff] }
 0x351   :  { %2886 = vmatpush1.bf16.msra.mxu0 %v3605_v49  ;;  %2927 = vmatpush1.bf16.msra.mxu1 %v3669_v32  ;;  %v3594_v23 = vcombine.high %v6157_v54, %v6156_v53  ;;  %v6158_v55 = vld [vmem:[#allocation89_spill] sm:$0xff]  ;;  %v6159_v52 = vld [vmem:[#allocation87_spill] sm:$0xff]  ;;  %v3593_v15 = vcombine.low %v6157_v54, %v6156_v53 }
 0x352   :  { %2887 = vmatprep.subr.bf16.mxu0 %v3602_v6  ;;  %2928 = vmatprep.subr.bf16.mxu1 %v3666_v62  ;;  %v3658_v7 = vcombine.high %v6159_v52, %v6158_v55  ;;  %v3657_v18 = vcombine.low %v6159_v52, %v6158_v55  ;;  %v6160_v38 = vld [vmem:[#allocation21_spill] sm:$0xff]  ;;  %v6161_v41 = vld [vmem:[#allocation19_spill] sm:$0xff] }
 0x353   :  { %v3590_v2 = vcombine.high %v6161_v41, %v6160_v38  ;;  %v6162_v30 = vld [vmem:[#allocation85_spill] sm:$0xff]  ;;  %v6163_v47 = vld [vmem:[#allocation83_spill] sm:$0xff]  ;;  %v3589_v24 = vcombine.low %v6161_v41, %v6160_v38 }
 0x354   :  { %v3654_v35 = vcombine.high %v6163_v47, %v6162_v30  ;;  %v3653_v57 = vcombine.low %v6163_v47, %v6162_v30  ;;  %v6164_v43 = vld [vmem:[#allocation17_spill] sm:$0xff]  ;;  %v6165_v58 = vld [vmem:[#allocation15_spill] sm:$0xff] }
 0x355   :  { %2888 = vmatpush1.bf16.msra.mxu0 %v3601_v39  ;;  %2929 = vmatpush1.bf16.msra.mxu1 %v3665_v17  ;;  %v3586_v8 = vcombine.high %v6165_v58, %v6164_v43  ;;  %v6166_v16 = vld [vmem:[#allocation81_spill] sm:$0xff]  ;;  %v6167_v4 = vld [vmem:[#allocation79_spill] sm:$0xff]  ;;  %v3585_v20 = vcombine.low %v6165_v58, %v6164_v43 }
 0x356   :  { %2889 = vmatprep.subr.bf16.mxu0 %v3598_v12  ;;  %2930 = vmatprep.subr.bf16.mxu1 %v3662_v11  ;;  %v3650_v28 = vcombine.high %v6167_v4, %v6166_v16  ;;  %v3649_v56 = vcombine.low %v6167_v4, %v6166_v16  ;;  %v6168_v13 = vld [vmem:[#allocation77_spill] sm:$0xff]  ;;  %v6169_v59 = vld [vmem:[#allocation75_spill] sm:$0xff] }
 0x357   :  { %v3646_v10 = vcombine.high %v6169_v59, %v6168_v13  ;;  %v6170_v36 = vld [vmem:[#allocation141_spill] sm:$0xff]  ;;  %v6171_v51 = vld [vmem:[#allocation139_spill] sm:$0xff]  ;;  %v3645_v50 = vcombine.low %v6169_v59, %v6168_v13 }
 0x358   :  { %v3710_v61 = vcombine.high %v6171_v51, %v6170_v36  ;;  %v3709_v19 = vcombine.low %v6171_v51, %v6170_v36  ;;  %v6172_v0 = vld [vmem:[#allocation73_spill] sm:$0xff]  ;;  %v6173_v3 = vld [vmem:[#allocation71_spill] sm:$0xff]  ;;  %v6200_v51 = vld [vmem:[#allocation46_spill] sm:$0xff] }
 0x359   :  { %2890 = vmatpush1.bf16.msra.mxu0 %v3597_v26  ;;  %2931 = vmatpush1.bf16.msra.mxu1 %v3661_v33  ;;  %v3642_v21 = vcombine.high %v6173_v3, %v6172_v0  ;;  %v6174_v44 = vld [vmem:[#allocation137_spill] sm:$0xff]  ;;  %v6175_v46 = vld [vmem:[#allocation135_spill] sm:$0xff]  ;;  %v3641_v48 = vcombine.low %v6173_v3, %v6172_v0  ;;  %v6203_v0 = vld [vmem:[#allocation108_spill] sm:$0xff] }
 0x35a   :  { %2891 = vmatprep.subr.bf16.mxu0 %v3594_v23  ;;  %2932 = vmatprep.subr.bf16.mxu1 %v3658_v7  ;;  %v3706_v45 = vcombine.high %v6175_v46, %v6174_v44  ;;  %v3705_v37 = vcombine.low %v6175_v46, %v6174_v44  ;;  %v6176_v14 = vld [vmem:[#allocation69_spill] sm:$0xff]  ;;  %v6177_v25 = vld [vmem:[#allocation67_spill] sm:$0xff]  ;;  %v5628_v44 = vpack.c.bf16 %v5482_v63, %v5482_v63 }
 0x35b   :  { %v3638_v49 = vcombine.high %v6177_v25, %v6176_v14  ;;  %v6178_v32 = vld [vmem:[#allocation133_spill] sm:$0xff]  ;;  %v6179_v22 = vld [vmem:[#allocation131_spill] sm:$0xff]  ;;  %v3637_v6 = vcombine.low %v6177_v25, %v6176_v14  ;;  %v6206_v25 = vld [vmem:[#allocation106_spill] sm:$0xff] }
 0x35c   :  { %v3702_v34 = vcombine.high %v6179_v22, %v6178_v32  ;;  %v3701_v1 = vcombine.low %v6179_v22, %v6178_v32  ;;  %v6180_v9 = vld [vmem:[#allocation65_spill] sm:$0xff]  ;;  %v6181_v62 = vld [vmem:[#allocation63_spill] sm:$0xff]  ;;  %v6208_v22 = vld [vmem:[#allocation38_spill] sm:$0xff] }
 0x35d   :  { %2892 = vmatpush1.bf16.msra.mxu0 %v3593_v15  ;;  %2933 = vmatpush1.bf16.msra.mxu1 %v3657_v18  ;;  %v3634_v39 = vcombine.high %v6181_v62, %v6180_v9  ;;  %v6182_v17 = vld [vmem:[#allocation129_spill] sm:$0xff]  ;;  %v6183_v60 = vld [vmem:[#allocation127_spill] sm:$0xff]  ;;  %v3633_v12 = vcombine.low %v6181_v62, %v6180_v9  ;;  %v6211_v9 = vld [vmem:[#allocation100_spill] sm:$0xff] }
 0x35e   :  { %2893 = vmatprep.subr.bf16.mxu0 %v3590_v2  ;;  %2934 = vmatprep.subr.bf16.mxu1 %v3654_v35  ;;  %v3698_v5 = vcombine.high %v6183_v60, %v6182_v17  ;;  %v3697_v27 = vcombine.low %v6183_v60, %v6182_v17  ;;  %v6184_v40 = vld [vmem:[#allocation61_spill] sm:$0xff]  ;;  %v6185_v11 = vld [vmem:[#allocation59_spill] sm:$0xff]  ;;  %v6212_v60 = vld [vmem:[#allocation34_spill] sm:$0xff] }
 0x35f   :  { %v3630_v26 = vcombine.high %v6185_v11, %v6184_v40  ;;  %v6186_v33 = vld [vmem:[#allocation125_spill] sm:$0xff]  ;;  %v6187_v53 = vld [vmem:[#allocation123_spill] sm:$0xff]  ;;  %v3629_v23 = vcombine.low %v6185_v11, %v6184_v40  ;;  %v6215_v40 = vld [vmem:[#allocation96_spill] sm:$0xff] }
 0x360   :  { %v3694_v54 = vcombine.high %v6187_v53, %v6186_v33  ;;  %v3693_v55 = vcombine.low %v6187_v53, %v6186_v33  ;;  %v6188_v52 = vld [vmem:[#allocation57_spill] sm:$0xff]  ;;  %v6189_v7 = vld [vmem:[#allocation55_spill] sm:$0xff]  ;;  %v6217_v33 = vld [vmem:[#allocation28_spill] sm:$0xff] }
 0x361   :  { %2894 = vmatpush1.bf16.msra.mxu0 %v3589_v24  ;;  %2935 = vmatpush1.bf16.msra.mxu1 %v3653_v57  ;;  %v3626_v15 = vcombine.high %v6189_v7, %v6188_v52  ;;  %v6190_v18 = vld [vmem:[#allocation121_spill] sm:$0xff]  ;;  %v6191_v38 = vld [vmem:[#allocation119_spill] sm:$0xff]  ;;  %v3625_v2 = vcombine.low %v6189_v7, %v6188_v52 }
 0x362   :  { %2895 = vmatprep.subr.bf16.mxu0 %v3586_v8  ;;  %2936 = vmatprep.subr.bf16.mxu1 %v3650_v28  ;;  %v3690_v41 = vcombine.high %v6191_v38, %v6190_v18  ;;  %v3689_v30 = vcombine.low %v6191_v38, %v6190_v18  ;;  %v6192_v47 = vld [vmem:[#allocation53_spill] sm:$0xff]  ;;  %v6193_v35 = vld [vmem:[#allocation51_spill] sm:$0xff]  ;;  %v6221_v18 = vld [vmem:[#allocation24_spill] sm:$0xff] }
 0x363   :  { %v3622_v24 = vcombine.high %v6193_v35, %v6192_v47  ;;  %v6194_v57 = vld [vmem:[#allocation117_spill] sm:$0xff]  ;;  %v6195_v43 = vld [vmem:[#allocation115_spill] sm:$0xff]  ;;  %v3621_v8 = vcombine.low %v6193_v35, %v6192_v47 }
 0x364   :  { %v3686_v58 = vcombine.high %v6195_v43, %v6194_v57  ;;  %v3685_v16 = vcombine.low %v6195_v43, %v6194_v57  ;;  %v6196_v4 = vld [vmem:[#allocation49_spill] sm:$0xff]  ;;  %v6197_v28 = vld [vmem:[#allocation47_spill] sm:$0xff]  ;;  %v6225_v57 = vld [vmem:[#allocation20_spill] sm:$0xff] }
 0x365   :  { %2896 = vmatpush1.bf16.msra.mxu0 %v3585_v20  ;;  %2937 = vmatpush1.bf16.msra.mxu1 %v3649_v56  ;;  %v3618_v20 = vcombine.high %v6197_v28, %v6196_v4  ;;  %v6198_v56 = vld [vmem:[#allocation113_spill] sm:$0xff]  ;;  %v6199_v13 = vld [vmem:[#allocation111_spill] sm:$0xff] }
 0x366   :  { %2897 = vmatprep.subr.bf16.mxu0 %v3646_v10  ;;  %2938 = vmatprep.subr.bf16.mxu1 %v3710_v61  ;;  %v3682_v59 = vcombine.high %v6199_v13, %v6198_v56  ;;  %v3617_v10 = vcombine.low %v6197_v28, %v6196_v4  ;;  %v3681_v36 = vcombine.low %v6199_v13, %v6198_v56  ;;  %v6201_v61 = vld [vmem:[#allocation44_spill] sm:$0xff] }
 0x367   :  { %v3615_v46 = vcombine.low %v6201_v61, %v6200_v51  ;;  %v6229_v56 = vld [vmem:[#allocation16_spill] sm:$0xff] }
 0x369   :  { %2898 = vmatpush2.bf16.msra.mxu0 %v3645_v50  ;;  %2939 = vmatpush2.bf16.msra.mxu1 %v3709_v19  ;;  %v3616_v50 = vcombine.high %v6201_v61, %v6200_v51  ;;  %v6202_v19 = vld [vmem:[#allocation110_spill] sm:$0xff] }
 0x36a   :  { %2899 = vmatprep.subr.bf16.mxu0 %v3642_v21  ;;  %2940 = vmatprep.subr.bf16.mxu1 %v3706_v45  ;;  %v3680_v3 = vcombine.high %v6203_v0, %v6202_v19  ;;  %v5624_v21 = vpack.c.bf16 %v5480_v31, %v5480_v31  ;;  %v3679_v45 = vcombine.low %v6203_v0, %v6202_v19  ;;  %v6207_v31 = vld [vmem:[#allocation104_spill] sm:$0xff] }
 0x36b   :  { %v3675_v32 = vcombine.low %v6207_v31, %v6206_v25  ;;  %v6233_v19 = vld [vmem:[#allocation76_spill] sm:$0xff] }
 0x36d   :  { %2900 = vmatpush2.bf16.msra.mxu0 %v3641_v48  ;;  %2941 = vmatpush2.bf16.msra.mxu1 %v3705_v37  ;;  %v6204_v48 = vld [vmem:[#allocation42_spill] sm:$0xff]  ;;  %v6205_v37 = vld [vmem:[#allocation40_spill] sm:$0xff] }
 0x36e   :  { %2901 = vmatprep.subr.bf16.mxu0 %v3638_v49  ;;  %2942 = vmatprep.subr.bf16.mxu1 %v3702_v34  ;;  %v3612_v14 = vcombine.high %v6205_v37, %v6204_v48  ;;  %v3676_v49 = vcombine.high %v6207_v31, %v6206_v25  ;;  %v3611_v63 = vcombine.low %v6205_v37, %v6204_v48  ;;  %v6209_v34 = vld [vmem:[#allocation36_spill] sm:$0xff] }
 0x36f   :  { %v6237_v25 = vld [vmem:[#allocation72_spill] sm:$0xff] }
 0x371   :  { %2902 = vmatpush2.bf16.msra.mxu0 %v3637_v6  ;;  %2943 = vmatpush2.bf16.msra.mxu1 %v3701_v1  ;;  %v3608_v6 = vcombine.high %v6209_v34, %v6208_v22  ;;  %v6210_v1 = vld [vmem:[#allocation102_spill] sm:$0xff] }
 0x372   :  { %2903 = vmatprep.subr.bf16.mxu0 %v3634_v39  ;;  %2944 = vmatprep.subr.bf16.mxu1 %v3698_v5  ;;  %v3672_v62 = vcombine.high %v6211_v9, %v6210_v1  ;;  %v3607_v39 = vcombine.low %v6209_v34, %v6208_v22  ;;  %v3671_v17 = vcombine.low %v6211_v9, %v6210_v1  ;;  %v6213_v5 = vld [vmem:[#allocation32_spill] sm:$0xff] }
 0x373   :  { %v6241_v1 = vld [vmem:[#allocation68_spill] sm:$0xff] }
 0x375   :  { %2904 = vmatpush2.bf16.msra.mxu0 %v3633_v12  ;;  %2945 = vmatpush2.bf16.msra.mxu1 %v3697_v27  ;;  %v3604_v12 = vcombine.high %v6213_v5, %v6212_v60  ;;  %v6214_v27 = vld [vmem:[#allocation98_spill] sm:$0xff] }
 0x376   :  { %2905 = vmatprep.subr.bf16.mxu0 %v3630_v26  ;;  %2946 = vmatprep.subr.bf16.mxu1 %v3694_v54  ;;  %v3668_v11 = vcombine.high %v6215_v40, %v6214_v27  ;;  %v6216_v26 = vld [vmem:[#allocation30_spill] sm:$0xff] }
 0x377   :  { %v3600_v53 = vcombine.high %v6217_v33, %v6216_v26  ;;  %v6218_v54 = vld [vmem:[#allocation94_spill] sm:$0xff]  ;;  %v3599_v52 = vcombine.low %v6217_v33, %v6216_v26 }
 0x379   :  { %2906 = vmatpush2.bf16.msra.mxu0 %v3629_v23  ;;  %2947 = vmatpush2.bf16.msra.mxu1 %v3693_v55  ;;  %v6219_v23 = vld [vmem:[#allocation92_spill] sm:$0xff] }
 0x37a   :  { %2907 = vmatprep.subr.bf16.mxu0 %v3626_v15  ;;  %2948 = vmatprep.subr.bf16.mxu1 %v3690_v41  ;;  %v3664_v55 = vcombine.high %v6219_v23, %v6218_v54  ;;  %v3663_v7 = vcombine.low %v6219_v23, %v6218_v54  ;;  %v6220_v15 = vld [vmem:[#allocation26_spill] sm:$0xff]  ;;  %v6249_v54 = vld [vmem:[#allocation60_spill] sm:$0xff] }
 0x37b   :  { %v3596_v38 = vcombine.high %v6221_v18, %v6220_v15  ;;  %v6222_v41 = vld [vmem:[#allocation90_spill] sm:$0xff]  ;;  %v3595_v47 = vcombine.low %v6221_v18, %v6220_v15 }
 0x37d   :  { %2908 = vmatpush2.bf16.msra.mxu0 %v3625_v2  ;;  %2949 = vmatpush2.bf16.msra.mxu1 %v3689_v30  ;;  %v6223_v2 = vld [vmem:[#allocation88_spill] sm:$0xff] }
 0x37e   :  { %2909 = vmatprep.subr.bf16.mxu0 %v3622_v24  ;;  %2950 = vmatprep.subr.bf16.mxu1 %v3686_v58  ;;  %v3660_v30 = vcombine.high %v6223_v2, %v6222_v41  ;;  %v3659_v35 = vcombine.low %v6223_v2, %v6222_v41  ;;  %v6224_v24 = vld [vmem:[#allocation22_spill] sm:$0xff]  ;;  %v6253_v41 = vld [vmem:[#allocation56_spill] sm:$0xff] }
 0x37f   :  { %v3592_v43 = vcombine.high %v6225_v57, %v6224_v24  ;;  %v6226_v58 = vld [vmem:[#allocation86_spill] sm:$0xff]  ;;  %v3591_v4 = vcombine.low %v6225_v57, %v6224_v24 }
 0x381   :  { %2910 = vmatpush2.bf16.msra.mxu0 %v3621_v8  ;;  %2951 = vmatpush2.bf16.msra.mxu1 %v3685_v16  ;;  %v6227_v8 = vld [vmem:[#allocation84_spill] sm:$0xff] }
 0x382   :  { %2911 = vmatprep.subr.bf16.mxu0 %v3618_v20  ;;  %2952 = vmatprep.subr.bf16.mxu1 %v3682_v59  ;;  %v3656_v16 = vcombine.high %v6227_v8, %v6226_v58  ;;  %v3655_v28 = vcombine.low %v6227_v8, %v6226_v58  ;;  %v6228_v20 = vld [vmem:[#allocation18_spill] sm:$0xff]  ;;  %v6257_v58 = vld [vmem:[#allocation52_spill] sm:$0xff] }
 0x383   :  { %v3588_v13 = vcombine.high %v6229_v56, %v6228_v20  ;;  %v6230_v59 = vld [vmem:[#allocation82_spill] sm:$0xff]  ;;  %v3587_v51 = vcombine.low %v6229_v56, %v6228_v20 }
 0x385   :  { %2912 = vmatpush2.bf16.msra.mxu0 %v3617_v10  ;;  %2953 = vmatpush2.bf16.msra.mxu1 %v3681_v36  ;;  %v6231_v10 = vld [vmem:[#allocation80_spill] sm:$0xff] }
 0x386   :  { %2963 = vmatprep.subr.bf16.mxu0 %v3616_v50  ;;  %3004 = vmatprep.subr.bf16.mxu1 %v3680_v3  ;;  %v3652_v36 = vcombine.high %v6231_v10, %v6230_v59  ;;  %v3651_v61 = vcombine.low %v6231_v10, %v6230_v59  ;;  %v6232_v50 = vld [vmem:[#allocation78_spill] sm:$0xff]  ;;  %v6261_v59 = vld [vmem:[#allocation48_spill] sm:$0xff] }
 0x387   :  { %v3648_v0 = vcombine.high %v6233_v19, %v6232_v50  ;;  %v6234_v3 = vld [vmem:[#allocation142_spill] sm:$0xff]  ;;  %v3647_v48 = vcombine.low %v6233_v19, %v6232_v50 }
 0x388   :  { %2914 = vmatmul.mubr.bf16.vlgmr.msra.gmra.mxu0 %v5624_v21  ;;  %2955 = vmatmul.mubr.bf16.vlgmr.msra.gmra.mxu1 %v5628_v44 }
 0x389   :  { %2964 = vmatpush1.bf16.msra.mxu0 %v3615_v46  ;;  %3005 = vmatpush1.bf16.msra.mxu1 %v3679_v45  ;;  %v6235_v46 = vld [vmem:[#allocation140_spill] sm:$0xff] }
 0x38a   :  { %2965 = vmatprep.subr.bf16.mxu0 %v3612_v14  ;;  %3006 = vmatprep.subr.bf16.mxu1 %v3676_v49  ;;  %v3712_v45 = vcombine.high %v6235_v46, %v6234_v3  ;;  %v3711_v37 = vcombine.low %v6235_v46, %v6234_v3  ;;  %v6236_v14 = vld [vmem:[#allocation74_spill] sm:$0xff] }
 0x38b   :  { %2995 = vmatprep.mubr.bf16.mxu0 %v5528_v29  ;;  %3036 = vmatprep.mubr.bf16.mxu1 %v5530_v42  ;;  %v3603_v29 = vcombine.low %v6213_v5, %v6212_v60  ;;  %v3667_v42 = vcombine.low %v6215_v40, %v6214_v27  ;;  %v3644_v31 = vcombine.high %v6237_v25, %v6236_v14  ;;  %v6238_v49 = vld [vmem:[#allocation138_spill] sm:$0xff]  ;;  %v6245_v27 = vld [vmem:[#allocation64_spill] sm:$0xff] }
 0x38c   :  { %v3643_v22 = vcombine.low %v6237_v25, %v6236_v14  ;;  %v2219_v46 = vld [vmem:[%s5791_s4] sm:$0xf] }
 0x38d   :  { %2966 = vmatpush1.bf16.msra.mxu0 %v3611_v63  ;;  %3007 = vmatpush1.bf16.msra.mxu1 %v3675_v32  ;;  %v6239_v63 = vld [vmem:[#allocation136_spill] sm:$0xff] }
 0x38e   :  { %2967 = vmatprep.subr.bf16.mxu0 %v3608_v6  ;;  %3008 = vmatprep.subr.bf16.mxu1 %v3672_v62  ;;  %v3708_v32 = vcombine.high %v6239_v63, %v6238_v49  ;;  %v3707_v34 = vcombine.low %v6239_v63, %v6238_v49  ;;  %v6240_v6 = vld [vmem:[#allocation70_spill] sm:$0xff] }
 0x38f   :  { %v3640_v9 = vcombine.high %v6241_v1, %v6240_v6  ;;  %v6242_v62 = vld [vmem:[#allocation134_spill] sm:$0xff]  ;;  %v3639_v60 = vcombine.low %v6241_v1, %v6240_v6 }
 0x391   :  { %2968 = vmatpush1.bf16.msra.mxu0 %v3607_v39  ;;  %3009 = vmatpush1.bf16.msra.mxu1 %v3671_v17  ;;  %v6243_v39 = vld [vmem:[#allocation132_spill] sm:$0xff] }
 0x392   :  { %2969 = vmatprep.subr.bf16.mxu0 %v3604_v12  ;;  %3010 = vmatprep.subr.bf16.mxu1 %v3668_v11  ;;  %v3704_v17 = vcombine.high %v6243_v39, %v6242_v62  ;;  %v3703_v5 = vcombine.low %v6243_v39, %v6242_v62  ;;  %v6244_v12 = vld [vmem:[#allocation66_spill] sm:$0xff] }
 0x393   :  { %v3636_v40 = vcombine.high %v6245_v27, %v6244_v12  ;;  %v6246_v11 = vld [vmem:[#allocation130_spill] sm:$0xff]  ;;  %v3635_v26 = vcombine.low %v6245_v27, %v6244_v12  ;;  %v3923_v12 = vmov 1983009808  }
 0x394   :  { %v3056_v27 = vunpack.c.l.s4 %v3923_v12 }
 0x395   :  { %2970 = vmatpush1.bf16.msra.mxu0 %v3603_v29  ;;  %3011 = vmatpush1.bf16.msra.mxu1 %v3667_v42  ;;  %v6247_v29 = vld [vmem:[#allocation128_spill] sm:$0xff] }
 0x396   :  { %2971 = vmatprep.subr.bf16.mxu0 %v3600_v53  ;;  %3012 = vmatprep.subr.bf16.mxu1 %v3664_v55  ;;  %v3700_v42 = vcombine.high %v6247_v29, %v6246_v11  ;;  %v3699_v33 = vcombine.low %v6247_v29, %v6246_v11  ;;  %v6248_v53 = vld [vmem:[#allocation62_spill] sm:$0xff] }
 0x397   :  { %v3632_v23 = vcombine.high %v6249_v54, %v6248_v53  ;;  %v6250_v55 = vld [vmem:[#allocation126_spill] sm:$0xff]  ;;  %v3631_v15 = vcombine.low %v6249_v54, %v6248_v53  ;;  %v3057_v53 = vunpack.c.0.s8 %v3056_v27 }
 0x399   :  { %2972 = vmatpush1.bf16.msra.mxu0 %v3599_v52  ;;  %3013 = vmatpush1.bf16.msra.mxu1 %v3663_v7  ;;  %v6251_v52 = vld [vmem:[#allocation124_spill] sm:$0xff] }
 0x39a   :  { %2973 = vmatprep.subr.bf16.mxu0 %v3596_v38  ;;  %3014 = vmatprep.subr.bf16.mxu1 %v3660_v30  ;;  %v3696_v7 = vcombine.high %v6251_v52, %v6250_v55  ;;  %v3695_v18 = vcombine.low %v6251_v52, %v6250_v55  ;;  %v6252_v38 = vld [vmem:[#allocation58_spill] sm:$0xff] }
 0x39b   :  { %v3628_v2 = vcombine.high %v6253_v41, %v6252_v38  ;;  %v6254_v30 = vld [vmem:[#allocation122_spill] sm:$0xff]  ;;  %v3627_v24 = vcombine.low %v6253_v41, %v6252_v38 }
 0x39d   :  { %2974 = vmatpush1.bf16.msra.mxu0 %v3595_v47  ;;  %3015 = vmatpush1.bf16.msra.mxu1 %v3659_v35  ;;  %v6255_v47 = vld [vmem:[#allocation120_spill] sm:$0xff] }
 0x39e   :  { %2975 = vmatprep.subr.bf16.mxu0 %v3592_v43  ;;  %3016 = vmatprep.subr.bf16.mxu1 %v3656_v16  ;;  %v3692_v35 = vcombine.high %v6255_v47, %v6254_v30  ;;  %v3691_v57 = vcombine.low %v6255_v47, %v6254_v30  ;;  %v6256_v43 = vld [vmem:[#allocation54_spill] sm:$0xff] }
 0x39f   :  { %v3624_v8 = vcombine.high %v6257_v58, %v6256_v43  ;;  %v6258_v16 = vld [vmem:[#allocation118_spill] sm:$0xff]  ;;  %v3623_v20 = vcombine.low %v6257_v58, %v6256_v43 }
 0x3a1   :  { %2976 = vmatpush1.bf16.msra.mxu0 %v3591_v4  ;;  %3017 = vmatpush1.bf16.msra.mxu1 %v3655_v28  ;;  %v6259_v4 = vld [vmem:[#allocation116_spill] sm:$0xff] }
 0x3a2   :  { %2977 = vmatprep.subr.bf16.mxu0 %v3588_v13  ;;  %3018 = vmatprep.subr.bf16.mxu1 %v3652_v36  ;;  %v3688_v28 = vcombine.high %v6259_v4, %v6258_v16  ;;  %v3687_v56 = vcombine.low %v6259_v4, %v6258_v16  ;;  %v6260_v13 = vld [vmem:[#allocation50_spill] sm:$0xff] }
 0x3a3   :  { %v3620_v10 = vcombine.high %v6261_v59, %v6260_v13  ;;  %v6262_v36 = vld [vmem:[#allocation114_spill] sm:$0xff]  ;;  %v3619_v50 = vcombine.low %v6261_v59, %v6260_v13 }
 0x3a5   :  { %2978 = vmatpush1.bf16.msra.mxu0 %v3587_v51  ;;  %3019 = vmatpush1.bf16.msra.mxu1 %v3651_v61  ;;  %v6263_v51 = vld [vmem:[#allocation112_spill] sm:$0xff] }
 0x3a6   :  { %2979 = vmatprep.subr.bf16.mxu0 %v3648_v0  ;;  %3020 = vmatprep.subr.bf16.mxu1 %v3712_v45  ;;  %v3684_v61 = vcombine.high %v6263_v51, %v6262_v36  ;;  %v3683_v19 = vcombine.low %v6263_v51, %v6262_v36  ;;  %v6264_v0 = vld [vmem:[#allocation145_spill] sm:$0xff] }
 0x3a7   :  { %v2223_v3 = vsub.s32 0, %v6264_v0  ;;  %v2227_v45 = vsub.s32 1, %v6264_v0  ;;  %v3060_v38 = vsub.s32 %v3057_v53, %v6264_v0 }
 0x3a9   :  { %2980 = vmatpush2.bf16.msra.mxu0 %v3647_v48  ;;  %3021 = vmatpush2.bf16.msra.mxu1 %v3711_v37  ;;  %v2224_v48 = vrot.slane %v2219_v46, %v2223_v3  ;;  %v2228_v37 = vrot.slane %v2219_v46, %v2227_v45 }
 0x3aa   :  { %2981 = vmatprep.subr.bf16.mxu0 %v3644_v31  ;;  %3022 = vmatprep.subr.bf16.mxu1 %v3708_v32 }
 0x3ad   :  { %2982 = vmatpush2.bf16.msra.mxu0 %v3643_v22  ;;  %3023 = vmatpush2.bf16.msra.mxu1 %v3707_v34 }
 0x3ae   :  { %2983 = vmatprep.subr.bf16.mxu0 %v3640_v9  ;;  %3024 = vmatprep.subr.bf16.mxu1 %v3704_v17  ;;  %v2231_v17 = vsub.s32 2, %v6264_v0 }
 0x3b1   :  { %2984 = vmatpush2.bf16.msra.mxu0 %v3639_v60  ;;  %3025 = vmatpush2.bf16.msra.mxu1 %v3703_v5  ;;  %v2235_v60 = vsub.s32 3, %v6264_v0  ;;  %v2232_v5 = vrot.slane %v2219_v46, %v2231_v17 }
 0x3b2   :  { %2985 = vmatprep.subr.bf16.mxu0 %v3636_v40  ;;  %3026 = vmatprep.subr.bf16.mxu1 %v3700_v42 }
 0x3b3   :  { %v2236_v40 = vrot.slane %v2219_v46, %v2235_v60 }
 0x3b5   :  { %2986 = vmatpush2.bf16.msra.mxu0 %v3635_v26  ;;  %3027 = vmatpush2.bf16.msra.mxu1 %v3699_v33 }
 0x3b6   :  { %2987 = vmatprep.subr.bf16.mxu0 %v3632_v23  ;;  %3028 = vmatprep.subr.bf16.mxu1 %v3696_v7 }
 0x3b9   :  { %2988 = vmatpush2.bf16.msra.mxu0 %v3631_v15  ;;  %3029 = vmatpush2.bf16.msra.mxu1 %v3695_v18 }
 0x3ba   :  { %2989 = vmatprep.subr.bf16.mxu0 %v3628_v2  ;;  %3030 = vmatprep.subr.bf16.mxu1 %v3692_v35 }
 0x3bd   :  { %2990 = vmatpush2.bf16.msra.mxu0 %v3627_v24  ;;  %3031 = vmatpush2.bf16.msra.mxu1 %v3691_v57 }
 0x3be   :  { %2991 = vmatprep.subr.bf16.mxu0 %v3624_v8  ;;  %3032 = vmatprep.subr.bf16.mxu1 %v3688_v28 }
 0x3c1   :  { %2992 = vmatpush2.bf16.msra.mxu0 %v3623_v20  ;;  %3033 = vmatpush2.bf16.msra.mxu1 %v3687_v56 }
 0x3c2   :  { %2993 = vmatprep.subr.bf16.mxu0 %v3620_v10  ;;  %3034 = vmatprep.subr.bf16.mxu1 %v3684_v61 }
 0x3c5   :  { %2994 = vmatpush2.bf16.msra.mxu0 %v3619_v50  ;;  %3035 = vmatpush2.bf16.msra.mxu1 %v3683_v19 }
 0x3c8   :  { %2996 = vmatmul.mubr.bf16.vlgmr.msra.gmra.mxu0 %v5624_v21  ;;  %3037 = vmatmul.mubr.bf16.vlgmr.msra.gmra.mxu1 %v5628_v44 }
 0x448   :  { %v2915_v14 = vpop.f32.mrf.mxu0  ;;  %v2956_v25 = vpop.f32.mrf.mxu1 }
 0x449   :  { %v2916_v31 = vadd.f32 %v2915_v14, %v2224_v48 }
 0x44a   :  { %v2917_v49 = vpop.f32.mrf.mxu0  ;;  %v2958_v63 = vpop.f32.mrf.mxu1 }
 0x44b   :  { %v2957_v32 = vadd.f32 %v2956_v25, %v2916_v31  ;;  %v2918_v22 = vadd.f32 %v2917_v49, %v2228_v37 }
 0x44c   :  { %v2919_v21 = vpop.f32.mrf.mxu0  ;;  %v2960_v34 = vpop.f32.mrf.mxu1 }
 0x44d   :  { %v5765_v44 = vmax.f32 %v2957_v32, 0.0  ;;  %v2959_v6 = vadd.f32 %v2958_v63, %v2918_v22 }
 0x44e   :  { %v2920_v1 = vpop.f32.mrf.mxu0  ;;  %v2961_v9 = vpop.f32.mrf.mxu1 }
 0x44f   :  { %v3046_v62 = vmax.f32 %v2959_v6, 0.0 }
 0x451   :  { %v3053_v39 = vcombine.low %v5765_v44, %v3046_v62 }
 0x453   :  { %v3061_v47 = vrot.slane %v3053_v39, %v3060_v38 }
 0x488   :  { %v2997_v11 = vpop.f32.mrf.mxu0  ;;  %v3038_v29 = vpop.f32.mrf.mxu1 }
 0x489   :  { %v2998_v42 = vadd.f32 %v2997_v11, %v2232_v5 }
 0x48a   :  { %v2999_v26 = vpop.f32.mrf.mxu0  ;;  %v3040_v33 = vpop.f32.mrf.mxu1 }
 0x48b   :  { %v3039_v54 = vadd.f32 %v3038_v29, %v2998_v42  ;;  %v3000_v23 = vadd.f32 %v2999_v26, %v2236_v40 }
 0x48c   :  { %v3001_v55 = vpop.f32.mrf.mxu0  ;;  %v3042_v52 = vpop.f32.mrf.mxu1 }
 0x48d   :  { %v3041_v7 = vadd.f32 %v3040_v33, %v3000_v23  ;;  %v5771_v41 = vmax.f32 %v3039_v54, 0.0 }
 0x48e   :  { %v3002_v15 = vpop.f32.mrf.mxu0  ;;  %v3043_v18 = vpop.f32.mrf.mxu1 }
 0x48f   :  { %v3048_v2 = vmax.f32 %v3041_v7, 0.0 }
 0x491   :  { %v3054_v30 = vcombine.low %v5771_v41, %v3048_v2 }
 0x493   :  { %v3068_v35 = vrot.slane %v3054_v30, %v3060_v38 }
 0x495   :  { %v3069_v24 = vcombine.low %v3061_v47, %v3068_v35 }
 0x497   :  { %3071 = vst [vmem:[#allocation7] sm:$0xff] %v3069_v24 }
 0x498   :  { %3915 = dma.done.wait [#allocation4 + $0x1], 4096 }
 0x499   :  { %3916 = vsyncadd [#allocation4 + $0x1], 4294963200  ;;  %v3076_v57 = vpack.c.bf16 %v3046_v62, %v3046_v62  ;;  %v3078_v43 = vpack.c.bf16 %v3048_v2, %v3048_v2  ;;  %v3841_v58 = vld [vmem:[#allocation3 + $0x78] sm:$0xff]   ;;  %v3845_v28 = vld [vmem:[#allocation3 + $0x70] sm:$0xff]   ;;  %v3075_v9 = vpack.c.bf16 %v5765_v44, %v5765_v44  ;;  %v3077_v62 = vpack.c.bf16 %v5771_v41, %v5771_v41  ;;  %s3924_s4 = smov [#allocation7]  }
 0x49a   :  { %v3842_v8 = vld [vmem:[#allocation3 + $0xf8] sm:$0xff]   ;;  %3748 = vmatprep.subr.bf16.mxu0 %v3841_v58  ;;  %v3846_v20 = vld [vmem:[#allocation3 + $0xf0] sm:$0xff]   ;;  %v3849_v59 = vld [vmem:[#allocation3 + $0x68] sm:$0xff]   ;;  %s3439_s20 = sshll.u32 %s3924_s4, 4  ;;  %s3440_s20 = int_to_ptr.vmem [resolvable:$true] %s3439_s20 }
 0x49b   :  { %3374 = vmatprep.mubr.bf16.mxu0 %v3076_v57  ;;  %3414 = vmatprep.mubr.bf16.mxu1 %v3078_v43  ;;  %v3843_v16 = vld [vmem:[#allocation3 + $0x38] sm:$0xff]   ;;  %v3847_v56 = vld [vmem:[#allocation3 + $0x30] sm:$0xff]   ;;  %v3850_v10 = vld [vmem:[#allocation3 + $0xe8] sm:$0xff]   ;;  %s3873_s21 = scalar_lea.vmem %s3440_s20, 128  ;;  %p3878_p1 = scmp.lt.s32.totalorder %s3440_s20, %s3440_s20 }
 0x49c   :  { %3770 = vmatprep.subr.bf16.mxu1 %v3842_v8  ;;  %v3844_v4 = vld [vmem:[#allocation3 + $0xb8] sm:$0xff]   ;;  %3749 = vmatpush3.bf16.msra.mxu0 %v3843_v16  ;;  %v3848_v13 = vld [vmem:[#allocation3 + $0xb0] sm:$0xff]   ;;  %v3851_v36 = vld [vmem:[#allocation3 + $0x28] sm:$0xff]   ;;  %p3874_p0 = scmp.ne.s32.totalorder %s3440_s20, %s3873_s21  ;;  %p3879_p2 = scmp.lt.s32.totalorder %s3873_s21, %s3873_s21 }
 0x49d   :  { %3771 = vmatpush3.bf16.msra.mxu1 %v3844_v4  ;;  %3750 = vmatprep.subr.bf16.mxu0 %v3845_v28  ;;  %v3852_v51 = vld [vmem:[#allocation3 + $0xa8] sm:$0xff]   ;;  %v3853_v61 = vld [vmem:[#allocation3 + $0x60] sm:$0xff]   ;;  %v3857_v3 = vld [vmem:[#allocation3 + $0x58] sm:$0xff]  }
 0x49e   :  { %3772 = vmatprep.subr.bf16.mxu1 %v3846_v20  ;;  %v3854_v50 = vld [vmem:[#allocation3 + $0xe0] sm:$0xff]   ;;  %v3858_v46 = vld [vmem:[#allocation3 + $0xd8] sm:$0xff]   ;;  %v3861_v37 = vld [vmem:[#allocation3 + $0x50] sm:$0xff]   ;;  %p3880_p3 = por %p3879_p2, %p3878_p1 }
 0x49f   :  { %v3855_v19 = vld [vmem:[#allocation3 + $0x20] sm:$0xff]   ;;  %v3859_v45 = vld [vmem:[#allocation3 + $0x18] sm:$0xff]   ;;  %v3862_v14 = vld [vmem:[#allocation3 + $0xd0] sm:$0xff]  }
 0x4a0   :  { %3751 = vmatpush3.bf16.msra.mxu0 %v3847_v56  ;;  %v3856_v0 = vld [vmem:[#allocation3 + $0xa0] sm:$0xff]   ;;  %v3860_v48 = vld [vmem:[#allocation3 + $0x98] sm:$0xff]   ;;  %v3863_v25 = vld [vmem:[#allocation3 + $0x10] sm:$0xff]   ;;  %p3881_p4 = pnand %p3880_p3, %p3874_p0 }
 0x4a1   :  { %3773 = vmatpush3.bf16.msra.mxu1 %v3848_v13  ;;  %3752 = vmatprep.subr.bf16.mxu0 %v3849_v59  ;;  %v3864_v31 = vld [vmem:[#allocation3 + $0x90] sm:$0xff]   ;;  %v3865_v49 = vld [vmem:[#allocation3 + $0x48] sm:$0xff]   ;;  %v3869_v21 = vld [vmem:[#allocation3 + $0x40] sm:$0xff]  }
 0x4a2   :  { %3774 = vmatprep.subr.bf16.mxu1 %v3850_v10  ;;  %v3866_v63 = vld [vmem:[#allocation3 + $0xc8] sm:$0xff]   ;;  %v3870_v34 = vld [vmem:[#allocation3 + $0xc0] sm:$0xff]  }
 0x4a3   :  { %v3867_v32 = vld [vmem:[#allocation3 + $0x8] sm:$0xff]   ;;  %v3871_v6 = vld [vmem:[#allocation3] sm:$0xff]  }
 0x4a4   :  { %3753 = vmatpush3.bf16.msra.mxu0 %v3851_v36  ;;  %v3868_v22 = vld [vmem:[#allocation3 + $0x88] sm:$0xff]   ;;  %v3872_v1 = vld [vmem:[#allocation3 + $0x80] sm:$0xff]  }
 0x4a5   :  { %3775 = vmatpush3.bf16.msra.mxu1 %v3852_v51  ;;  %3754 = vmatprep.subr.bf16.mxu0 %v3853_v61 }
 0x4a6   :  { %3776 = vmatprep.subr.bf16.mxu1 %v3854_v50 }
 0x4a8   :  { %3755 = vmatpush3.bf16.msra.mxu0 %v3855_v19 }
 0x4a9   :  { %3777 = vmatpush3.bf16.msra.mxu1 %v3856_v0  ;;  %3756 = vmatprep.subr.bf16.mxu0 %v3857_v3 }
 0x4aa   :  { %3778 = vmatprep.subr.bf16.mxu1 %v3858_v46 }
 0x4ac   :  { %3757 = vmatpush3.bf16.msra.mxu0 %v3859_v45 }
 0x4ad   :  { %3779 = vmatpush3.bf16.msra.mxu1 %v3860_v48  ;;  %3758 = vmatprep.subr.bf16.mxu0 %v3861_v37 }
 0x4ae   :  { %3780 = vmatprep.subr.bf16.mxu1 %v3862_v14 }
 0x4b0   :  { %3759 = vmatpush3.bf16.msra.mxu0 %v3863_v25 }
 0x4b1   :  { %3781 = vmatpush3.bf16.msra.mxu1 %v3864_v31  ;;  %3760 = vmatprep.subr.bf16.mxu0 %v3865_v49 }
 0x4b2   :  { %3782 = vmatprep.subr.bf16.mxu1 %v3866_v63 }
 0x4b4   :  { %3761 = vmatpush3.bf16.msra.mxu0 %v3867_v32 }
 0x4b5   :  { %3783 = vmatpush3.bf16.msra.mxu1 %v3868_v22  ;;  %3762 = vmatprep.subr.bf16.mxu0 %v3869_v21 }
 0x4b6   :  { %3784 = vmatprep.subr.bf16.mxu1 %v3870_v34 }
 0x4b8   :  { %3763 = vmatpush3.bf16.msra.mxu0 %v3871_v6 }
 0x4b9   :  { %3785 = vmatpush3.bf16.msra.mxu1 %v3872_v1 }
 0x4bb   :  { %3375 = vmatmul.mubr.bf16.vlgmr.msra.gmra.mxu0 %v3075_v9 }
 0x4bc   :  { %3415 = vmatmul.mubr.bf16.vlgmr.msra.gmra.mxu1 %v3077_v62 }
 0x4bd   :  { %3884 = shalt.err (!%p3881_p4)
}
 0x4be   :  { %3442 = dma.vmem_to_hbm [thread:$0]  %s3440_s20, 128, %s5795_s8, [#allocation8]   ;;  %v3713_v17 = vld [vmem:[%s5793_s6] ss:$0 sm:$0xff] }
 0x4bf   :  { %s3925_s26 = smov [#allocation5]  }
 0x4c0   :  { %s3429_s3 = sshll.u32 %s3925_s26, 4  ;;  %s3430_s3 = int_to_ptr.vmem [resolvable:$true] %s3429_s3 }
 0x4c1   :  { %s3893_s8 = scalar_lea.vmem %s3430_s3, 32  ;;  %p3898_p6 = scmp.lt.s32.totalorder %s3430_s3, %s3430_s3 }
 0x4c2   :  { %p3894_p5 = scmp.ne.s32.totalorder %s3430_s3, %s3893_s8  ;;  %p3899_p7 = scmp.lt.s32.totalorder %s3893_s8, %s3893_s8 }
 0x4c4   :  { %p3900_p8 = por %p3899_p7, %p3898_p6 }
 0x4c6   :  { %p3901_p9 = pnand %p3900_p8, %p3894_p5 }
 0x57b   :  { %v3764_v44 = vpop.f32.mrf.mxu0 }
 0x57c   :  { %v3786_v39 = vpop.f32.mrf.mxu1 }
 0x57d   :  { %v3765_v60 = vpop.f32.mrf.mxu0 }
 0x57e   :  { %v3766_v5 = vadd.f32 %v3765_v60, %v3764_v44  ;;  %v3787_v12 = vpop.f32.mrf.mxu1 }
 0x57f   :  { %v3767_v27 = vpop.f32.mrf.mxu0  ;;  %v3788_v11 = vadd.f32 %v3787_v12, %v3786_v39 }
 0x580   :  { %v3377_v40 = vadd.f32 %v3766_v5, %v3713_v17  ;;  %v3789_v29 = vpop.f32.mrf.mxu1 }
 0x581   :  { %v3768_v42 = vpop.f32.mrf.mxu0 }
 0x582   :  { %v3417_v26 = vadd.f32 %v3788_v11, %v3377_v40  ;;  %v3790_v33 = vpop.f32.mrf.mxu1 }
 0x584   :  { %3422 = vst [vmem:[#allocation5] sm:$0x3] %v3417_v26 }
 0x585   :  { %3904 = shalt.err (!%p3901_p9)
}
 0x586   :  { %3432 = dma.vmem_to_hbm [thread:$0]  %s3430_s3, 32, %s5794_s7, [#allocation6]  }
 0x587   :  { %3917 = dma.done.wait [#allocation6], 32  }
 0x588   :  { %3918 = vsyncadd [#allocation6], 4294967264 }
 0x589   :  { %3919 = dma.done.wait [#allocation8], 128  }
 0x58a   :  { %3920 = vsyncadd [#allocation8], 4294967168 }
 0x58b   :  { %3449 = vsyncpa [#allocation6], 1 }
 0x58c   :  { %3450 = vsyncpa [#allocation8], 1 }
 0x58d   :  { %3451 = vsyncmov [#allocation4] }
 0x590   :  { %s3452_s28 = vpop.sfrf %3451 }
 0x591   :  { %p3746_p10 = scmp.ne.s32.totalorder %s3452_s28, 0 }
 0x593   :  { %3456 = shalt.err (%p3746_p10)  }
 0x594   :  { %3458 = vsyncmov [#allocation4 + $0x1] }
 0x597   :  { %s3459_s29 = vpop.sfrf %3458 }
 0x598   :  { %p3747_p11 = scmp.ne.s32.totalorder %s3459_s29, 0 }
 0x59a   :  { %3463 = shalt.err (%p3747_p11)  }

</bundles_post_ra>
